<compile_context>
chip_gen: v6e
topology: v6e:2x2x1
jax: 0.10.0
libtpu: 0.0.40
codegen_flags: <defaults>
</compile_context>

<pallas_src>
import math
import functools

import jax
import jax.numpy as jnp
from jax import lax
from jax.experimental import pallas as pl
from jax.experimental.pallas import tpu as pltpu

NEG_INF = -1e30   # additive mask value (masked weights underflow to exactly 0 in softmax)
LN_EPS = 1e-6     # matches layer_norm_eps=1e-06 in the PyTorch module


# ----------------------------- in-kernel helpers (traced inside the Pallas body) -----------------------------

def _gelu(y):
    # exact gelu (PyTorch activation='gelu', approximate='none')
    return 0.5 * y * (1.0 + lax.erf(y * (1.0 / math.sqrt(2.0))))


def _ln(z, g, b, eps):
    # nn.LayerNorm over last dim (biased variance)
    mu = jnp.mean(z, axis=-1, keepdims=True)
    zc = z - mu
    var = jnp.mean(zc * zc, axis=-1, keepdims=True)
    return zc * lax.rsqrt(var + eps) * g + b


def _attention(q2, k2, v2, bias, wo, bo, nhead, dh):
    """q2: (Lq, E), k2/v2: (Lk, E), bias: (Lq, Lk) additive, wo: (E, E), bo: (1, E).
    Per-head attention with the output projection ACCUMULATED per head (no lane concat).
    Note: a fully-masked row yields a uniform distribution here (PyTorch would produce NaN)."""
    scale = 1.0 / math.sqrt(dh)
    out = None
    for h in range(nhead):                          # static unroll; everything VMEM/vreg resident
        sl = slice(h * dh, (h + 1) * dh)            # static, sublane/lane-aligned slices
        s = jnp.dot(q2[:, sl], k2[:, sl].T, preferred_element_type=jnp.float32) * scale + bias
        s = s - jnp.max(s, axis=-1, keepdims=True)
        p = jnp.exp(s)
        p = p / jnp.sum(p, axis=-1, keepdims=True)  # exact softmax (no approx reciprocal)
        oh = jnp.dot(p, v2[:, sl], preferred_element_type=jnp.float32)        # (Lq, dh)
        contrib = jnp.dot(oh, wo[sl, :], preferred_element_type=jnp.float32)  # (Lq, E)
        out = contrib if out is None else out + contrib
    return out + bo


def _ffn(x, w1, b1, w2, b2):
    h = jnp.dot(x, w1, preferred_element_type=jnp.float32) + b1
    h = _gelu(h)
    return jnp.dot(h, w2, preferred_element_type=jnp.float32) + b2


# ----------------------------- the single fused kernel -----------------------------

def _seq2seq_kernel(
        # per-batch data (grid axis 0 selects the batch element)
        src_ref, tgt_ref, ebias_ref, sbias_ref, cbias_ref,
        # encoder: stacked per-layer weights (leading dim = layer index)
        e_wqkv, e_bqkv, e_wo, e_bo, e_ln1g, e_ln1b, e_w1, e_b1, e_w2, e_b2, e_ln2g, e_ln2b,
        enc_lng, enc_lnb,
        # decoder: stacked per-layer weights
        d_sa_wqkv, d_sa_bqkv, d_sa_wo, d_sa_bo, d_ln1g, d_ln1b,
        d_ca_wq, d_ca_bq, d_ca_wkv, d_ca_bkv, d_ca_wo, d_ca_bo, d_ln2g, d_ln2b,
        d_w1, d_b1, d_w2, d_b2, d_ln3g, d_ln3b,
        dec_lng, dec_lnb,
        gen_w, gen_b,
        # output
        o_ref,
        *, num_enc, num_dec, nhead, eps):
    x = src_ref[0]                                  # (L, E)
    ebias = ebias_ref[0]                            # (L, L)
    E = x.shape[-1]
    dh = E // nhead

    # ---------------- encoder stack (post-norm) ----------------
    for l in range(num_enc):                        # static unroll over layers
        qkv = jnp.dot(x, e_wqkv[l], preferred_element_type=jnp.float32) + e_bqkv[l]
        att = _attention(qkv[:, :E], qkv[:, E:2 * E], qkv[:, 2 * E:], ebias,
                         e_wo[l], e_bo[l], nhead, dh)
        x = _ln(x + att, e_ln1g[l], e_ln1b[l], eps)
        y = _ffn(x, e_w1[l], e_b1[l], e_w2[l], e_b2[l])
        x = _ln(x + y, e_ln2g[l], e_ln2b[l], eps)
    mem = _ln(x, enc_lng[...], enc_lnb[...], eps)   # encoder final LayerNorm (memory, VMEM only)

    # ---------------- decoder stack (post-norm) ----------------
    y = tgt_ref[0]                                  # (T, E)
    sbias = sbias_ref[0]                            # (T, T)
    cbias = cbias_ref[0]                            # (T, L)
    for l in range(num_dec):
        # self-attention (fused QKV)
        qkv = jnp.dot(y, d_sa_wqkv[l], preferred_element_type=jnp.float32) + d_sa_bqkv[l]
        att = _attention(qkv[:, :E], qkv[:, E:2 * E], qkv[:, 2 * E:], sbias,
                         d_sa_wo[l], d_sa_bo[l], nhead, dh)
        y = _ln(y + att, d_ln1g[l], d_ln1b[l], eps)
        # cross-attention (Q from decoder, fused KV from encoder memory)
        q = jnp.dot(y, d_ca_wq[l], preferred_element_type=jnp.float32) + d_ca_bq[l]
        kv = jnp.dot(mem, d_ca_wkv[l], preferred_element_type=jnp.float32) + d_ca_bkv[l]
        att = _attention(q, kv[:, :E], kv[:, E:], cbias,
                         d_ca_wo[l], d_ca_bo[l], nhead, dh)
        y = _ln(y + att, d_ln2g[l], d_ln2b[l], eps)
        # FFN
        z = _ffn(y, d_w1[l], d_b1[l], d_w2[l], d_b2[l])
        y = _ln(y + z, d_ln3g[l], d_ln3b[l], eps)

    # decoder final LayerNorm + generator; Vp padded to 128 -> lane-dense (unmasked) store
    y = _ln(y, dec_lng[...], dec_lnb[...], eps)
    o_ref[0] = jnp.dot(y, gen_w[...], preferred_element_type=jnp.float32) + gen_b[...]


# weight operand order (shared by the kernel signature and the wrapper)
_WEIGHT_NAMES = [
    "e_wqkv", "e_bqkv", "e_wo", "e_bo", "e_ln1g", "e_ln1b",
    "e_w1", "e_b1", "e_w2", "e_b2", "e_ln2g", "e_ln2b",
    "enc_lng", "enc_lnb",
    "d_sa_wqkv", "d_sa_bqkv", "d_sa_wo", "d_sa_bo", "d_ln1g", "d_ln1b",
    "d_ca_wq", "d_ca_bq", "d_ca_wkv", "d_ca_bkv", "d_ca_wo", "d_ca_bo", "d_ln2g", "d_ln2b",
    "d_w1", "d_b1", "d_w2", "d_b2", "d_ln3g", "d_ln3b",
    "dec_lng", "dec_lnb",
    "gen_w", "gen_b",
]


def transformer_fused(src_emb, tgt_emb, enc_bias, self_bias, cross_bias, pp, cfg):
    """src_emb: (B,L,E), tgt_emb: (B,T,E), biases: (B,L,L)/(B,T,T)/(B,T,L). Returns (B,T,Vp)."""
    B, L, E = src_emb.shape
    T = tgt_emb.shape[1]
    Vp = pp["gen_w"].shape[1]

    data = [src_emb, tgt_emb, enc_bias, self_bias, cross_bias]
    data_specs = [
        pl.BlockSpec((1, L, E), lambda i: (i, 0, 0)),
        pl.BlockSpec((1, T, E), lambda i: (i, 0, 0)),
        pl.BlockSpec((1, L, L), lambda i: (i, 0, 0)),
        pl.BlockSpec((1, T, T), lambda i: (i, 0, 0)),
        pl.BlockSpec((1, T, L), lambda i: (i, 0, 0)),
    ]
    weights = [pp[k] for k in _WEIGHT_NAMES]
    # Whole-array blocks with constant index maps: each weight is DMA'd into VMEM exactly once
    # (block index never changes across the batch grid).
    w_specs = [pl.BlockSpec(w.shape, lambda i, _nd=w.ndim: (0,) * _nd) for w in weights]

    return pl.pallas_call(
        functools.partial(_seq2seq_kernel,
                          num_enc=cfg["num_encoder_layers"],
                          num_dec=cfg["num_decoder_layers"],
                          nhead=cfg["nhead"], eps=LN_EPS),
        out_shape=jax.ShapeDtypeStruct((B, T, Vp), jnp.float32),
        grid=(B,),
        in_specs=data_specs + w_specs,
        out_specs=pl.BlockSpec((1, T, Vp), lambda i: (i, 0, 0)),
        compiler_params=pltpu.CompilerParams(dimension_semantics=("parallel",)),
    )(*data, *weights)


# ----------------------------- one-time parameter packing (hoisted out of the forward) -----------------------------

def pack_params(params, cfg):
    """Stack per-layer weights along a leading layer axis, reshape vectors to (.., 1, N),
    and pad the generator to a 128-lane vocab — all outside the per-call forward path."""
    E = cfg["emb_size"]
    enc, dec = params["enc_layers"], params["dec_layers"]

    def s2(layers, k):   # (nl, D1, D2)
        return jnp.stack([lp[k] for lp in layers], axis=0)

    def s1(layers, k):   # (nl, 1, N)
        return jnp.stack([lp[k] for lp in layers], axis=0)[:, None, :]

    pp = {
        "e_wqkv": s2(enc, "wqkv"), "e_bqkv": s1(enc, "bqkv"),
        "e_wo": s2(enc, "wo"), "e_bo": s1(enc, "bo"),
        "e_ln1g": s1(enc, "ln1_g"), "e_ln1b": s1(enc, "ln1_b"),
        "e_w1": s2(enc, "w1"), "e_b1": s1(enc, "b1"),
        "e_w2": s2(enc, "w2"), "e_b2": s1(enc, "b2"),
        "e_ln2g": s1(enc, "ln2_g"), "e_ln2b": s1(enc, "ln2_b"),
        "enc_lng": params["enc_ln_g"].reshape(1, E), "enc_lnb": params["enc_ln_b"].reshape(1, E),
        "d_sa_wqkv": s2(dec, "sa_wqkv"), "d_sa_bqkv": s1(dec, "sa_bqkv"),
        "d_sa_wo": s2(dec, "sa_wo"), "d_sa_bo": s1(dec, "sa_bo"),
        "d_ln1g": s1(dec, "ln1_g"), "d_ln1b": s1(dec, "ln1_b"),
        "d_ca_wq": s2(dec, "ca_wq"), "d_ca_bq": s1(dec, "ca_bq"),
        "d_ca_wkv": s2(dec, "ca_wkv"), "d_ca_bkv": s1(dec, "ca_bkv"),
        "d_ca_wo": s2(dec, "ca_wo"), "d_ca_bo": s1(dec, "ca_bo"),
        "d_ln2g": s1(dec, "ln2_g"), "d_ln2b": s1(dec, "ln2_b"),
        "d_w1": s2(dec, "w1"), "d_b1": s1(dec, "b1"),
        "d_w2": s2(dec, "w2"), "d_b2": s1(dec, "b2"),
        "d_ln3g": s1(dec, "ln3_g"), "d_ln3b": s1(dec, "ln3_b"),
        "dec_lng": params["dec_ln_g"].reshape(1, E), "dec_lnb": params["dec_ln_b"].reshape(1, E),
    }
    V = params["gen_w"].shape[1]
    Vp = ((V + 127) // 128) * 128
    pp["gen_w"] = jnp.pad(params["gen_w"], ((0, 0), (0, Vp - V)))
    pp["gen_b"] = jnp.pad(params["gen_b"], (0, Vp - V)).reshape(1, Vp)
    # embedding tables + positional encoding (used by the tiny JAX glue)
    pp["src_emb"] = params["src_emb"]
    pp["tgt_emb"] = params["tgt_emb"]
    pp["pe"] = params["pe"]
    return pp


# ----------------------------- model glue (plain JAX, tiny) -----------------------------

def make_bias(attn_mask, key_padding_mask, B, Lq, Lk):
    """Combine (Lq,Lk) float attn_mask and (B,Lk) bool key_padding_mask into (B, Lq, Lk).
    No per-head replication (the kernel broadcasts over heads)."""
    bias = jnp.zeros((B, Lq, Lk), jnp.float32)
    if attn_mask is not None:
        bias = bias + attn_mask[None, :, :].astype(jnp.float32)
    if key_padding_mask is not None:
        bias = bias + jnp.where(key_padding_mask[:, None, :], NEG_INF, 0.0).astype(jnp.float32)
    return bias


def positional_encoding_table(emb_dim, max_length=1000):
    den = jnp.exp(-jnp.arange(0, emb_dim, 2, dtype=jnp.float32) * math.log(10000.0) / emb_dim)
    pos = jnp.arange(0, max_length, dtype=jnp.float32).reshape(max_length, 1)
    pe = jnp.zeros((max_length, emb_dim), jnp.float32)
    pe = pe.at[:, 0::2].set(jnp.sin(pos * den))
    pe = pe.at[:, 1::2].set(jnp.cos(pos * den))
    return pe  # (max_length, E)


def seq2seq_forward(pp, cfg, src, trg, src_mask, tgt_mask,
                    src_padding_mask, tgt_padding_mask, memory_key_padding_mask):
    """src/trg: (L,B)/(T,B) int token ids; masks follow PyTorch conventions
    (float additive attn masks (L,L)/(T,T), bool key_padding masks (B, L)).
    Returns logits (T, B, tgt_vocab_size)."""
    E = cfg["emb_size"]
    L, B = src.shape
    T = trg.shape[0]
    pe = pp["pe"]

    # TokenEmbedding * sqrt(E) + PositionalEncoding (dropout_rate=0.0 -> identity).
    # TODO(synk): embedding gather + PE add stay as tiny XLA glue ops; dropout modeled in eval mode.
    src_emb = jnp.take(pp["src_emb"], src.T, axis=0) * math.sqrt(E) + pe[:L][None, :, :]
    tgt_emb = jnp.take(pp["tgt_emb"], trg.T, axis=0) * math.sqrt(E) + pe[:T][None, :, :]

    enc_bias = make_bias(src_mask, src_padding_mask, B, L, L)
    self_bias = make_bias(tgt_mask, tgt_padding_mask, B, T, T)
    cross_bias = make_bias(None, memory_key_padding_mask, B, T, L)

    # ONE fused Pallas kernel: encoder stack + enc-LN + decoder stack + dec-LN + generator.
    logits_pad = transformer_fused(src_emb, tgt_emb, enc_bias, self_bias, cross_bias, pp, cfg)

    V = cfg["tgt_vocab_size"]
    logits = logits_pad[:, :, :V]               # (B, T, V)  drop the 128-lane padding
    return jnp.transpose(logits, (1, 0, 2))     # (T, B, V)


# ----------------------------- deterministic init -----------------------------

def _dense_init(key, shape, scale=0.02):
    return scale * jax.random.normal(key, shape, jnp.float32)


def init_params(key, cfg):
    E, F = cfg["emb_size"], cfg["dim_feedforward"]
    keys = iter(jax.random.split(key, 256))

    def ones(n):
        return jnp.ones((n,), jnp.float32)

    def zeros(n):
        return jnp.zeros((n,), jnp.float32)

    # Fused QKV weight layout: columns [q | k | v] == PyTorch in_proj_weight.T split row-major thirds.
    def enc_layer():
        return {
            "wqkv": _dense_init(next(keys), (E, 3 * E)), "bqkv": zeros(3 * E),
            "wo": _dense_init(next(keys), (E, E)), "bo": zeros(E),
            "ln1_g": ones(E), "ln1_b": zeros(E),
            "w1": _dense_init(next(keys), (E, F)), "b1": zeros(F),
            "w2": _dense_init(next(keys), (F, E)), "b2": zeros(E),
            "ln2_g": ones(E), "ln2_b": zeros(E),
        }

    def dec_layer():
        return {
            "sa_wqkv": _dense_init(next(keys), (E, 3 * E)), "sa_bqkv": zeros(3 * E),
            "sa_wo": _dense_init(next(keys), (E, E)), "sa_bo": zeros(E),
            "ln1_g": ones(E), "ln1_b": zeros(E),
            "ca_wq": _dense_init(next(keys), (E, E)), "ca_bq": zeros(E),
            "ca_wkv": _dense_init(next(keys), (E, 2 * E)), "ca_bkv": zeros(2 * E),
            "ca_wo": _dense_init(next(keys), (E, E)), "ca_bo": zeros(E),
            "ln2_g": ones(E), "ln2_b": zeros(E),
            "w1": _dense_init(next(keys), (E, F)), "b1": zeros(F),
            "w2": _dense_init(next(keys), (F, E)), "b2": zeros(E),
            "ln3_g": ones(E), "ln3_b": zeros(E),
        }

    return {
        "src_emb": _dense_init(next(keys), (cfg["src_vocab_size"], E), scale=1.0),
        "tgt_emb": _dense_init(next(keys), (cfg["tgt_vocab_size"], E), scale=1.0),
        "pe": positional_encoding_table(E),
        "enc_layers": [enc_layer() for _ in range(cfg["num_encoder_layers"])],
        "dec_layers": [dec_layer() for _ in range(cfg["num_decoder_layers"])],
        "enc_ln_g": ones(E), "enc_ln_b": zeros(E),
        "dec_ln_g": ones(E), "dec_ln_b": zeros(E),
        "gen_w": _dense_init(next(keys), (E, cfg["tgt_vocab_size"])),
        "gen_b": zeros(cfg["tgt_vocab_size"]),
    }


# ----------------------------- main -----------------------------

if __name__ == "__main__":
    cfg = dict(
        num_encoder_layers=2,
        num_decoder_layers=2,
        emb_size=32,
        nhead=4,
        src_vocab_size=53,
        tgt_vocab_size=57,
        dim_feedforward=64,
        dropout=0.1,  # modeled as eval-mode identity
    )
    L, T, B = 8, 8, 2

    root = jax.random.PRNGKey(0)
    k_params, k_src, k_trg = jax.random.split(root, 3)
    params = init_params(k_params, cfg)
    packed = pack_params(params, cfg)   # one-time: stack layer weights, pad generator to 128 lanes

    src = jax.random.randint(k_src, (L, B), 0, cfg["src_vocab_size"], dtype=jnp.int32)
    trg = jax.random.randint(k_trg, (T, B), 0, cfg["tgt_vocab_size"], dtype=jnp.int32)

    src_mask = jnp.zeros((L, L), jnp.float32)
    # causal mask like Transformer.generate_square_subsequent_mask
    tgt_mask = jnp.where(jnp.triu(jnp.ones((T, T), bool), k=1), NEG_INF, 0.0).astype(jnp.float32)

    # key padding masks are (B, L) bool per PyTorch MHA convention (True = padded)
    src_padding_mask = jnp.zeros((B, L), bool).at[1, L - 1].set(True)
    tgt_padding_mask = jnp.zeros((B, T), bool)
    memory_key_padding_mask = src_padding_mask

    forward = jax.jit(lambda pp, *a: seq2seq_forward(pp, cfg, *a))
    out = forward(packed, src, trg, src_mask, tgt_mask,
                  src_padding_mask, tgt_padding_mask, memory_key_padding_mask)
    out = jax.block_until_ready(out)

    assert out.shape == (T, B, cfg["tgt_vocab_size"])
    assert bool(jnp.all(jnp.isfinite(out)))
    print("KERNEL_OK")
</pallas_src>

<mosaic_0001>
module attributes {stable_mosaic.version = 11 : i64} {
  func.func @_seq2seq_kernel(%arg0: i32, %arg1: memref<1x8x32xf32, #tpu.memory_space<vmem>>, %arg2: memref<1x8x32xf32, #tpu.memory_space<vmem>>, %arg3: memref<1x8x8xf32, #tpu.memory_space<vmem>>, %arg4: memref<1x8x8xf32, #tpu.memory_space<vmem>>, %arg5: memref<1x8x8xf32, #tpu.memory_space<vmem>>, %arg6: memref<2x32x96xf32, #tpu.memory_space<vmem>>, %arg7: memref<2x1x96xf32, #tpu.memory_space<vmem>>, %arg8: memref<2x32x32xf32, #tpu.memory_space<vmem>>, %arg9: memref<2x1x32xf32, #tpu.memory_space<vmem>>, %arg10: memref<2x1x32xf32, #tpu.memory_space<vmem>>, %arg11: memref<2x1x32xf32, #tpu.memory_space<vmem>>, %arg12: memref<2x32x64xf32, #tpu.memory_space<vmem>>, %arg13: memref<2x1x64xf32, #tpu.memory_space<vmem>>, %arg14: memref<2x64x32xf32, #tpu.memory_space<vmem>>, %arg15: memref<2x1x32xf32, #tpu.memory_space<vmem>>, %arg16: memref<2x1x32xf32, #tpu.memory_space<vmem>>, %arg17: memref<2x1x32xf32, #tpu.memory_space<vmem>>, %arg18: memref<1x32xf32, #tpu.memory_space<vmem>>, %arg19: memref<1x32xf32, #tpu.memory_space<vmem>>, %arg20: memref<2x32x96xf32, #tpu.memory_space<vmem>>, %arg21: memref<2x1x96xf32, #tpu.memory_space<vmem>>, %arg22: memref<2x32x32xf32, #tpu.memory_space<vmem>>, %arg23: memref<2x1x32xf32, #tpu.memory_space<vmem>>, %arg24: memref<2x1x32xf32, #tpu.memory_space<vmem>>, %arg25: memref<2x1x32xf32, #tpu.memory_space<vmem>>, %arg26: memref<2x32x32xf32, #tpu.memory_space<vmem>>, %arg27: memref<2x1x32xf32, #tpu.memory_space<vmem>>, %arg28: memref<2x32x64xf32, #tpu.memory_space<vmem>>, %arg29: memref<2x1x64xf32, #tpu.memory_space<vmem>>, %arg30: memref<2x32x32xf32, #tpu.memory_space<vmem>>, %arg31: memref<2x1x32xf32, #tpu.memory_space<vmem>>, %arg32: memref<2x1x32xf32, #tpu.memory_space<vmem>>, %arg33: memref<2x1x32xf32, #tpu.memory_space<vmem>>, %arg34: memref<2x32x64xf32, #tpu.memory_space<vmem>>, %arg35: memref<2x1x64xf32, #tpu.memory_space<vmem>>, %arg36: memref<2x64x32xf32, #tpu.memory_space<vmem>>, %arg37: memref<2x1x32xf32, #tpu.memory_space<vmem>>, %arg38: memref<2x1x32xf32, #tpu.memory_space<vmem>>, %arg39: memref<2x1x32xf32, #tpu.memory_space<vmem>>, %arg40: memref<1x32xf32, #tpu.memory_space<vmem>>, %arg41: memref<1x32xf32, #tpu.memory_space<vmem>>, %arg42: memref<32x128xf32, #tpu.memory_space<vmem>>, %arg43: memref<1x128xf32, #tpu.memory_space<vmem>>, %arg44: memref<1x8x128xf32, #tpu.memory_space<vmem>>) attributes {dimension_semantics = [#tpu.dimension_semantics<parallel>], iteration_bounds = array<i64: 2>, scalar_prefetch = 0 : i64, scratch_operands = 0 : i64, tpu.core_type = #tpu.core_type<tc>, window_params = [{transform_indices = @transform_0, window_bounds = array<i64: 1, 8, 32>}, {transform_indices = @transform_1, window_bounds = array<i64: 1, 8, 32>}, {transform_indices = @transform_2, window_bounds = array<i64: 1, 8, 8>}, {transform_indices = @transform_3, window_bounds = array<i64: 1, 8, 8>}, {transform_indices = @transform_4, window_bounds = array<i64: 1, 8, 8>}, {pipeline_mode = #tpu.pipeline_mode<synchronous>, transform_indices = @transform_5, window_bounds = array<i64: 2, 32, 96>}, {pipeline_mode = #tpu.pipeline_mode<synchronous>, transform_indices = @transform_6, window_bounds = array<i64: 2, 1, 96>}, {pipeline_mode = #tpu.pipeline_mode<synchronous>, transform_indices = @transform_7, window_bounds = array<i64: 2, 32, 32>}, {pipeline_mode = #tpu.pipeline_mode<synchronous>, transform_indices = @transform_8, window_bounds = array<i64: 2, 1, 32>}, {pipeline_mode = #tpu.pipeline_mode<synchronous>, transform_indices = @transform_9, window_bounds = array<i64: 2, 1, 32>}, {pipeline_mode = #tpu.pipeline_mode<synchronous>, transform_indices = @transform_10, window_bounds = array<i64: 2, 1, 32>}, {pipeline_mode = #tpu.pipeline_mode<synchronous>, transform_indices = @transform_11, window_bounds = array<i64: 2, 32, 64>}, {pipeline_mode = #tpu.pipeline_mode<synchronous>, transform_indices = @transform_12, window_bounds = array<i64: 2, 1, 64>}, {pipeline_mode = #tpu.pipeline_mode<synchronous>, transform_indices = @transform_13, window_bounds = array<i64: 2, 64, 32>}, {pipeline_mode = #tpu.pipeline_mode<synchronous>, transform_indices = @transform_14, window_bounds = array<i64: 2, 1, 32>}, {pipeline_mode = #tpu.pipeline_mode<synchronous>, transform_indices = @transform_15, window_bounds = array<i64: 2, 1, 32>}, {pipeline_mode = #tpu.pipeline_mode<synchronous>, transform_indices = @transform_16, window_bounds = array<i64: 2, 1, 32>}, {pipeline_mode = #tpu.pipeline_mode<synchronous>, transform_indices = @transform_17, window_bounds = array<i64: 1, 32>}, {pipeline_mode = #tpu.pipeline_mode<synchronous>, transform_indices = @transform_18, window_bounds = array<i64: 1, 32>}, {pipeline_mode = #tpu.pipeline_mode<synchronous>, transform_indices = @transform_19, window_bounds = array<i64: 2, 32, 96>}, {pipeline_mode = #tpu.pipeline_mode<synchronous>, transform_indices = @transform_20, window_bounds = array<i64: 2, 1, 96>}, {pipeline_mode = #tpu.pipeline_mode<synchronous>, transform_indices = @transform_21, window_bounds = array<i64: 2, 32, 32>}, {pipeline_mode = #tpu.pipeline_mode<synchronous>, transform_indices = @transform_22, window_bounds = array<i64: 2, 1, 32>}, {pipeline_mode = #tpu.pipeline_mode<synchronous>, transform_indices = @transform_23, window_bounds = array<i64: 2, 1, 32>}, {pipeline_mode = #tpu.pipeline_mode<synchronous>, transform_indices = @transform_24, window_bounds = array<i64: 2, 1, 32>}, {pipeline_mode = #tpu.pipeline_mode<synchronous>, transform_indices = @transform_25, window_bounds = array<i64: 2, 32, 32>}, {pipeline_mode = #tpu.pipeline_mode<synchronous>, transform_indices = @transform_26, window_bounds = array<i64: 2, 1, 32>}, {pipeline_mode = #tpu.pipeline_mode<synchronous>, transform_indices = @transform_27, window_bounds = array<i64: 2, 32, 64>}, {pipeline_mode = #tpu.pipeline_mode<synchronous>, transform_indices = @transform_28, window_bounds = array<i64: 2, 1, 64>}, {pipeline_mode = #tpu.pipeline_mode<synchronous>, transform_indices = @transform_29, window_bounds = array<i64: 2, 32, 32>}, {pipeline_mode = #tpu.pipeline_mode<synchronous>, transform_indices = @transform_30, window_bounds = array<i64: 2, 1, 32>}, {pipeline_mode = #tpu.pipeline_mode<synchronous>, transform_indices = @transform_31, window_bounds = array<i64: 2, 1, 32>}, {pipeline_mode = #tpu.pipeline_mode<synchronous>, transform_indices = @transform_32, window_bounds = array<i64: 2, 1, 32>}, {pipeline_mode = #tpu.pipeline_mode<synchronous>, transform_indices = @transform_33, window_bounds = array<i64: 2, 32, 64>}, {pipeline_mode = #tpu.pipeline_mode<synchronous>, transform_indices = @transform_34, window_bounds = array<i64: 2, 1, 64>}, {pipeline_mode = #tpu.pipeline_mode<synchronous>, transform_indices = @transform_35, window_bounds = array<i64: 2, 64, 32>}, {pipeline_mode = #tpu.pipeline_mode<synchronous>, transform_indices = @transform_36, window_bounds = array<i64: 2, 1, 32>}, {pipeline_mode = #tpu.pipeline_mode<synchronous>, transform_indices = @transform_37, window_bounds = array<i64: 2, 1, 32>}, {pipeline_mode = #tpu.pipeline_mode<synchronous>, transform_indices = @transform_38, window_bounds = array<i64: 2, 1, 32>}, {pipeline_mode = #tpu.pipeline_mode<synchronous>, transform_indices = @transform_39, window_bounds = array<i64: 1, 32>}, {pipeline_mode = #tpu.pipeline_mode<synchronous>, transform_indices = @transform_40, window_bounds = array<i64: 1, 32>}, {pipeline_mode = #tpu.pipeline_mode<synchronous>, transform_indices = @transform_41, window_bounds = array<i64: 32, 128>}, {pipeline_mode = #tpu.pipeline_mode<synchronous>, transform_indices = @transform_42, window_bounds = array<i64: 1, 128>}, {transform_indices = @transform_43, window_bounds = array<i64: 1, 8, 128>}]} {
    %c0 = arith.constant 0 : index
    %c0_0 = arith.constant 0 : index
    %c0_1 = arith.constant 0 : index
    %0 = vector.load %arg1[%c0, %c0_0, %c0_1] : memref<1x8x32xf32, #tpu.memory_space<vmem>>, vector<1x8x32xf32>
    %1 = vector.shape_cast %0 : vector<1x8x32xf32> to vector<8x32xf32>
    %c0_2 = arith.constant 0 : index
    %c0_3 = arith.constant 0 : index
    %c0_4 = arith.constant 0 : index
    %2 = vector.load %arg3[%c0_2, %c0_3, %c0_4] : memref<1x8x8xf32, #tpu.memory_space<vmem>>, vector<1x8x8xf32>
    %3 = vector.shape_cast %2 : vector<1x8x8xf32> to vector<8x8xf32>
    %c0_5 = arith.constant 0 : index
    %c0_6 = arith.constant 0 : index
    %c0_7 = arith.constant 0 : index
    %4 = vector.load %arg6[%c0_5, %c0_6, %c0_7] : memref<2x32x96xf32, #tpu.memory_space<vmem>>, vector<1x32x96xf32>
    %5 = vector.shape_cast %4 : vector<1x32x96xf32> to vector<32x96xf32>
    %cst = arith.constant dense<0.000000e+00> : vector<8x96xf32>
    %6 = tpu.matmul %1, %5, %cst {dimension_numbers = #tpu.dot_dimension_numbers<[1], [0], [0], [1], [0, 0, 1, 1], [], []>} : vector<8x32xf32>, vector<32x96xf32>, vector<8x96xf32> -> vector<8x96xf32>
    %c0_8 = arith.constant 0 : index
    %c0_9 = arith.constant 0 : index
    %c0_10 = arith.constant 0 : index
    %7 = vector.load %arg7[%c0_8, %c0_9, %c0_10] : memref<2x1x96xf32, #tpu.memory_space<vmem>>, vector<1x1x96xf32>
    %8 = vector.shape_cast %7 : vector<1x1x96xf32> to vector<1x96xf32>
    %9 = vector.broadcast %8 : vector<1x96xf32> to vector<8x96xf32>
    %10 = arith.addf %6, %9 : vector<8x96xf32>
    %11 = vector.extract_strided_slice %10 {offsets = [0, 0], sizes = [8, 32], strides = [1, 1]} : vector<8x96xf32> to vector<8x32xf32>
    %12 = vector.extract_strided_slice %10 {offsets = [0, 32], sizes = [8, 32], strides = [1, 1]} : vector<8x96xf32> to vector<8x32xf32>
    %13 = vector.extract_strided_slice %10 {offsets = [0, 64], sizes = [8, 32], strides = [1, 1]} : vector<8x96xf32> to vector<8x32xf32>
    %c0_11 = arith.constant 0 : index
    %c0_12 = arith.constant 0 : index
    %c0_13 = arith.constant 0 : index
    %14 = vector.load %arg8[%c0_11, %c0_12, %c0_13] : memref<2x32x32xf32, #tpu.memory_space<vmem>>, vector<1x32x32xf32>
    %15 = vector.shape_cast %14 : vector<1x32x32xf32> to vector<32x32xf32>
    %c0_14 = arith.constant 0 : index
    %c0_15 = arith.constant 0 : index
    %c0_16 = arith.constant 0 : index
    %16 = vector.load %arg9[%c0_14, %c0_15, %c0_16] : memref<2x1x32xf32, #tpu.memory_space<vmem>>, vector<1x1x32xf32>
    %17 = vector.shape_cast %16 : vector<1x1x32xf32> to vector<1x32xf32>
    %18 = vector.extract_strided_slice %11 {offsets = [0, 0], sizes = [8, 8], strides = [1, 1]} : vector<8x32xf32> to vector<8x8xf32>
    %19 = vector.extract_strided_slice %12 {offsets = [0, 0], sizes = [8, 8], strides = [1, 1]} : vector<8x32xf32> to vector<8x8xf32>
    %20 = tpu.transpose %19, [1, 0] : vector<8x8xf32> -> vector<8x8xf32>
    %cst_17 = arith.constant dense<0.000000e+00> : vector<8x8xf32>
    %21 = tpu.matmul %18, %20, %cst_17 {dimension_numbers = #tpu.dot_dimension_numbers<[1], [0], [0], [1], [0, 0, 1, 1], [], []>} : vector<8x8xf32>, vector<8x8xf32>, vector<8x8xf32> -> vector<8x8xf32>
    %cst_18 = arith.constant 0.353553385 : f32
    %22 = vector.broadcast %cst_18 : f32 to vector<8x8xf32>
    %23 = arith.mulf %21, %22 : vector<8x8xf32>
    %24 = arith.addf %23, %3 : vector<8x8xf32>
    %cst_19 = arith.constant dense<0xFF800000> : vector<8xf32>
    %25 = vector.multi_reduction <maximumf>, %24, %cst_19 [1] : vector<8x8xf32> to vector<8xf32>
    %26 = vector.shape_cast %25 : vector<8xf32> to vector<8x1xf32>
    %27 = vector.broadcast %26 : vector<8x1xf32> to vector<8x8xf32>
    %28 = arith.subf %24, %27 : vector<8x8xf32>
    %29 = math.exp %28 : vector<8x8xf32>
    %cst_20 = arith.constant dense<0.000000e+00> : vector<8xf32>
    %30 = vector.multi_reduction <add>, %29, %cst_20 [1] : vector<8x8xf32> to vector<8xf32>
    %31 = vector.shape_cast %30 : vector<8xf32> to vector<8x1xf32>
    %32 = vector.broadcast %31 : vector<8x1xf32> to vector<8x8xf32>
    %33 = arith.divf %29, %32 : vector<8x8xf32>
    %34 = vector.extract_strided_slice %13 {offsets = [0, 0], sizes = [8, 8], strides = [1, 1]} : vector<8x32xf32> to vector<8x8xf32>
    %cst_21 = arith.constant dense<0.000000e+00> : vector<8x8xf32>
    %35 = tpu.matmul %33, %34, %cst_21 {dimension_numbers = #tpu.dot_dimension_numbers<[1], [0], [0], [1], [0, 0, 1, 1], [], []>} : vector<8x8xf32>, vector<8x8xf32>, vector<8x8xf32> -> vector<8x8xf32>
    %36 = vector.extract_strided_slice %15 {offsets = [0, 0], sizes = [8, 32], strides = [1, 1]} : vector<32x32xf32> to vector<8x32xf32>
    %cst_22 = arith.constant dense<0.000000e+00> : vector<8x32xf32>
    %37 = tpu.matmul %35, %36, %cst_22 {dimension_numbers = #tpu.dot_dimension_numbers<[1], [0], [0], [1], [0, 0, 1, 1], [], []>} : vector<8x8xf32>, vector<8x32xf32>, vector<8x32xf32> -> vector<8x32xf32>
    %38 = vector.extract_strided_slice %11 {offsets = [0, 8], sizes = [8, 8], strides = [1, 1]} : vector<8x32xf32> to vector<8x8xf32>
    %39 = vector.extract_strided_slice %12 {offsets = [0, 8], sizes = [8, 8], strides = [1, 1]} : vector<8x32xf32> to vector<8x8xf32>
    %40 = tpu.transpose %39, [1, 0] : vector<8x8xf32> -> vector<8x8xf32>
    %cst_23 = arith.constant dense<0.000000e+00> : vector<8x8xf32>
    %41 = tpu.matmul %38, %40, %cst_23 {dimension_numbers = #tpu.dot_dimension_numbers<[1], [0], [0], [1], [0, 0, 1, 1], [], []>} : vector<8x8xf32>, vector<8x8xf32>, vector<8x8xf32> -> vector<8x8xf32>
    %cst_24 = arith.constant 0.353553385 : f32
    %42 = vector.broadcast %cst_24 : f32 to vector<8x8xf32>
    %43 = arith.mulf %41, %42 : vector<8x8xf32>
    %44 = arith.addf %43, %3 : vector<8x8xf32>
    %cst_25 = arith.constant dense<0xFF800000> : vector<8xf32>
    %45 = vector.multi_reduction <maximumf>, %44, %cst_25 [1] : vector<8x8xf32> to vector<8xf32>
    %46 = vector.shape_cast %45 : vector<8xf32> to vector<8x1xf32>
    %47 = vector.broadcast %46 : vector<8x1xf32> to vector<8x8xf32>
    %48 = arith.subf %44, %47 : vector<8x8xf32>
    %49 = math.exp %48 : vector<8x8xf32>
    %cst_26 = arith.constant dense<0.000000e+00> : vector<8xf32>
    %50 = vector.multi_reduction <add>, %49, %cst_26 [1] : vector<8x8xf32> to vector<8xf32>
    %51 = vector.shape_cast %50 : vector<8xf32> to vector<8x1xf32>
    %52 = vector.broadcast %51 : vector<8x1xf32> to vector<8x8xf32>
    %53 = arith.divf %49, %52 : vector<8x8xf32>
    %54 = vector.extract_strided_slice %13 {offsets = [0, 8], sizes = [8, 8], strides = [1, 1]} : vector<8x32xf32> to vector<8x8xf32>
    %cst_27 = arith.constant dense<0.000000e+00> : vector<8x8xf32>
    %55 = tpu.matmul %53, %54, %cst_27 {dimension_numbers = #tpu.dot_dimension_numbers<[1], [0], [0], [1], [0, 0, 1, 1], [], []>} : vector<8x8xf32>, vector<8x8xf32>, vector<8x8xf32> -> vector<8x8xf32>
    %56 = vector.extract_strided_slice %15 {offsets = [8, 0], sizes = [8, 32], strides = [1, 1]} : vector<32x32xf32> to vector<8x32xf32>
    %cst_28 = arith.constant dense<0.000000e+00> : vector<8x32xf32>
    %57 = tpu.matmul %55, %56, %cst_28 {dimension_numbers = #tpu.dot_dimension_numbers<[1], [0], [0], [1], [0, 0, 1, 1], [], []>} : vector<8x8xf32>, vector<8x32xf32>, vector<8x32xf32> -> vector<8x32xf32>
    %58 = arith.addf %37, %57 : vector<8x32xf32>
    %59 = vector.extract_strided_slice %11 {offsets = [0, 16], sizes = [8, 8], strides = [1, 1]} : vector<8x32xf32> to vector<8x8xf32>
    %60 = vector.extract_strided_slice %12 {offsets = [0, 16], sizes = [8, 8], strides = [1, 1]} : vector<8x32xf32> to vector<8x8xf32>
    %61 = tpu.transpose %60, [1, 0] : vector<8x8xf32> -> vector<8x8xf32>
    %cst_29 = arith.constant dense<0.000000e+00> : vector<8x8xf32>
    %62 = tpu.matmul %59, %61, %cst_29 {dimension_numbers = #tpu.dot_dimension_numbers<[1], [0], [0], [1], [0, 0, 1, 1], [], []>} : vector<8x8xf32>, vector<8x8xf32>, vector<8x8xf32> -> vector<8x8xf32>
    %cst_30 = arith.constant 0.353553385 : f32
    %63 = vector.broadcast %cst_30 : f32 to vector<8x8xf32>
    %64 = arith.mulf %62, %63 : vector<8x8xf32>
    %65 = arith.addf %64, %3 : vector<8x8xf32>
    %cst_31 = arith.constant dense<0xFF800000> : vector<8xf32>
    %66 = vector.multi_reduction <maximumf>, %65, %cst_31 [1] : vector<8x8xf32> to vector<8xf32>
    %67 = vector.shape_cast %66 : vector<8xf32> to vector<8x1xf32>
    %68 = vector.broadcast %67 : vector<8x1xf32> to vector<8x8xf32>
    %69 = arith.subf %65, %68 : vector<8x8xf32>
    %70 = math.exp %69 : vector<8x8xf32>
    %cst_32 = arith.constant dense<0.000000e+00> : vector<8xf32>
    %71 = vector.multi_reduction <add>, %70, %cst_32 [1] : vector<8x8xf32> to vector<8xf32>
    %72 = vector.shape_cast %71 : vector<8xf32> to vector<8x1xf32>
    %73 = vector.broadcast %72 : vector<8x1xf32> to vector<8x8xf32>
    %74 = arith.divf %70, %73 : vector<8x8xf32>
    %75 = vector.extract_strided_slice %13 {offsets = [0, 16], sizes = [8, 8], strides = [1, 1]} : vector<8x32xf32> to vector<8x8xf32>
    %cst_33 = arith.constant dense<0.000000e+00> : vector<8x8xf32>
    %76 = tpu.matmul %74, %75, %cst_33 {dimension_numbers = #tpu.dot_dimension_numbers<[1], [0], [0], [1], [0, 0, 1, 1], [], []>} : vector<8x8xf32>, vector<8x8xf32>, vector<8x8xf32> -> vector<8x8xf32>
    %77 = vector.extract_strided_slice %15 {offsets = [16, 0], sizes = [8, 32], strides = [1, 1]} : vector<32x32xf32> to vector<8x32xf32>
    %cst_34 = arith.constant dense<0.000000e+00> : vector<8x32xf32>
    %78 = tpu.matmul %76, %77, %cst_34 {dimension_numbers = #tpu.dot_dimension_numbers<[1], [0], [0], [1], [0, 0, 1, 1], [], []>} : vector<8x8xf32>, vector<8x32xf32>, vector<8x32xf32> -> vector<8x32xf32>
    %79 = arith.addf %58, %78 : vector<8x32xf32>
    %80 = vector.extract_strided_slice %11 {offsets = [0, 24], sizes = [8, 8], strides = [1, 1]} : vector<8x32xf32> to vector<8x8xf32>
    %81 = vector.extract_strided_slice %12 {offsets = [0, 24], sizes = [8, 8], strides = [1, 1]} : vector<8x32xf32> to vector<8x8xf32>
    %82 = tpu.transpose %81, [1, 0] : vector<8x8xf32> -> vector<8x8xf32>
    %cst_35 = arith.constant dense<0.000000e+00> : vector<8x8xf32>
    %83 = tpu.matmul %80, %82, %cst_35 {dimension_numbers = #tpu.dot_dimension_numbers<[1], [0], [0], [1], [0, 0, 1, 1], [], []>} : vector<8x8xf32>, vector<8x8xf32>, vector<8x8xf32> -> vector<8x8xf32>
    %cst_36 = arith.constant 0.353553385 : f32
    %84 = vector.broadcast %cst_36 : f32 to vector<8x8xf32>
    %85 = arith.mulf %83, %84 : vector<8x8xf32>
    %86 = arith.addf %85, %3 : vector<8x8xf32>
    %cst_37 = arith.constant dense<0xFF800000> : vector<8xf32>
    %87 = vector.multi_reduction <maximumf>, %86, %cst_37 [1] : vector<8x8xf32> to vector<8xf32>
    %88 = vector.shape_cast %87 : vector<8xf32> to vector<8x1xf32>
    %89 = vector.broadcast %88 : vector<8x1xf32> to vector<8x8xf32>
    %90 = arith.subf %86, %89 : vector<8x8xf32>
    %91 = math.exp %90 : vector<8x8xf32>
    %cst_38 = arith.constant dense<0.000000e+00> : vector<8xf32>
    %92 = vector.multi_reduction <add>, %91, %cst_38 [1] : vector<8x8xf32> to vector<8xf32>
    %93 = vector.shape_cast %92 : vector<8xf32> to vector<8x1xf32>
    %94 = vector.broadcast %93 : vector<8x1xf32> to vector<8x8xf32>
    %95 = arith.divf %91, %94 : vector<8x8xf32>
    %96 = vector.extract_strided_slice %13 {offsets = [0, 24], sizes = [8, 8], strides = [1, 1]} : vector<8x32xf32> to vector<8x8xf32>
    %cst_39 = arith.constant dense<0.000000e+00> : vector<8x8xf32>
    %97 = tpu.matmul %95, %96, %cst_39 {dimension_numbers = #tpu.dot_dimension_numbers<[1], [0], [0], [1], [0, 0, 1, 1], [], []>} : vector<8x8xf32>, vector<8x8xf32>, vector<8x8xf32> -> vector<8x8xf32>
    %98 = vector.extract_strided_slice %15 {offsets = [24, 0], sizes = [8, 32], strides = [1, 1]} : vector<32x32xf32> to vector<8x32xf32>
    %cst_40 = arith.constant dense<0.000000e+00> : vector<8x32xf32>
    %99 = tpu.matmul %97, %98, %cst_40 {dimension_numbers = #tpu.dot_dimension_numbers<[1], [0], [0], [1], [0, 0, 1, 1], [], []>} : vector<8x8xf32>, vector<8x32xf32>, vector<8x32xf32> -> vector<8x32xf32>
    %100 = arith.addf %79, %99 : vector<8x32xf32>
    %101 = vector.broadcast %17 : vector<1x32xf32> to vector<8x32xf32>
    %102 = arith.addf %100, %101 : vector<8x32xf32>
    %103 = arith.addf %1, %102 : vector<8x32xf32>
    %c0_41 = arith.constant 0 : index
    %c0_42 = arith.constant 0 : index
    %c0_43 = arith.constant 0 : index
    %104 = vector.load %arg10[%c0_41, %c0_42, %c0_43] : memref<2x1x32xf32, #tpu.memory_space<vmem>>, vector<1x1x32xf32>
    %105 = vector.shape_cast %104 : vector<1x1x32xf32> to vector<1x32xf32>
    %c0_44 = arith.constant 0 : index
    %c0_45 = arith.constant 0 : index
    %c0_46 = arith.constant 0 : index
    %106 = vector.load %arg11[%c0_44, %c0_45, %c0_46] : memref<2x1x32xf32, #tpu.memory_space<vmem>>, vector<1x1x32xf32>
    %107 = vector.shape_cast %106 : vector<1x1x32xf32> to vector<1x32xf32>
    %cst_47 = arith.constant dense<0.000000e+00> : vector<8xf32>
    %108 = vector.multi_reduction <add>, %103, %cst_47 [1] : vector<8x32xf32> to vector<8xf32>
    %109 = vector.shape_cast %108 : vector<8xf32> to vector<8x1xf32>
    %cst_48 = arith.constant 3.200000e+01 : f32
    %110 = vector.broadcast %cst_48 : f32 to vector<8x1xf32>
    %111 = arith.divf %109, %110 : vector<8x1xf32>
    %112 = vector.broadcast %111 : vector<8x1xf32> to vector<8x32xf32>
    %113 = arith.subf %103, %112 : vector<8x32xf32>
    %114 = arith.mulf %113, %113 : vector<8x32xf32>
    %cst_49 = arith.constant dense<0.000000e+00> : vector<8xf32>
    %115 = vector.multi_reduction <add>, %114, %cst_49 [1] : vector<8x32xf32> to vector<8xf32>
    %116 = vector.shape_cast %115 : vector<8xf32> to vector<8x1xf32>
    %cst_50 = arith.constant 3.200000e+01 : f32
    %117 = vector.broadcast %cst_50 : f32 to vector<8x1xf32>
    %118 = arith.divf %116, %117 : vector<8x1xf32>
    %cst_51 = arith.constant 9.99999997E-7 : f32
    %119 = vector.broadcast %cst_51 : f32 to vector<8x1xf32>
    %120 = arith.addf %118, %119 : vector<8x1xf32>
    %121 = math.rsqrt %120 : vector<8x1xf32>
    %122 = vector.broadcast %121 : vector<8x1xf32> to vector<8x32xf32>
    %123 = arith.mulf %113, %122 : vector<8x32xf32>
    %124 = vector.broadcast %105 : vector<1x32xf32> to vector<8x32xf32>
    %125 = arith.mulf %123, %124 : vector<8x32xf32>
    %126 = vector.broadcast %107 : vector<1x32xf32> to vector<8x32xf32>
    %127 = arith.addf %125, %126 : vector<8x32xf32>
    %c0_52 = arith.constant 0 : index
    %c0_53 = arith.constant 0 : index
    %c0_54 = arith.constant 0 : index
    %128 = vector.load %arg12[%c0_52, %c0_53, %c0_54] : memref<2x32x64xf32, #tpu.memory_space<vmem>>, vector<1x32x64xf32>
    %129 = vector.shape_cast %128 : vector<1x32x64xf32> to vector<32x64xf32>
    %c0_55 = arith.constant 0 : index
    %c0_56 = arith.constant 0 : index
    %c0_57 = arith.constant 0 : index
    %130 = vector.load %arg13[%c0_55, %c0_56, %c0_57] : memref<2x1x64xf32, #tpu.memory_space<vmem>>, vector<1x1x64xf32>
    %131 = vector.shape_cast %130 : vector<1x1x64xf32> to vector<1x64xf32>
    %c0_58 = arith.constant 0 : index
    %c0_59 = arith.constant 0 : index
    %c0_60 = arith.constant 0 : index
    %132 = vector.load %arg14[%c0_58, %c0_59, %c0_60] : memref<2x64x32xf32, #tpu.memory_space<vmem>>, vector<1x64x32xf32>
    %133 = vector.shape_cast %132 : vector<1x64x32xf32> to vector<64x32xf32>
    %c0_61 = arith.constant 0 : index
    %c0_62 = arith.constant 0 : index
    %c0_63 = arith.constant 0 : index
    %134 = vector.load %arg15[%c0_61, %c0_62, %c0_63] : memref<2x1x32xf32, #tpu.memory_space<vmem>>, vector<1x1x32xf32>
    %135 = vector.shape_cast %134 : vector<1x1x32xf32> to vector<1x32xf32>
    %cst_64 = arith.constant dense<0.000000e+00> : vector<8x64xf32>
    %136 = tpu.matmul %127, %129, %cst_64 {dimension_numbers = #tpu.dot_dimension_numbers<[1], [0], [0], [1], [0, 0, 1, 1], [], []>} : vector<8x32xf32>, vector<32x64xf32>, vector<8x64xf32> -> vector<8x64xf32>
    %137 = vector.broadcast %131 : vector<1x64xf32> to vector<8x64xf32>
    %138 = arith.addf %136, %137 : vector<8x64xf32>
    %cst_65 = arith.constant 5.000000e-01 : f32
    %139 = vector.broadcast %cst_65 : f32 to vector<8x64xf32>
    %140 = arith.mulf %139, %138 : vector<8x64xf32>
    %cst_66 = arith.constant 0.707106769 : f32
    %141 = vector.broadcast %cst_66 : f32 to vector<8x64xf32>
    %142 = arith.mulf %138, %141 : vector<8x64xf32>
    %143 = math.erf %142 : vector<8x64xf32>
    %cst_67 = arith.constant 1.000000e+00 : f32
    %144 = vector.broadcast %cst_67 : f32 to vector<8x64xf32>
    %145 = arith.addf %144, %143 : vector<8x64xf32>
    %146 = arith.mulf %140, %145 : vector<8x64xf32>
    %cst_68 = arith.constant dense<0.000000e+00> : vector<8x32xf32>
    %147 = tpu.matmul %146, %133, %cst_68 {dimension_numbers = #tpu.dot_dimension_numbers<[1], [0], [0], [1], [0, 0, 1, 1], [], []>} : vector<8x64xf32>, vector<64x32xf32>, vector<8x32xf32> -> vector<8x32xf32>
    %148 = vector.broadcast %135 : vector<1x32xf32> to vector<8x32xf32>
    %149 = arith.addf %147, %148 : vector<8x32xf32>
    %150 = arith.addf %127, %149 : vector<8x32xf32>
    %c0_69 = arith.constant 0 : index
    %c0_70 = arith.constant 0 : index
    %c0_71 = arith.constant 0 : index
    %151 = vector.load %arg16[%c0_69, %c0_70, %c0_71] : memref<2x1x32xf32, #tpu.memory_space<vmem>>, vector<1x1x32xf32>
    %152 = vector.shape_cast %151 : vector<1x1x32xf32> to vector<1x32xf32>
    %c0_72 = arith.constant 0 : index
    %c0_73 = arith.constant 0 : index
    %c0_74 = arith.constant 0 : index
    %153 = vector.load %arg17[%c0_72, %c0_73, %c0_74] : memref<2x1x32xf32, #tpu.memory_space<vmem>>, vector<1x1x32xf32>
    %154 = vector.shape_cast %153 : vector<1x1x32xf32> to vector<1x32xf32>
    %cst_75 = arith.constant dense<0.000000e+00> : vector<8xf32>
    %155 = vector.multi_reduction <add>, %150, %cst_75 [1] : vector<8x32xf32> to vector<8xf32>
    %156 = vector.shape_cast %155 : vector<8xf32> to vector<8x1xf32>
    %cst_76 = arith.constant 3.200000e+01 : f32
    %157 = vector.broadcast %cst_76 : f32 to vector<8x1xf32>
    %158 = arith.divf %156, %157 : vector<8x1xf32>
    %159 = vector.broadcast %158 : vector<8x1xf32> to vector<8x32xf32>
    %160 = arith.subf %150, %159 : vector<8x32xf32>
    %161 = arith.mulf %160, %160 : vector<8x32xf32>
    %cst_77 = arith.constant dense<0.000000e+00> : vector<8xf32>
    %162 = vector.multi_reduction <add>, %161, %cst_77 [1] : vector<8x32xf32> to vector<8xf32>
    %163 = vector.shape_cast %162 : vector<8xf32> to vector<8x1xf32>
    %cst_78 = arith.constant 3.200000e+01 : f32
    %164 = vector.broadcast %cst_78 : f32 to vector<8x1xf32>
    %165 = arith.divf %163, %164 : vector<8x1xf32>
    %cst_79 = arith.constant 9.99999997E-7 : f32
    %166 = vector.broadcast %cst_79 : f32 to vector<8x1xf32>
    %167 = arith.addf %165, %166 : vector<8x1xf32>
    %168 = math.rsqrt %167 : vector<8x1xf32>
    %169 = vector.broadcast %168 : vector<8x1xf32> to vector<8x32xf32>
    %170 = arith.mulf %160, %169 : vector<8x32xf32>
    %171 = vector.broadcast %152 : vector<1x32xf32> to vector<8x32xf32>
    %172 = arith.mulf %170, %171 : vector<8x32xf32>
    %173 = vector.broadcast %154 : vector<1x32xf32> to vector<8x32xf32>
    %174 = arith.addf %172, %173 : vector<8x32xf32>
    %c1 = arith.constant 1 : index
    %c0_80 = arith.constant 0 : index
    %c0_81 = arith.constant 0 : index
    %175 = vector.load %arg6[%c1, %c0_80, %c0_81] : memref<2x32x96xf32, #tpu.memory_space<vmem>>, vector<1x32x96xf32>
    %176 = vector.shape_cast %175 : vector<1x32x96xf32> to vector<32x96xf32>
    %cst_82 = arith.constant dense<0.000000e+00> : vector<8x96xf32>
    %177 = tpu.matmul %174, %176, %cst_82 {dimension_numbers = #tpu.dot_dimension_numbers<[1], [0], [0], [1], [0, 0, 1, 1], [], []>} : vector<8x32xf32>, vector<32x96xf32>, vector<8x96xf32> -> vector<8x96xf32>
    %c1_83 = arith.constant 1 : index
    %c0_84 = arith.constant 0 : index
    %c0_85 = arith.constant 0 : index
    %178 = vector.load %arg7[%c1_83, %c0_84, %c0_85] : memref<2x1x96xf32, #tpu.memory_space<vmem>>, vector<1x1x96xf32>
    %179 = vector.shape_cast %178 : vector<1x1x96xf32> to vector<1x96xf32>
    %180 = vector.broadcast %179 : vector<1x96xf32> to vector<8x96xf32>
    %181 = arith.addf %177, %180 : vector<8x96xf32>
    %182 = vector.extract_strided_slice %181 {offsets = [0, 0], sizes = [8, 32], strides = [1, 1]} : vector<8x96xf32> to vector<8x32xf32>
    %183 = vector.extract_strided_slice %181 {offsets = [0, 32], sizes = [8, 32], strides = [1, 1]} : vector<8x96xf32> to vector<8x32xf32>
    %184 = vector.extract_strided_slice %181 {offsets = [0, 64], sizes = [8, 32], strides = [1, 1]} : vector<8x96xf32> to vector<8x32xf32>
    %c1_86 = arith.constant 1 : index
    %c0_87 = arith.constant 0 : index
    %c0_88 = arith.constant 0 : index
    %185 = vector.load %arg8[%c1_86, %c0_87, %c0_88] : memref<2x32x32xf32, #tpu.memory_space<vmem>>, vector<1x32x32xf32>
    %186 = vector.shape_cast %185 : vector<1x32x32xf32> to vector<32x32xf32>
    %c1_89 = arith.constant 1 : index
    %c0_90 = arith.constant 0 : index
    %c0_91 = arith.constant 0 : index
    %187 = vector.load %arg9[%c1_89, %c0_90, %c0_91] : memref<2x1x32xf32, #tpu.memory_space<vmem>>, vector<1x1x32xf32>
    %188 = vector.shape_cast %187 : vector<1x1x32xf32> to vector<1x32xf32>
    %189 = vector.extract_strided_slice %182 {offsets = [0, 0], sizes = [8, 8], strides = [1, 1]} : vector<8x32xf32> to vector<8x8xf32>
    %190 = vector.extract_strided_slice %183 {offsets = [0, 0], sizes = [8, 8], strides = [1, 1]} : vector<8x32xf32> to vector<8x8xf32>
    %191 = tpu.transpose %190, [1, 0] : vector<8x8xf32> -> vector<8x8xf32>
    %cst_92 = arith.constant dense<0.000000e+00> : vector<8x8xf32>
    %192 = tpu.matmul %189, %191, %cst_92 {dimension_numbers = #tpu.dot_dimension_numbers<[1], [0], [0], [1], [0, 0, 1, 1], [], []>} : vector<8x8xf32>, vector<8x8xf32>, vector<8x8xf32> -> vector<8x8xf32>
    %cst_93 = arith.constant 0.353553385 : f32
    %193 = vector.broadcast %cst_93 : f32 to vector<8x8xf32>
    %194 = arith.mulf %192, %193 : vector<8x8xf32>
    %195 = arith.addf %194, %3 : vector<8x8xf32>
    %cst_94 = arith.constant dense<0xFF800000> : vector<8xf32>
    %196 = vector.multi_reduction <maximumf>, %195, %cst_94 [1] : vector<8x8xf32> to vector<8xf32>
    %197 = vector.shape_cast %196 : vector<8xf32> to vector<8x1xf32>
    %198 = vector.broadcast %197 : vector<8x1xf32> to vector<8x8xf32>
    %199 = arith.subf %195, %198 : vector<8x8xf32>
    %200 = math.exp %199 : vector<8x8xf32>
    %cst_95 = arith.constant dense<0.000000e+00> : vector<8xf32>
    %201 = vector.multi_reduction <add>, %200, %cst_95 [1] : vector<8x8xf32> to vector<8xf32>
    %202 = vector.shape_cast %201 : vector<8xf32> to vector<8x1xf32>
    %203 = vector.broadcast %202 : vector<8x1xf32> to vector<8x8xf32>
    %204 = arith.divf %200, %203 : vector<8x8xf32>
    %205 = vector.extract_strided_slice %184 {offsets = [0, 0], sizes = [8, 8], strides = [1, 1]} : vector<8x32xf32> to vector<8x8xf32>
    %cst_96 = arith.constant dense<0.000000e+00> : vector<8x8xf32>
    %206 = tpu.matmul %204, %205, %cst_96 {dimension_numbers = #tpu.dot_dimension_numbers<[1], [0], [0], [1], [0, 0, 1, 1], [], []>} : vector<8x8xf32>, vector<8x8xf32>, vector<8x8xf32> -> vector<8x8xf32>
    %207 = vector.extract_strided_slice %186 {offsets = [0, 0], sizes = [8, 32], strides = [1, 1]} : vector<32x32xf32> to vector<8x32xf32>
    %cst_97 = arith.constant dense<0.000000e+00> : vector<8x32xf32>
    %208 = tpu.matmul %206, %207, %cst_97 {dimension_numbers = #tpu.dot_dimension_numbers<[1], [0], [0], [1], [0, 0, 1, 1], [], []>} : vector<8x8xf32>, vector<8x32xf32>, vector<8x32xf32> -> vector<8x32xf32>
    %209 = vector.extract_strided_slice %182 {offsets = [0, 8], sizes = [8, 8], strides = [1, 1]} : vector<8x32xf32> to vector<8x8xf32>
    %210 = vector.extract_strided_slice %183 {offsets = [0, 8], sizes = [8, 8], strides = [1, 1]} : vector<8x32xf32> to vector<8x8xf32>
    %211 = tpu.transpose %210, [1, 0] : vector<8x8xf32> -> vector<8x8xf32>
    %cst_98 = arith.constant dense<0.000000e+00> : vector<8x8xf32>
    %212 = tpu.matmul %209, %211, %cst_98 {dimension_numbers = #tpu.dot_dimension_numbers<[1], [0], [0], [1], [0, 0, 1, 1], [], []>} : vector<8x8xf32>, vector<8x8xf32>, vector<8x8xf32> -> vector<8x8xf32>
    %cst_99 = arith.constant 0.353553385 : f32
    %213 = vector.broadcast %cst_99 : f32 to vector<8x8xf32>
    %214 = arith.mulf %212, %213 : vector<8x8xf32>
    %215 = arith.addf %214, %3 : vector<8x8xf32>
    %cst_100 = arith.constant dense<0xFF800000> : vector<8xf32>
    %216 = vector.multi_reduction <maximumf>, %215, %cst_100 [1] : vector<8x8xf32> to vector<8xf32>
    %217 = vector.shape_cast %216 : vector<8xf32> to vector<8x1xf32>
    %218 = vector.broadcast %217 : vector<8x1xf32> to vector<8x8xf32>
    %219 = arith.subf %215, %218 : vector<8x8xf32>
    %220 = math.exp %219 : vector<8x8xf32>
    %cst_101 = arith.constant dense<0.000000e+00> : vector<8xf32>
    %221 = vector.multi_reduction <add>, %220, %cst_101 [1] : vector<8x8xf32> to vector<8xf32>
    %222 = vector.shape_cast %221 : vector<8xf32> to vector<8x1xf32>
    %223 = vector.broadcast %222 : vector<8x1xf32> to vector<8x8xf32>
    %224 = arith.divf %220, %223 : vector<8x8xf32>
    %225 = vector.extract_strided_slice %184 {offsets = [0, 8], sizes = [8, 8], strides = [1, 1]} : vector<8x32xf32> to vector<8x8xf32>
    %cst_102 = arith.constant dense<0.000000e+00> : vector<8x8xf32>
    %226 = tpu.matmul %224, %225, %cst_102 {dimension_numbers = #tpu.dot_dimension_numbers<[1], [0], [0], [1], [0, 0, 1, 1], [], []>} : vector<8x8xf32>, vector<8x8xf32>, vector<8x8xf32> -> vector<8x8xf32>
    %227 = vector.extract_strided_slice %186 {offsets = [8, 0], sizes = [8, 32], strides = [1, 1]} : vector<32x32xf32> to vector<8x32xf32>
    %cst_103 = arith.constant dense<0.000000e+00> : vector<8x32xf32>
    %228 = tpu.matmul %226, %227, %cst_103 {dimension_numbers = #tpu.dot_dimension_numbers<[1], [0], [0], [1], [0, 0, 1, 1], [], []>} : vector<8x8xf32>, vector<8x32xf32>, vector<8x32xf32> -> vector<8x32xf32>
    %229 = arith.addf %208, %228 : vector<8x32xf32>
    %230 = vector.extract_strided_slice %182 {offsets = [0, 16], sizes = [8, 8], strides = [1, 1]} : vector<8x32xf32> to vector<8x8xf32>
    %231 = vector.extract_strided_slice %183 {offsets = [0, 16], sizes = [8, 8], strides = [1, 1]} : vector<8x32xf32> to vector<8x8xf32>
    %232 = tpu.transpose %231, [1, 0] : vector<8x8xf32> -> vector<8x8xf32>
    %cst_104 = arith.constant dense<0.000000e+00> : vector<8x8xf32>
    %233 = tpu.matmul %230, %232, %cst_104 {dimension_numbers = #tpu.dot_dimension_numbers<[1], [0], [0], [1], [0, 0, 1, 1], [], []>} : vector<8x8xf32>, vector<8x8xf32>, vector<8x8xf32> -> vector<8x8xf32>
    %cst_105 = arith.constant 0.353553385 : f32
    %234 = vector.broadcast %cst_105 : f32 to vector<8x8xf32>
    %235 = arith.mulf %233, %234 : vector<8x8xf32>
    %236 = arith.addf %235, %3 : vector<8x8xf32>
    %cst_106 = arith.constant dense<0xFF800000> : vector<8xf32>
    %237 = vector.multi_reduction <maximumf>, %236, %cst_106 [1] : vector<8x8xf32> to vector<8xf32>
    %238 = vector.shape_cast %237 : vector<8xf32> to vector<8x1xf32>
    %239 = vector.broadcast %238 : vector<8x1xf32> to vector<8x8xf32>
    %240 = arith.subf %236, %239 : vector<8x8xf32>
    %241 = math.exp %240 : vector<8x8xf32>
    %cst_107 = arith.constant dense<0.000000e+00> : vector<8xf32>
    %242 = vector.multi_reduction <add>, %241, %cst_107 [1] : vector<8x8xf32> to vector<8xf32>
    %243 = vector.shape_cast %242 : vector<8xf32> to vector<8x1xf32>
    %244 = vector.broadcast %243 : vector<8x1xf32> to vector<8x8xf32>
    %245 = arith.divf %241, %244 : vector<8x8xf32>
    %246 = vector.extract_strided_slice %184 {offsets = [0, 16], sizes = [8, 8], strides = [1, 1]} : vector<8x32xf32> to vector<8x8xf32>
    %cst_108 = arith.constant dense<0.000000e+00> : vector<8x8xf32>
    %247 = tpu.matmul %245, %246, %cst_108 {dimension_numbers = #tpu.dot_dimension_numbers<[1], [0], [0], [1], [0, 0, 1, 1], [], []>} : vector<8x8xf32>, vector<8x8xf32>, vector<8x8xf32> -> vector<8x8xf32>
    %248 = vector.extract_strided_slice %186 {offsets = [16, 0], sizes = [8, 32], strides = [1, 1]} : vector<32x32xf32> to vector<8x32xf32>
    %cst_109 = arith.constant dense<0.000000e+00> : vector<8x32xf32>
    %249 = tpu.matmul %247, %248, %cst_109 {dimension_numbers = #tpu.dot_dimension_numbers<[1], [0], [0], [1], [0, 0, 1, 1], [], []>} : vector<8x8xf32>, vector<8x32xf32>, vector<8x32xf32> -> vector<8x32xf32>
    %250 = arith.addf %229, %249 : vector<8x32xf32>
    %251 = vector.extract_strided_slice %182 {offsets = [0, 24], sizes = [8, 8], strides = [1, 1]} : vector<8x32xf32> to vector<8x8xf32>
    %252 = vector.extract_strided_slice %183 {offsets = [0, 24], sizes = [8, 8], strides = [1, 1]} : vector<8x32xf32> to vector<8x8xf32>
    %253 = tpu.transpose %252, [1, 0] : vector<8x8xf32> -> vector<8x8xf32>
    %cst_110 = arith.constant dense<0.000000e+00> : vector<8x8xf32>
    %254 = tpu.matmul %251, %253, %cst_110 {dimension_numbers = #tpu.dot_dimension_numbers<[1], [0], [0], [1], [0, 0, 1, 1], [], []>} : vector<8x8xf32>, vector<8x8xf32>, vector<8x8xf32> -> vector<8x8xf32>
    %cst_111 = arith.constant 0.353553385 : f32
    %255 = vector.broadcast %cst_111 : f32 to vector<8x8xf32>
    %256 = arith.mulf %254, %255 : vector<8x8xf32>
    %257 = arith.addf %256, %3 : vector<8x8xf32>
    %cst_112 = arith.constant dense<0xFF800000> : vector<8xf32>
    %258 = vector.multi_reduction <maximumf>, %257, %cst_112 [1] : vector<8x8xf32> to vector<8xf32>
    %259 = vector.shape_cast %258 : vector<8xf32> to vector<8x1xf32>
    %260 = vector.broadcast %259 : vector<8x1xf32> to vector<8x8xf32>
    %261 = arith.subf %257, %260 : vector<8x8xf32>
    %262 = math.exp %261 : vector<8x8xf32>
    %cst_113 = arith.constant dense<0.000000e+00> : vector<8xf32>
    %263 = vector.multi_reduction <add>, %262, %cst_113 [1] : vector<8x8xf32> to vector<8xf32>
    %264 = vector.shape_cast %263 : vector<8xf32> to vector<8x1xf32>
    %265 = vector.broadcast %264 : vector<8x1xf32> to vector<8x8xf32>
    %266 = arith.divf %262, %265 : vector<8x8xf32>
    %267 = vector.extract_strided_slice %184 {offsets = [0, 24], sizes = [8, 8], strides = [1, 1]} : vector<8x32xf32> to vector<8x8xf32>
    %cst_114 = arith.constant dense<0.000000e+00> : vector<8x8xf32>
    %268 = tpu.matmul %266, %267, %cst_114 {dimension_numbers = #tpu.dot_dimension_numbers<[1], [0], [0], [1], [0, 0, 1, 1], [], []>} : vector<8x8xf32>, vector<8x8xf32>, vector<8x8xf32> -> vector<8x8xf32>
    %269 = vector.extract_strided_slice %186 {offsets = [24, 0], sizes = [8, 32], strides = [1, 1]} : vector<32x32xf32> to vector<8x32xf32>
    %cst_115 = arith.constant dense<0.000000e+00> : vector<8x32xf32>
    %270 = tpu.matmul %268, %269, %cst_115 {dimension_numbers = #tpu.dot_dimension_numbers<[1], [0], [0], [1], [0, 0, 1, 1], [], []>} : vector<8x8xf32>, vector<8x32xf32>, vector<8x32xf32> -> vector<8x32xf32>
    %271 = arith.addf %250, %270 : vector<8x32xf32>
    %272 = vector.broadcast %188 : vector<1x32xf32> to vector<8x32xf32>
    %273 = arith.addf %271, %272 : vector<8x32xf32>
    %274 = arith.addf %174, %273 : vector<8x32xf32>
    %c1_116 = arith.constant 1 : index
    %c0_117 = arith.constant 0 : index
    %c0_118 = arith.constant 0 : index
    %275 = vector.load %arg10[%c1_116, %c0_117, %c0_118] : memref<2x1x32xf32, #tpu.memory_space<vmem>>, vector<1x1x32xf32>
    %276 = vector.shape_cast %275 : vector<1x1x32xf32> to vector<1x32xf32>
    %c1_119 = arith.constant 1 : index
    %c0_120 = arith.constant 0 : index
    %c0_121 = arith.constant 0 : index
    %277 = vector.load %arg11[%c1_119, %c0_120, %c0_121] : memref<2x1x32xf32, #tpu.memory_space<vmem>>, vector<1x1x32xf32>
    %278 = vector.shape_cast %277 : vector<1x1x32xf32> to vector<1x32xf32>
    %cst_122 = arith.constant dense<0.000000e+00> : vector<8xf32>
    %279 = vector.multi_reduction <add>, %274, %cst_122 [1] : vector<8x32xf32> to vector<8xf32>
    %280 = vector.shape_cast %279 : vector<8xf32> to vector<8x1xf32>
    %cst_123 = arith.constant 3.200000e+01 : f32
    %281 = vector.broadcast %cst_123 : f32 to vector<8x1xf32>
    %282 = arith.divf %280, %281 : vector<8x1xf32>
    %283 = vector.broadcast %282 : vector<8x1xf32> to vector<8x32xf32>
    %284 = arith.subf %274, %283 : vector<8x32xf32>
    %285 = arith.mulf %284, %284 : vector<8x32xf32>
    %cst_124 = arith.constant dense<0.000000e+00> : vector<8xf32>
    %286 = vector.multi_reduction <add>, %285, %cst_124 [1] : vector<8x32xf32> to vector<8xf32>
    %287 = vector.shape_cast %286 : vector<8xf32> to vector<8x1xf32>
    %cst_125 = arith.constant 3.200000e+01 : f32
    %288 = vector.broadcast %cst_125 : f32 to vector<8x1xf32>
    %289 = arith.divf %287, %288 : vector<8x1xf32>
    %cst_126 = arith.constant 9.99999997E-7 : f32
    %290 = vector.broadcast %cst_126 : f32 to vector<8x1xf32>
    %291 = arith.addf %289, %290 : vector<8x1xf32>
    %292 = math.rsqrt %291 : vector<8x1xf32>
    %293 = vector.broadcast %292 : vector<8x1xf32> to vector<8x32xf32>
    %294 = arith.mulf %284, %293 : vector<8x32xf32>
    %295 = vector.broadcast %276 : vector<1x32xf32> to vector<8x32xf32>
    %296 = arith.mulf %294, %295 : vector<8x32xf32>
    %297 = vector.broadcast %278 : vector<1x32xf32> to vector<8x32xf32>
    %298 = arith.addf %296, %297 : vector<8x32xf32>
    %c1_127 = arith.constant 1 : index
    %c0_128 = arith.constant 0 : index
    %c0_129 = arith.constant 0 : index
    %299 = vector.load %arg12[%c1_127, %c0_128, %c0_129] : memref<2x32x64xf32, #tpu.memory_space<vmem>>, vector<1x32x64xf32>
    %300 = vector.shape_cast %299 : vector<1x32x64xf32> to vector<32x64xf32>
    %c1_130 = arith.constant 1 : index
    %c0_131 = arith.constant 0 : index
    %c0_132 = arith.constant 0 : index
    %301 = vector.load %arg13[%c1_130, %c0_131, %c0_132] : memref<2x1x64xf32, #tpu.memory_space<vmem>>, vector<1x1x64xf32>
    %302 = vector.shape_cast %301 : vector<1x1x64xf32> to vector<1x64xf32>
    %c1_133 = arith.constant 1 : index
    %c0_134 = arith.constant 0 : index
    %c0_135 = arith.constant 0 : index
    %303 = vector.load %arg14[%c1_133, %c0_134, %c0_135] : memref<2x64x32xf32, #tpu.memory_space<vmem>>, vector<1x64x32xf32>
    %304 = vector.shape_cast %303 : vector<1x64x32xf32> to vector<64x32xf32>
    %c1_136 = arith.constant 1 : index
    %c0_137 = arith.constant 0 : index
    %c0_138 = arith.constant 0 : index
    %305 = vector.load %arg15[%c1_136, %c0_137, %c0_138] : memref<2x1x32xf32, #tpu.memory_space<vmem>>, vector<1x1x32xf32>
    %306 = vector.shape_cast %305 : vector<1x1x32xf32> to vector<1x32xf32>
    %cst_139 = arith.constant dense<0.000000e+00> : vector<8x64xf32>
    %307 = tpu.matmul %298, %300, %cst_139 {dimension_numbers = #tpu.dot_dimension_numbers<[1], [0], [0], [1], [0, 0, 1, 1], [], []>} : vector<8x32xf32>, vector<32x64xf32>, vector<8x64xf32> -> vector<8x64xf32>
    %308 = vector.broadcast %302 : vector<1x64xf32> to vector<8x64xf32>
    %309 = arith.addf %307, %308 : vector<8x64xf32>
    %cst_140 = arith.constant 5.000000e-01 : f32
    %310 = vector.broadcast %cst_140 : f32 to vector<8x64xf32>
    %311 = arith.mulf %310, %309 : vector<8x64xf32>
    %cst_141 = arith.constant 0.707106769 : f32
    %312 = vector.broadcast %cst_141 : f32 to vector<8x64xf32>
    %313 = arith.mulf %309, %312 : vector<8x64xf32>
    %314 = math.erf %313 : vector<8x64xf32>
    %cst_142 = arith.constant 1.000000e+00 : f32
    %315 = vector.broadcast %cst_142 : f32 to vector<8x64xf32>
    %316 = arith.addf %315, %314 : vector<8x64xf32>
    %317 = arith.mulf %311, %316 : vector<8x64xf32>
    %cst_143 = arith.constant dense<0.000000e+00> : vector<8x32xf32>
    %318 = tpu.matmul %317, %304, %cst_143 {dimension_numbers = #tpu.dot_dimension_numbers<[1], [0], [0], [1], [0, 0, 1, 1], [], []>} : vector<8x64xf32>, vector<64x32xf32>, vector<8x32xf32> -> vector<8x32xf32>
    %319 = vector.broadcast %306 : vector<1x32xf32> to vector<8x32xf32>
    %320 = arith.addf %318, %319 : vector<8x32xf32>
    %321 = arith.addf %298, %320 : vector<8x32xf32>
    %c1_144 = arith.constant 1 : index
    %c0_145 = arith.constant 0 : index
    %c0_146 = arith.constant 0 : index
    %322 = vector.load %arg16[%c1_144, %c0_145, %c0_146] : memref<2x1x32xf32, #tpu.memory_space<vmem>>, vector<1x1x32xf32>
    %323 = vector.shape_cast %322 : vector<1x1x32xf32> to vector<1x32xf32>
    %c1_147 = arith.constant 1 : index
    %c0_148 = arith.constant 0 : index
    %c0_149 = arith.constant 0 : index
    %324 = vector.load %arg17[%c1_147, %c0_148, %c0_149] : memref<2x1x32xf32, #tpu.memory_space<vmem>>, vector<1x1x32xf32>
    %325 = vector.shape_cast %324 : vector<1x1x32xf32> to vector<1x32xf32>
    %cst_150 = arith.constant dense<0.000000e+00> : vector<8xf32>
    %326 = vector.multi_reduction <add>, %321, %cst_150 [1] : vector<8x32xf32> to vector<8xf32>
    %327 = vector.shape_cast %326 : vector<8xf32> to vector<8x1xf32>
    %cst_151 = arith.constant 3.200000e+01 : f32
    %328 = vector.broadcast %cst_151 : f32 to vector<8x1xf32>
    %329 = arith.divf %327, %328 : vector<8x1xf32>
    %330 = vector.broadcast %329 : vector<8x1xf32> to vector<8x32xf32>
    %331 = arith.subf %321, %330 : vector<8x32xf32>
    %332 = arith.mulf %331, %331 : vector<8x32xf32>
    %cst_152 = arith.constant dense<0.000000e+00> : vector<8xf32>
    %333 = vector.multi_reduction <add>, %332, %cst_152 [1] : vector<8x32xf32> to vector<8xf32>
    %334 = vector.shape_cast %333 : vector<8xf32> to vector<8x1xf32>
    %cst_153 = arith.constant 3.200000e+01 : f32
    %335 = vector.broadcast %cst_153 : f32 to vector<8x1xf32>
    %336 = arith.divf %334, %335 : vector<8x1xf32>
    %cst_154 = arith.constant 9.99999997E-7 : f32
    %337 = vector.broadcast %cst_154 : f32 to vector<8x1xf32>
    %338 = arith.addf %336, %337 : vector<8x1xf32>
    %339 = math.rsqrt %338 : vector<8x1xf32>
    %340 = vector.broadcast %339 : vector<8x1xf32> to vector<8x32xf32>
    %341 = arith.mulf %331, %340 : vector<8x32xf32>
    %342 = vector.broadcast %323 : vector<1x32xf32> to vector<8x32xf32>
    %343 = arith.mulf %341, %342 : vector<8x32xf32>
    %344 = vector.broadcast %325 : vector<1x32xf32> to vector<8x32xf32>
    %345 = arith.addf %343, %344 : vector<8x32xf32>
    %c0_155 = arith.constant 0 : index
    %c0_156 = arith.constant 0 : index
    %346 = vector.load %arg18[%c0_155, %c0_156] : memref<1x32xf32, #tpu.memory_space<vmem>>, vector<1x32xf32>
    %c0_157 = arith.constant 0 : index
    %c0_158 = arith.constant 0 : index
    %347 = vector.load %arg19[%c0_157, %c0_158] : memref<1x32xf32, #tpu.memory_space<vmem>>, vector<1x32xf32>
    %cst_159 = arith.constant dense<0.000000e+00> : vector<8xf32>
    %348 = vector.multi_reduction <add>, %345, %cst_159 [1] : vector<8x32xf32> to vector<8xf32>
    %349 = vector.shape_cast %348 : vector<8xf32> to vector<8x1xf32>
    %cst_160 = arith.constant 3.200000e+01 : f32
    %350 = vector.broadcast %cst_160 : f32 to vector<8x1xf32>
    %351 = arith.divf %349, %350 : vector<8x1xf32>
    %352 = vector.broadcast %351 : vector<8x1xf32> to vector<8x32xf32>
    %353 = arith.subf %345, %352 : vector<8x32xf32>
    %354 = arith.mulf %353, %353 : vector<8x32xf32>
    %cst_161 = arith.constant dense<0.000000e+00> : vector<8xf32>
    %355 = vector.multi_reduction <add>, %354, %cst_161 [1] : vector<8x32xf32> to vector<8xf32>
    %356 = vector.shape_cast %355 : vector<8xf32> to vector<8x1xf32>
    %cst_162 = arith.constant 3.200000e+01 : f32
    %357 = vector.broadcast %cst_162 : f32 to vector<8x1xf32>
    %358 = arith.divf %356, %357 : vector<8x1xf32>
    %cst_163 = arith.constant 9.99999997E-7 : f32
    %359 = vector.broadcast %cst_163 : f32 to vector<8x1xf32>
    %360 = arith.addf %358, %359 : vector<8x1xf32>
    %361 = math.rsqrt %360 : vector<8x1xf32>
    %362 = vector.broadcast %361 : vector<8x1xf32> to vector<8x32xf32>
    %363 = arith.mulf %353, %362 : vector<8x32xf32>
    %364 = vector.broadcast %346 : vector<1x32xf32> to vector<8x32xf32>
    %365 = arith.mulf %363, %364 : vector<8x32xf32>
    %366 = vector.broadcast %347 : vector<1x32xf32> to vector<8x32xf32>
    %367 = arith.addf %365, %366 : vector<8x32xf32>
    %c0_164 = arith.constant 0 : index
    %c0_165 = arith.constant 0 : index
    %c0_166 = arith.constant 0 : index
    %368 = vector.load %arg2[%c0_164, %c0_165, %c0_166] : memref<1x8x32xf32, #tpu.memory_space<vmem>>, vector<1x8x32xf32>
    %369 = vector.shape_cast %368 : vector<1x8x32xf32> to vector<8x32xf32>
    %c0_167 = arith.constant 0 : index
    %c0_168 = arith.constant 0 : index
    %c0_169 = arith.constant 0 : index
    %370 = vector.load %arg4[%c0_167, %c0_168, %c0_169] : memref<1x8x8xf32, #tpu.memory_space<vmem>>, vector<1x8x8xf32>
    %371 = vector.shape_cast %370 : vector<1x8x8xf32> to vector<8x8xf32>
    %c0_170 = arith.constant 0 : index
    %c0_171 = arith.constant 0 : index
    %c0_172 = arith.constant 0 : index
    %372 = vector.load %arg5[%c0_170, %c0_171, %c0_172] : memref<1x8x8xf32, #tpu.memory_space<vmem>>, vector<1x8x8xf32>
    %373 = vector.shape_cast %372 : vector<1x8x8xf32> to vector<8x8xf32>
    %c0_173 = arith.constant 0 : index
    %c0_174 = arith.constant 0 : index
    %c0_175 = arith.constant 0 : index
    %374 = vector.load %arg20[%c0_173, %c0_174, %c0_175] : memref<2x32x96xf32, #tpu.memory_space<vmem>>, vector<1x32x96xf32>
    %375 = vector.shape_cast %374 : vector<1x32x96xf32> to vector<32x96xf32>
    %cst_176 = arith.constant dense<0.000000e+00> : vector<8x96xf32>
    %376 = tpu.matmul %369, %375, %cst_176 {dimension_numbers = #tpu.dot_dimension_numbers<[1], [0], [0], [1], [0, 0, 1, 1], [], []>} : vector<8x32xf32>, vector<32x96xf32>, vector<8x96xf32> -> vector<8x96xf32>
    %c0_177 = arith.constant 0 : index
    %c0_178 = arith.constant 0 : index
    %c0_179 = arith.constant 0 : index
    %377 = vector.load %arg21[%c0_177, %c0_178, %c0_179] : memref<2x1x96xf32, #tpu.memory_space<vmem>>, vector<1x1x96xf32>
    %378 = vector.shape_cast %377 : vector<1x1x96xf32> to vector<1x96xf32>
    %379 = vector.broadcast %378 : vector<1x96xf32> to vector<8x96xf32>
    %380 = arith.addf %376, %379 : vector<8x96xf32>
    %381 = vector.extract_strided_slice %380 {offsets = [0, 0], sizes = [8, 32], strides = [1, 1]} : vector<8x96xf32> to vector<8x32xf32>
    %382 = vector.extract_strided_slice %380 {offsets = [0, 32], sizes = [8, 32], strides = [1, 1]} : vector<8x96xf32> to vector<8x32xf32>
    %383 = vector.extract_strided_slice %380 {offsets = [0, 64], sizes = [8, 32], strides = [1, 1]} : vector<8x96xf32> to vector<8x32xf32>
    %c0_180 = arith.constant 0 : index
    %c0_181 = arith.constant 0 : index
    %c0_182 = arith.constant 0 : index
    %384 = vector.load %arg22[%c0_180, %c0_181, %c0_182] : memref<2x32x32xf32, #tpu.memory_space<vmem>>, vector<1x32x32xf32>
    %385 = vector.shape_cast %384 : vector<1x32x32xf32> to vector<32x32xf32>
    %c0_183 = arith.constant 0 : index
    %c0_184 = arith.constant 0 : index
    %c0_185 = arith.constant 0 : index
    %386 = vector.load %arg23[%c0_183, %c0_184, %c0_185] : memref<2x1x32xf32, #tpu.memory_space<vmem>>, vector<1x1x32xf32>
    %387 = vector.shape_cast %386 : vector<1x1x32xf32> to vector<1x32xf32>
    %388 = vector.extract_strided_slice %381 {offsets = [0, 0], sizes = [8, 8], strides = [1, 1]} : vector<8x32xf32> to vector<8x8xf32>
    %389 = vector.extract_strided_slice %382 {offsets = [0, 0], sizes = [8, 8], strides = [1, 1]} : vector<8x32xf32> to vector<8x8xf32>
    %390 = tpu.transpose %389, [1, 0] : vector<8x8xf32> -> vector<8x8xf32>
    %cst_186 = arith.constant dense<0.000000e+00> : vector<8x8xf32>
    %391 = tpu.matmul %388, %390, %cst_186 {dimension_numbers = #tpu.dot_dimension_numbers<[1], [0], [0], [1], [0, 0, 1, 1], [], []>} : vector<8x8xf32>, vector<8x8xf32>, vector<8x8xf32> -> vector<8x8xf32>
    %cst_187 = arith.constant 0.353553385 : f32
    %392 = vector.broadcast %cst_187 : f32 to vector<8x8xf32>
    %393 = arith.mulf %391, %392 : vector<8x8xf32>
    %394 = arith.addf %393, %371 : vector<8x8xf32>
    %cst_188 = arith.constant dense<0xFF800000> : vector<8xf32>
    %395 = vector.multi_reduction <maximumf>, %394, %cst_188 [1] : vector<8x8xf32> to vector<8xf32>
    %396 = vector.shape_cast %395 : vector<8xf32> to vector<8x1xf32>
    %397 = vector.broadcast %396 : vector<8x1xf32> to vector<8x8xf32>
    %398 = arith.subf %394, %397 : vector<8x8xf32>
    %399 = math.exp %398 : vector<8x8xf32>
    %cst_189 = arith.constant dense<0.000000e+00> : vector<8xf32>
    %400 = vector.multi_reduction <add>, %399, %cst_189 [1] : vector<8x8xf32> to vector<8xf32>
    %401 = vector.shape_cast %400 : vector<8xf32> to vector<8x1xf32>
    %402 = vector.broadcast %401 : vector<8x1xf32> to vector<8x8xf32>
    %403 = arith.divf %399, %402 : vector<8x8xf32>
    %404 = vector.extract_strided_slice %383 {offsets = [0, 0], sizes = [8, 8], strides = [1, 1]} : vector<8x32xf32> to vector<8x8xf32>
    %cst_190 = arith.constant dense<0.000000e+00> : vector<8x8xf32>
    %405 = tpu.matmul %403, %404, %cst_190 {dimension_numbers = #tpu.dot_dimension_numbers<[1], [0], [0], [1], [0, 0, 1, 1], [], []>} : vector<8x8xf32>, vector<8x8xf32>, vector<8x8xf32> -> vector<8x8xf32>
    %406 = vector.extract_strided_slice %385 {offsets = [0, 0], sizes = [8, 32], strides = [1, 1]} : vector<32x32xf32> to vector<8x32xf32>
    %cst_191 = arith.constant dense<0.000000e+00> : vector<8x32xf32>
    %407 = tpu.matmul %405, %406, %cst_191 {dimension_numbers = #tpu.dot_dimension_numbers<[1], [0], [0], [1], [0, 0, 1, 1], [], []>} : vector<8x8xf32>, vector<8x32xf32>, vector<8x32xf32> -> vector<8x32xf32>
    %408 = vector.extract_strided_slice %381 {offsets = [0, 8], sizes = [8, 8], strides = [1, 1]} : vector<8x32xf32> to vector<8x8xf32>
    %409 = vector.extract_strided_slice %382 {offsets = [0, 8], sizes = [8, 8], strides = [1, 1]} : vector<8x32xf32> to vector<8x8xf32>
    %410 = tpu.transpose %409, [1, 0] : vector<8x8xf32> -> vector<8x8xf32>
    %cst_192 = arith.constant dense<0.000000e+00> : vector<8x8xf32>
    %411 = tpu.matmul %408, %410, %cst_192 {dimension_numbers = #tpu.dot_dimension_numbers<[1], [0], [0], [1], [0, 0, 1, 1], [], []>} : vector<8x8xf32>, vector<8x8xf32>, vector<8x8xf32> -> vector<8x8xf32>
    %cst_193 = arith.constant 0.353553385 : f32
    %412 = vector.broadcast %cst_193 : f32 to vector<8x8xf32>
    %413 = arith.mulf %411, %412 : vector<8x8xf32>
    %414 = arith.addf %413, %371 : vector<8x8xf32>
    %cst_194 = arith.constant dense<0xFF800000> : vector<8xf32>
    %415 = vector.multi_reduction <maximumf>, %414, %cst_194 [1] : vector<8x8xf32> to vector<8xf32>
    %416 = vector.shape_cast %415 : vector<8xf32> to vector<8x1xf32>
    %417 = vector.broadcast %416 : vector<8x1xf32> to vector<8x8xf32>
    %418 = arith.subf %414, %417 : vector<8x8xf32>
    %419 = math.exp %418 : vector<8x8xf32>
    %cst_195 = arith.constant dense<0.000000e+00> : vector<8xf32>
    %420 = vector.multi_reduction <add>, %419, %cst_195 [1] : vector<8x8xf32> to vector<8xf32>
    %421 = vector.shape_cast %420 : vector<8xf32> to vector<8x1xf32>
    %422 = vector.broadcast %421 : vector<8x1xf32> to vector<8x8xf32>
    %423 = arith.divf %419, %422 : vector<8x8xf32>
    %424 = vector.extract_strided_slice %383 {offsets = [0, 8], sizes = [8, 8], strides = [1, 1]} : vector<8x32xf32> to vector<8x8xf32>
    %cst_196 = arith.constant dense<0.000000e+00> : vector<8x8xf32>
    %425 = tpu.matmul %423, %424, %cst_196 {dimension_numbers = #tpu.dot_dimension_numbers<[1], [0], [0], [1], [0, 0, 1, 1], [], []>} : vector<8x8xf32>, vector<8x8xf32>, vector<8x8xf32> -> vector<8x8xf32>
    %426 = vector.extract_strided_slice %385 {offsets = [8, 0], sizes = [8, 32], strides = [1, 1]} : vector<32x32xf32> to vector<8x32xf32>
    %cst_197 = arith.constant dense<0.000000e+00> : vector<8x32xf32>
    %427 = tpu.matmul %425, %426, %cst_197 {dimension_numbers = #tpu.dot_dimension_numbers<[1], [0], [0], [1], [0, 0, 1, 1], [], []>} : vector<8x8xf32>, vector<8x32xf32>, vector<8x32xf32> -> vector<8x32xf32>
    %428 = arith.addf %407, %427 : vector<8x32xf32>
    %429 = vector.extract_strided_slice %381 {offsets = [0, 16], sizes = [8, 8], strides = [1, 1]} : vector<8x32xf32> to vector<8x8xf32>
    %430 = vector.extract_strided_slice %382 {offsets = [0, 16], sizes = [8, 8], strides = [1, 1]} : vector<8x32xf32> to vector<8x8xf32>
    %431 = tpu.transpose %430, [1, 0] : vector<8x8xf32> -> vector<8x8xf32>
    %cst_198 = arith.constant dense<0.000000e+00> : vector<8x8xf32>
    %432 = tpu.matmul %429, %431, %cst_198 {dimension_numbers = #tpu.dot_dimension_numbers<[1], [0], [0], [1], [0, 0, 1, 1], [], []>} : vector<8x8xf32>, vector<8x8xf32>, vector<8x8xf32> -> vector<8x8xf32>
    %cst_199 = arith.constant 0.353553385 : f32
    %433 = vector.broadcast %cst_199 : f32 to vector<8x8xf32>
    %434 = arith.mulf %432, %433 : vector<8x8xf32>
    %435 = arith.addf %434, %371 : vector<8x8xf32>
    %cst_200 = arith.constant dense<0xFF800000> : vector<8xf32>
    %436 = vector.multi_reduction <maximumf>, %435, %cst_200 [1] : vector<8x8xf32> to vector<8xf32>
    %437 = vector.shape_cast %436 : vector<8xf32> to vector<8x1xf32>
    %438 = vector.broadcast %437 : vector<8x1xf32> to vector<8x8xf32>
    %439 = arith.subf %435, %438 : vector<8x8xf32>
    %440 = math.exp %439 : vector<8x8xf32>
    %cst_201 = arith.constant dense<0.000000e+00> : vector<8xf32>
    %441 = vector.multi_reduction <add>, %440, %cst_201 [1] : vector<8x8xf32> to vector<8xf32>
    %442 = vector.shape_cast %441 : vector<8xf32> to vector<8x1xf32>
    %443 = vector.broadcast %442 : vector<8x1xf32> to vector<8x8xf32>
    %444 = arith.divf %440, %443 : vector<8x8xf32>
    %445 = vector.extract_strided_slice %383 {offsets = [0, 16], sizes = [8, 8], strides = [1, 1]} : vector<8x32xf32> to vector<8x8xf32>
    %cst_202 = arith.constant dense<0.000000e+00> : vector<8x8xf32>
    %446 = tpu.matmul %444, %445, %cst_202 {dimension_numbers = #tpu.dot_dimension_numbers<[1], [0], [0], [1], [0, 0, 1, 1], [], []>} : vector<8x8xf32>, vector<8x8xf32>, vector<8x8xf32> -> vector<8x8xf32>
    %447 = vector.extract_strided_slice %385 {offsets = [16, 0], sizes = [8, 32], strides = [1, 1]} : vector<32x32xf32> to vector<8x32xf32>
    %cst_203 = arith.constant dense<0.000000e+00> : vector<8x32xf32>
    %448 = tpu.matmul %446, %447, %cst_203 {dimension_numbers = #tpu.dot_dimension_numbers<[1], [0], [0], [1], [0, 0, 1, 1], [], []>} : vector<8x8xf32>, vector<8x32xf32>, vector<8x32xf32> -> vector<8x32xf32>
    %449 = arith.addf %428, %448 : vector<8x32xf32>
    %450 = vector.extract_strided_slice %381 {offsets = [0, 24], sizes = [8, 8], strides = [1, 1]} : vector<8x32xf32> to vector<8x8xf32>
    %451 = vector.extract_strided_slice %382 {offsets = [0, 24], sizes = [8, 8], strides = [1, 1]} : vector<8x32xf32> to vector<8x8xf32>
    %452 = tpu.transpose %451, [1, 0] : vector<8x8xf32> -> vector<8x8xf32>
    %cst_204 = arith.constant dense<0.000000e+00> : vector<8x8xf32>
    %453 = tpu.matmul %450, %452, %cst_204 {dimension_numbers = #tpu.dot_dimension_numbers<[1], [0], [0], [1], [0, 0, 1, 1], [], []>} : vector<8x8xf32>, vector<8x8xf32>, vector<8x8xf32> -> vector<8x8xf32>
    %cst_205 = arith.constant 0.353553385 : f32
    %454 = vector.broadcast %cst_205 : f32 to vector<8x8xf32>
    %455 = arith.mulf %453, %454 : vector<8x8xf32>
    %456 = arith.addf %455, %371 : vector<8x8xf32>
    %cst_206 = arith.constant dense<0xFF800000> : vector<8xf32>
    %457 = vector.multi_reduction <maximumf>, %456, %cst_206 [1] : vector<8x8xf32> to vector<8xf32>
    %458 = vector.shape_cast %457 : vector<8xf32> to vector<8x1xf32>
    %459 = vector.broadcast %458 : vector<8x1xf32> to vector<8x8xf32>
    %460 = arith.subf %456, %459 : vector<8x8xf32>
    %461 = math.exp %460 : vector<8x8xf32>
    %cst_207 = arith.constant dense<0.000000e+00> : vector<8xf32>
    %462 = vector.multi_reduction <add>, %461, %cst_207 [1] : vector<8x8xf32> to vector<8xf32>
    %463 = vector.shape_cast %462 : vector<8xf32> to vector<8x1xf32>
    %464 = vector.broadcast %463 : vector<8x1xf32> to vector<8x8xf32>
    %465 = arith.divf %461, %464 : vector<8x8xf32>
    %466 = vector.extract_strided_slice %383 {offsets = [0, 24], sizes = [8, 8], strides = [1, 1]} : vector<8x32xf32> to vector<8x8xf32>
    %cst_208 = arith.constant dense<0.000000e+00> : vector<8x8xf32>
    %467 = tpu.matmul %465, %466, %cst_208 {dimension_numbers = #tpu.dot_dimension_numbers<[1], [0], [0], [1], [0, 0, 1, 1], [], []>} : vector<8x8xf32>, vector<8x8xf32>, vector<8x8xf32> -> vector<8x8xf32>
    %468 = vector.extract_strided_slice %385 {offsets = [24, 0], sizes = [8, 32], strides = [1, 1]} : vector<32x32xf32> to vector<8x32xf32>
    %cst_209 = arith.constant dense<0.000000e+00> : vector<8x32xf32>
    %469 = tpu.matmul %467, %468, %cst_209 {dimension_numbers = #tpu.dot_dimension_numbers<[1], [0], [0], [1], [0, 0, 1, 1], [], []>} : vector<8x8xf32>, vector<8x32xf32>, vector<8x32xf32> -> vector<8x32xf32>
    %470 = arith.addf %449, %469 : vector<8x32xf32>
    %471 = vector.broadcast %387 : vector<1x32xf32> to vector<8x32xf32>
    %472 = arith.addf %470, %471 : vector<8x32xf32>
    %473 = arith.addf %369, %472 : vector<8x32xf32>
    %c0_210 = arith.constant 0 : index
    %c0_211 = arith.constant 0 : index
    %c0_212 = arith.constant 0 : index
    %474 = vector.load %arg24[%c0_210, %c0_211, %c0_212] : memref<2x1x32xf32, #tpu.memory_space<vmem>>, vector<1x1x32xf32>
    %475 = vector.shape_cast %474 : vector<1x1x32xf32> to vector<1x32xf32>
    %c0_213 = arith.constant 0 : index
    %c0_214 = arith.constant 0 : index
    %c0_215 = arith.constant 0 : index
    %476 = vector.load %arg25[%c0_213, %c0_214, %c0_215] : memref<2x1x32xf32, #tpu.memory_space<vmem>>, vector<1x1x32xf32>
    %477 = vector.shape_cast %476 : vector<1x1x32xf32> to vector<1x32xf32>
    %cst_216 = arith.constant dense<0.000000e+00> : vector<8xf32>
    %478 = vector.multi_reduction <add>, %473, %cst_216 [1] : vector<8x32xf32> to vector<8xf32>
    %479 = vector.shape_cast %478 : vector<8xf32> to vector<8x1xf32>
    %cst_217 = arith.constant 3.200000e+01 : f32
    %480 = vector.broadcast %cst_217 : f32 to vector<8x1xf32>
    %481 = arith.divf %479, %480 : vector<8x1xf32>
    %482 = vector.broadcast %481 : vector<8x1xf32> to vector<8x32xf32>
    %483 = arith.subf %473, %482 : vector<8x32xf32>
    %484 = arith.mulf %483, %483 : vector<8x32xf32>
    %cst_218 = arith.constant dense<0.000000e+00> : vector<8xf32>
    %485 = vector.multi_reduction <add>, %484, %cst_218 [1] : vector<8x32xf32> to vector<8xf32>
    %486 = vector.shape_cast %485 : vector<8xf32> to vector<8x1xf32>
    %cst_219 = arith.constant 3.200000e+01 : f32
    %487 = vector.broadcast %cst_219 : f32 to vector<8x1xf32>
    %488 = arith.divf %486, %487 : vector<8x1xf32>
    %cst_220 = arith.constant 9.99999997E-7 : f32
    %489 = vector.broadcast %cst_220 : f32 to vector<8x1xf32>
    %490 = arith.addf %488, %489 : vector<8x1xf32>
    %491 = math.rsqrt %490 : vector<8x1xf32>
    %492 = vector.broadcast %491 : vector<8x1xf32> to vector<8x32xf32>
    %493 = arith.mulf %483, %492 : vector<8x32xf32>
    %494 = vector.broadcast %475 : vector<1x32xf32> to vector<8x32xf32>
    %495 = arith.mulf %493, %494 : vector<8x32xf32>
    %496 = vector.broadcast %477 : vector<1x32xf32> to vector<8x32xf32>
    %497 = arith.addf %495, %496 : vector<8x32xf32>
    %c0_221 = arith.constant 0 : index
    %c0_222 = arith.constant 0 : index
    %c0_223 = arith.constant 0 : index
    %498 = vector.load %arg26[%c0_221, %c0_222, %c0_223] : memref<2x32x32xf32, #tpu.memory_space<vmem>>, vector<1x32x32xf32>
    %499 = vector.shape_cast %498 : vector<1x32x32xf32> to vector<32x32xf32>
    %cst_224 = arith.constant dense<0.000000e+00> : vector<8x32xf32>
    %500 = tpu.matmul %497, %499, %cst_224 {dimension_numbers = #tpu.dot_dimension_numbers<[1], [0], [0], [1], [0, 0, 1, 1], [], []>} : vector<8x32xf32>, vector<32x32xf32>, vector<8x32xf32> -> vector<8x32xf32>
    %c0_225 = arith.constant 0 : index
    %c0_226 = arith.constant 0 : index
    %c0_227 = arith.constant 0 : index
    %501 = vector.load %arg27[%c0_225, %c0_226, %c0_227] : memref<2x1x32xf32, #tpu.memory_space<vmem>>, vector<1x1x32xf32>
    %502 = vector.shape_cast %501 : vector<1x1x32xf32> to vector<1x32xf32>
    %503 = vector.broadcast %502 : vector<1x32xf32> to vector<8x32xf32>
    %504 = arith.addf %500, %503 : vector<8x32xf32>
    %c0_228 = arith.constant 0 : index
    %c0_229 = arith.constant 0 : index
    %c0_230 = arith.constant 0 : index
    %505 = vector.load %arg28[%c0_228, %c0_229, %c0_230] : memref<2x32x64xf32, #tpu.memory_space<vmem>>, vector<1x32x64xf32>
    %506 = vector.shape_cast %505 : vector<1x32x64xf32> to vector<32x64xf32>
    %cst_231 = arith.constant dense<0.000000e+00> : vector<8x64xf32>
    %507 = tpu.matmul %367, %506, %cst_231 {dimension_numbers = #tpu.dot_dimension_numbers<[1], [0], [0], [1], [0, 0, 1, 1], [], []>} : vector<8x32xf32>, vector<32x64xf32>, vector<8x64xf32> -> vector<8x64xf32>
    %c0_232 = arith.constant 0 : index
    %c0_233 = arith.constant 0 : index
    %c0_234 = arith.constant 0 : index
    %508 = vector.load %arg29[%c0_232, %c0_233, %c0_234] : memref<2x1x64xf32, #tpu.memory_space<vmem>>, vector<1x1x64xf32>
    %509 = vector.shape_cast %508 : vector<1x1x64xf32> to vector<1x64xf32>
    %510 = vector.broadcast %509 : vector<1x64xf32> to vector<8x64xf32>
    %511 = arith.addf %507, %510 : vector<8x64xf32>
    %512 = vector.extract_strided_slice %511 {offsets = [0, 0], sizes = [8, 32], strides = [1, 1]} : vector<8x64xf32> to vector<8x32xf32>
    %513 = vector.extract_strided_slice %511 {offsets = [0, 32], sizes = [8, 32], strides = [1, 1]} : vector<8x64xf32> to vector<8x32xf32>
    %c0_235 = arith.constant 0 : index
    %c0_236 = arith.constant 0 : index
    %c0_237 = arith.constant 0 : index
    %514 = vector.load %arg30[%c0_235, %c0_236, %c0_237] : memref<2x32x32xf32, #tpu.memory_space<vmem>>, vector<1x32x32xf32>
    %515 = vector.shape_cast %514 : vector<1x32x32xf32> to vector<32x32xf32>
    %c0_238 = arith.constant 0 : index
    %c0_239 = arith.constant 0 : index
    %c0_240 = arith.constant 0 : index
    %516 = vector.load %arg31[%c0_238, %c0_239, %c0_240] : memref<2x1x32xf32, #tpu.memory_space<vmem>>, vector<1x1x32xf32>
    %517 = vector.shape_cast %516 : vector<1x1x32xf32> to vector<1x32xf32>
    %518 = vector.extract_strided_slice %504 {offsets = [0, 0], sizes = [8, 8], strides = [1, 1]} : vector<8x32xf32> to vector<8x8xf32>
    %519 = vector.extract_strided_slice %512 {offsets = [0, 0], sizes = [8, 8], strides = [1, 1]} : vector<8x32xf32> to vector<8x8xf32>
    %520 = tpu.transpose %519, [1, 0] : vector<8x8xf32> -> vector<8x8xf32>
    %cst_241 = arith.constant dense<0.000000e+00> : vector<8x8xf32>
    %521 = tpu.matmul %518, %520, %cst_241 {dimension_numbers = #tpu.dot_dimension_numbers<[1], [0], [0], [1], [0, 0, 1, 1], [], []>} : vector<8x8xf32>, vector<8x8xf32>, vector<8x8xf32> -> vector<8x8xf32>
    %cst_242 = arith.constant 0.353553385 : f32
    %522 = vector.broadcast %cst_242 : f32 to vector<8x8xf32>
    %523 = arith.mulf %521, %522 : vector<8x8xf32>
    %524 = arith.addf %523, %373 : vector<8x8xf32>
    %cst_243 = arith.constant dense<0xFF800000> : vector<8xf32>
    %525 = vector.multi_reduction <maximumf>, %524, %cst_243 [1] : vector<8x8xf32> to vector<8xf32>
    %526 = vector.shape_cast %525 : vector<8xf32> to vector<8x1xf32>
    %527 = vector.broadcast %526 : vector<8x1xf32> to vector<8x8xf32>
    %528 = arith.subf %524, %527 : vector<8x8xf32>
    %529 = math.exp %528 : vector<8x8xf32>
    %cst_244 = arith.constant dense<0.000000e+00> : vector<8xf32>
    %530 = vector.multi_reduction <add>, %529, %cst_244 [1] : vector<8x8xf32> to vector<8xf32>
    %531 = vector.shape_cast %530 : vector<8xf32> to vector<8x1xf32>
    %532 = vector.broadcast %531 : vector<8x1xf32> to vector<8x8xf32>
    %533 = arith.divf %529, %532 : vector<8x8xf32>
    %534 = vector.extract_strided_slice %513 {offsets = [0, 0], sizes = [8, 8], strides = [1, 1]} : vector<8x32xf32> to vector<8x8xf32>
    %cst_245 = arith.constant dense<0.000000e+00> : vector<8x8xf32>
    %535 = tpu.matmul %533, %534, %cst_245 {dimension_numbers = #tpu.dot_dimension_numbers<[1], [0], [0], [1], [0, 0, 1, 1], [], []>} : vector<8x8xf32>, vector<8x8xf32>, vector<8x8xf32> -> vector<8x8xf32>
    %536 = vector.extract_strided_slice %515 {offsets = [0, 0], sizes = [8, 32], strides = [1, 1]} : vector<32x32xf32> to vector<8x32xf32>
    %cst_246 = arith.constant dense<0.000000e+00> : vector<8x32xf32>
    %537 = tpu.matmul %535, %536, %cst_246 {dimension_numbers = #tpu.dot_dimension_numbers<[1], [0], [0], [1], [0, 0, 1, 1], [], []>} : vector<8x8xf32>, vector<8x32xf32>, vector<8x32xf32> -> vector<8x32xf32>
    %538 = vector.extract_strided_slice %504 {offsets = [0, 8], sizes = [8, 8], strides = [1, 1]} : vector<8x32xf32> to vector<8x8xf32>
    %539 = vector.extract_strided_slice %512 {offsets = [0, 8], sizes = [8, 8], strides = [1, 1]} : vector<8x32xf32> to vector<8x8xf32>
    %540 = tpu.transpose %539, [1, 0] : vector<8x8xf32> -> vector<8x8xf32>
    %cst_247 = arith.constant dense<0.000000e+00> : vector<8x8xf32>
    %541 = tpu.matmul %538, %540, %cst_247 {dimension_numbers = #tpu.dot_dimension_numbers<[1], [0], [0], [1], [0, 0, 1, 1], [], []>} : vector<8x8xf32>, vector<8x8xf32>, vector<8x8xf32> -> vector<8x8xf32>
    %cst_248 = arith.constant 0.353553385 : f32
    %542 = vector.broadcast %cst_248 : f32 to vector<8x8xf32>
    %543 = arith.mulf %541, %542 : vector<8x8xf32>
    %544 = arith.addf %543, %373 : vector<8x8xf32>
    %cst_249 = arith.constant dense<0xFF800000> : vector<8xf32>
    %545 = vector.multi_reduction <maximumf>, %544, %cst_249 [1] : vector<8x8xf32> to vector<8xf32>
    %546 = vector.shape_cast %545 : vector<8xf32> to vector<8x1xf32>
    %547 = vector.broadcast %546 : vector<8x1xf32> to vector<8x8xf32>
    %548 = arith.subf %544, %547 : vector<8x8xf32>
    %549 = math.exp %548 : vector<8x8xf32>
    %cst_250 = arith.constant dense<0.000000e+00> : vector<8xf32>
    %550 = vector.multi_reduction <add>, %549, %cst_250 [1] : vector<8x8xf32> to vector<8xf32>
    %551 = vector.shape_cast %550 : vector<8xf32> to vector<8x1xf32>
    %552 = vector.broadcast %551 : vector<8x1xf32> to vector<8x8xf32>
    %553 = arith.divf %549, %552 : vector<8x8xf32>
    %554 = vector.extract_strided_slice %513 {offsets = [0, 8], sizes = [8, 8], strides = [1, 1]} : vector<8x32xf32> to vector<8x8xf32>
    %cst_251 = arith.constant dense<0.000000e+00> : vector<8x8xf32>
    %555 = tpu.matmul %553, %554, %cst_251 {dimension_numbers = #tpu.dot_dimension_numbers<[1], [0], [0], [1], [0, 0, 1, 1], [], []>} : vector<8x8xf32>, vector<8x8xf32>, vector<8x8xf32> -> vector<8x8xf32>
    %556 = vector.extract_strided_slice %515 {offsets = [8, 0], sizes = [8, 32], strides = [1, 1]} : vector<32x32xf32> to vector<8x32xf32>
    %cst_252 = arith.constant dense<0.000000e+00> : vector<8x32xf32>
    %557 = tpu.matmul %555, %556, %cst_252 {dimension_numbers = #tpu.dot_dimension_numbers<[1], [0], [0], [1], [0, 0, 1, 1], [], []>} : vector<8x8xf32>, vector<8x32xf32>, vector<8x32xf32> -> vector<8x32xf32>
    %558 = arith.addf %537, %557 : vector<8x32xf32>
    %559 = vector.extract_strided_slice %504 {offsets = [0, 16], sizes = [8, 8], strides = [1, 1]} : vector<8x32xf32> to vector<8x8xf32>
    %560 = vector.extract_strided_slice %512 {offsets = [0, 16], sizes = [8, 8], strides = [1, 1]} : vector<8x32xf32> to vector<8x8xf32>
    %561 = tpu.transpose %560, [1, 0] : vector<8x8xf32> -> vector<8x8xf32>
    %cst_253 = arith.constant dense<0.000000e+00> : vector<8x8xf32>
    %562 = tpu.matmul %559, %561, %cst_253 {dimension_numbers = #tpu.dot_dimension_numbers<[1], [0], [0], [1], [0, 0, 1, 1], [], []>} : vector<8x8xf32>, vector<8x8xf32>, vector<8x8xf32> -> vector<8x8xf32>
    %cst_254 = arith.constant 0.353553385 : f32
    %563 = vector.broadcast %cst_254 : f32 to vector<8x8xf32>
    %564 = arith.mulf %562, %563 : vector<8x8xf32>
    %565 = arith.addf %564, %373 : vector<8x8xf32>
    %cst_255 = arith.constant dense<0xFF800000> : vector<8xf32>
    %566 = vector.multi_reduction <maximumf>, %565, %cst_255 [1] : vector<8x8xf32> to vector<8xf32>
    %567 = vector.shape_cast %566 : vector<8xf32> to vector<8x1xf32>
    %568 = vector.broadcast %567 : vector<8x1xf32> to vector<8x8xf32>
    %569 = arith.subf %565, %568 : vector<8x8xf32>
    %570 = math.exp %569 : vector<8x8xf32>
    %cst_256 = arith.constant dense<0.000000e+00> : vector<8xf32>
    %571 = vector.multi_reduction <add>, %570, %cst_256 [1] : vector<8x8xf32> to vector<8xf32>
    %572 = vector.shape_cast %571 : vector<8xf32> to vector<8x1xf32>
    %573 = vector.broadcast %572 : vector<8x1xf32> to vector<8x8xf32>
    %574 = arith.divf %570, %573 : vector<8x8xf32>
    %575 = vector.extract_strided_slice %513 {offsets = [0, 16], sizes = [8, 8], strides = [1, 1]} : vector<8x32xf32> to vector<8x8xf32>
    %cst_257 = arith.constant dense<0.000000e+00> : vector<8x8xf32>
    %576 = tpu.matmul %574, %575, %cst_257 {dimension_numbers = #tpu.dot_dimension_numbers<[1], [0], [0], [1], [0, 0, 1, 1], [], []>} : vector<8x8xf32>, vector<8x8xf32>, vector<8x8xf32> -> vector<8x8xf32>
    %577 = vector.extract_strided_slice %515 {offsets = [16, 0], sizes = [8, 32], strides = [1, 1]} : vector<32x32xf32> to vector<8x32xf32>
    %cst_258 = arith.constant dense<0.000000e+00> : vector<8x32xf32>
    %578 = tpu.matmul %576, %577, %cst_258 {dimension_numbers = #tpu.dot_dimension_numbers<[1], [0], [0], [1], [0, 0, 1, 1], [], []>} : vector<8x8xf32>, vector<8x32xf32>, vector<8x32xf32> -> vector<8x32xf32>
    %579 = arith.addf %558, %578 : vector<8x32xf32>
    %580 = vector.extract_strided_slice %504 {offsets = [0, 24], sizes = [8, 8], strides = [1, 1]} : vector<8x32xf32> to vector<8x8xf32>
    %581 = vector.extract_strided_slice %512 {offsets = [0, 24], sizes = [8, 8], strides = [1, 1]} : vector<8x32xf32> to vector<8x8xf32>
    %582 = tpu.transpose %581, [1, 0] : vector<8x8xf32> -> vector<8x8xf32>
    %cst_259 = arith.constant dense<0.000000e+00> : vector<8x8xf32>
    %583 = tpu.matmul %580, %582, %cst_259 {dimension_numbers = #tpu.dot_dimension_numbers<[1], [0], [0], [1], [0, 0, 1, 1], [], []>} : vector<8x8xf32>, vector<8x8xf32>, vector<8x8xf32> -> vector<8x8xf32>
    %cst_260 = arith.constant 0.353553385 : f32
    %584 = vector.broadcast %cst_260 : f32 to vector<8x8xf32>
    %585 = arith.mulf %583, %584 : vector<8x8xf32>
    %586 = arith.addf %585, %373 : vector<8x8xf32>
    %cst_261 = arith.constant dense<0xFF800000> : vector<8xf32>
    %587 = vector.multi_reduction <maximumf>, %586, %cst_261 [1] : vector<8x8xf32> to vector<8xf32>
    %588 = vector.shape_cast %587 : vector<8xf32> to vector<8x1xf32>
    %589 = vector.broadcast %588 : vector<8x1xf32> to vector<8x8xf32>
    %590 = arith.subf %586, %589 : vector<8x8xf32>
    %591 = math.exp %590 : vector<8x8xf32>
    %cst_262 = arith.constant dense<0.000000e+00> : vector<8xf32>
    %592 = vector.multi_reduction <add>, %591, %cst_262 [1] : vector<8x8xf32> to vector<8xf32>
    %593 = vector.shape_cast %592 : vector<8xf32> to vector<8x1xf32>
    %594 = vector.broadcast %593 : vector<8x1xf32> to vector<8x8xf32>
    %595 = arith.divf %591, %594 : vector<8x8xf32>
    %596 = vector.extract_strided_slice %513 {offsets = [0, 24], sizes = [8, 8], strides = [1, 1]} : vector<8x32xf32> to vector<8x8xf32>
    %cst_263 = arith.constant dense<0.000000e+00> : vector<8x8xf32>
    %597 = tpu.matmul %595, %596, %cst_263 {dimension_numbers = #tpu.dot_dimension_numbers<[1], [0], [0], [1], [0, 0, 1, 1], [], []>} : vector<8x8xf32>, vector<8x8xf32>, vector<8x8xf32> -> vector<8x8xf32>
    %598 = vector.extract_strided_slice %515 {offsets = [24, 0], sizes = [8, 32], strides = [1, 1]} : vector<32x32xf32> to vector<8x32xf32>
    %cst_264 = arith.constant dense<0.000000e+00> : vector<8x32xf32>
    %599 = tpu.matmul %597, %598, %cst_264 {dimension_numbers = #tpu.dot_dimension_numbers<[1], [0], [0], [1], [0, 0, 1, 1], [], []>} : vector<8x8xf32>, vector<8x32xf32>, vector<8x32xf32> -> vector<8x32xf32>
    %600 = arith.addf %579, %599 : vector<8x32xf32>
    %601 = vector.broadcast %517 : vector<1x32xf32> to vector<8x32xf32>
    %602 = arith.addf %600, %601 : vector<8x32xf32>
    %603 = arith.addf %497, %602 : vector<8x32xf32>
    %c0_265 = arith.constant 0 : index
    %c0_266 = arith.constant 0 : index
    %c0_267 = arith.constant 0 : index
    %604 = vector.load %arg32[%c0_265, %c0_266, %c0_267] : memref<2x1x32xf32, #tpu.memory_space<vmem>>, vector<1x1x32xf32>
    %605 = vector.shape_cast %604 : vector<1x1x32xf32> to vector<1x32xf32>
    %c0_268 = arith.constant 0 : index
    %c0_269 = arith.constant 0 : index
    %c0_270 = arith.constant 0 : index
    %606 = vector.load %arg33[%c0_268, %c0_269, %c0_270] : memref<2x1x32xf32, #tpu.memory_space<vmem>>, vector<1x1x32xf32>
    %607 = vector.shape_cast %606 : vector<1x1x32xf32> to vector<1x32xf32>
    %cst_271 = arith.constant dense<0.000000e+00> : vector<8xf32>
    %608 = vector.multi_reduction <add>, %603, %cst_271 [1] : vector<8x32xf32> to vector<8xf32>
    %609 = vector.shape_cast %608 : vector<8xf32> to vector<8x1xf32>
    %cst_272 = arith.constant 3.200000e+01 : f32
    %610 = vector.broadcast %cst_272 : f32 to vector<8x1xf32>
    %611 = arith.divf %609, %610 : vector<8x1xf32>
    %612 = vector.broadcast %611 : vector<8x1xf32> to vector<8x32xf32>
    %613 = arith.subf %603, %612 : vector<8x32xf32>
    %614 = arith.mulf %613, %613 : vector<8x32xf32>
    %cst_273 = arith.constant dense<0.000000e+00> : vector<8xf32>
    %615 = vector.multi_reduction <add>, %614, %cst_273 [1] : vector<8x32xf32> to vector<8xf32>
    %616 = vector.shape_cast %615 : vector<8xf32> to vector<8x1xf32>
    %cst_274 = arith.constant 3.200000e+01 : f32
    %617 = vector.broadcast %cst_274 : f32 to vector<8x1xf32>
    %618 = arith.divf %616, %617 : vector<8x1xf32>
    %cst_275 = arith.constant 9.99999997E-7 : f32
    %619 = vector.broadcast %cst_275 : f32 to vector<8x1xf32>
    %620 = arith.addf %618, %619 : vector<8x1xf32>
    %621 = math.rsqrt %620 : vector<8x1xf32>
    %622 = vector.broadcast %621 : vector<8x1xf32> to vector<8x32xf32>
    %623 = arith.mulf %613, %622 : vector<8x32xf32>
    %624 = vector.broadcast %605 : vector<1x32xf32> to vector<8x32xf32>
    %625 = arith.mulf %623, %624 : vector<8x32xf32>
    %626 = vector.broadcast %607 : vector<1x32xf32> to vector<8x32xf32>
    %627 = arith.addf %625, %626 : vector<8x32xf32>
    %c0_276 = arith.constant 0 : index
    %c0_277 = arith.constant 0 : index
    %c0_278 = arith.constant 0 : index
    %628 = vector.load %arg34[%c0_276, %c0_277, %c0_278] : memref<2x32x64xf32, #tpu.memory_space<vmem>>, vector<1x32x64xf32>
    %629 = vector.shape_cast %628 : vector<1x32x64xf32> to vector<32x64xf32>
    %c0_279 = arith.constant 0 : index
    %c0_280 = arith.constant 0 : index
    %c0_281 = arith.constant 0 : index
    %630 = vector.load %arg35[%c0_279, %c0_280, %c0_281] : memref<2x1x64xf32, #tpu.memory_space<vmem>>, vector<1x1x64xf32>
    %631 = vector.shape_cast %630 : vector<1x1x64xf32> to vector<1x64xf32>
    %c0_282 = arith.constant 0 : index
    %c0_283 = arith.constant 0 : index
    %c0_284 = arith.constant 0 : index
    %632 = vector.load %arg36[%c0_282, %c0_283, %c0_284] : memref<2x64x32xf32, #tpu.memory_space<vmem>>, vector<1x64x32xf32>
    %633 = vector.shape_cast %632 : vector<1x64x32xf32> to vector<64x32xf32>
    %c0_285 = arith.constant 0 : index
    %c0_286 = arith.constant 0 : index
    %c0_287 = arith.constant 0 : index
    %634 = vector.load %arg37[%c0_285, %c0_286, %c0_287] : memref<2x1x32xf32, #tpu.memory_space<vmem>>, vector<1x1x32xf32>
    %635 = vector.shape_cast %634 : vector<1x1x32xf32> to vector<1x32xf32>
    %cst_288 = arith.constant dense<0.000000e+00> : vector<8x64xf32>
    %636 = tpu.matmul %627, %629, %cst_288 {dimension_numbers = #tpu.dot_dimension_numbers<[1], [0], [0], [1], [0, 0, 1, 1], [], []>} : vector<8x32xf32>, vector<32x64xf32>, vector<8x64xf32> -> vector<8x64xf32>
    %637 = vector.broadcast %631 : vector<1x64xf32> to vector<8x64xf32>
    %638 = arith.addf %636, %637 : vector<8x64xf32>
    %cst_289 = arith.constant 5.000000e-01 : f32
    %639 = vector.broadcast %cst_289 : f32 to vector<8x64xf32>
    %640 = arith.mulf %639, %638 : vector<8x64xf32>
    %cst_290 = arith.constant 0.707106769 : f32
    %641 = vector.broadcast %cst_290 : f32 to vector<8x64xf32>
    %642 = arith.mulf %638, %641 : vector<8x64xf32>
    %643 = math.erf %642 : vector<8x64xf32>
    %cst_291 = arith.constant 1.000000e+00 : f32
    %644 = vector.broadcast %cst_291 : f32 to vector<8x64xf32>
    %645 = arith.addf %644, %643 : vector<8x64xf32>
    %646 = arith.mulf %640, %645 : vector<8x64xf32>
    %cst_292 = arith.constant dense<0.000000e+00> : vector<8x32xf32>
    %647 = tpu.matmul %646, %633, %cst_292 {dimension_numbers = #tpu.dot_dimension_numbers<[1], [0], [0], [1], [0, 0, 1, 1], [], []>} : vector<8x64xf32>, vector<64x32xf32>, vector<8x32xf32> -> vector<8x32xf32>
    %648 = vector.broadcast %635 : vector<1x32xf32> to vector<8x32xf32>
    %649 = arith.addf %647, %648 : vector<8x32xf32>
    %650 = arith.addf %627, %649 : vector<8x32xf32>
    %c0_293 = arith.constant 0 : index
    %c0_294 = arith.constant 0 : index
    %c0_295 = arith.constant 0 : index
    %651 = vector.load %arg38[%c0_293, %c0_294, %c0_295] : memref<2x1x32xf32, #tpu.memory_space<vmem>>, vector<1x1x32xf32>
    %652 = vector.shape_cast %651 : vector<1x1x32xf32> to vector<1x32xf32>
    %c0_296 = arith.constant 0 : index
    %c0_297 = arith.constant 0 : index
    %c0_298 = arith.constant 0 : index
    %653 = vector.load %arg39[%c0_296, %c0_297, %c0_298] : memref<2x1x32xf32, #tpu.memory_space<vmem>>, vector<1x1x32xf32>
    %654 = vector.shape_cast %653 : vector<1x1x32xf32> to vector<1x32xf32>
    %cst_299 = arith.constant dense<0.000000e+00> : vector<8xf32>
    %655 = vector.multi_reduction <add>, %650, %cst_299 [1] : vector<8x32xf32> to vector<8xf32>
    %656 = vector.shape_cast %655 : vector<8xf32> to vector<8x1xf32>
    %cst_300 = arith.constant 3.200000e+01 : f32
    %657 = vector.broadcast %cst_300 : f32 to vector<8x1xf32>
    %658 = arith.divf %656, %657 : vector<8x1xf32>
    %659 = vector.broadcast %658 : vector<8x1xf32> to vector<8x32xf32>
    %660 = arith.subf %650, %659 : vector<8x32xf32>
    %661 = arith.mulf %660, %660 : vector<8x32xf32>
    %cst_301 = arith.constant dense<0.000000e+00> : vector<8xf32>
    %662 = vector.multi_reduction <add>, %661, %cst_301 [1] : vector<8x32xf32> to vector<8xf32>
    %663 = vector.shape_cast %662 : vector<8xf32> to vector<8x1xf32>
    %cst_302 = arith.constant 3.200000e+01 : f32
    %664 = vector.broadcast %cst_302 : f32 to vector<8x1xf32>
    %665 = arith.divf %663, %664 : vector<8x1xf32>
    %cst_303 = arith.constant 9.99999997E-7 : f32
    %666 = vector.broadcast %cst_303 : f32 to vector<8x1xf32>
    %667 = arith.addf %665, %666 : vector<8x1xf32>
    %668 = math.rsqrt %667 : vector<8x1xf32>
    %669 = vector.broadcast %668 : vector<8x1xf32> to vector<8x32xf32>
    %670 = arith.mulf %660, %669 : vector<8x32xf32>
    %671 = vector.broadcast %652 : vector<1x32xf32> to vector<8x32xf32>
    %672 = arith.mulf %670, %671 : vector<8x32xf32>
    %673 = vector.broadcast %654 : vector<1x32xf32> to vector<8x32xf32>
    %674 = arith.addf %672, %673 : vector<8x32xf32>
    %c1_304 = arith.constant 1 : index
    %c0_305 = arith.constant 0 : index
    %c0_306 = arith.constant 0 : index
    %675 = vector.load %arg20[%c1_304, %c0_305, %c0_306] : memref<2x32x96xf32, #tpu.memory_space<vmem>>, vector<1x32x96xf32>
    %676 = vector.shape_cast %675 : vector<1x32x96xf32> to vector<32x96xf32>
    %cst_307 = arith.constant dense<0.000000e+00> : vector<8x96xf32>
    %677 = tpu.matmul %674, %676, %cst_307 {dimension_numbers = #tpu.dot_dimension_numbers<[1], [0], [0], [1], [0, 0, 1, 1], [], []>} : vector<8x32xf32>, vector<32x96xf32>, vector<8x96xf32> -> vector<8x96xf32>
    %c1_308 = arith.constant 1 : index
    %c0_309 = arith.constant 0 : index
    %c0_310 = arith.constant 0 : index
    %678 = vector.load %arg21[%c1_308, %c0_309, %c0_310] : memref<2x1x96xf32, #tpu.memory_space<vmem>>, vector<1x1x96xf32>
    %679 = vector.shape_cast %678 : vector<1x1x96xf32> to vector<1x96xf32>
    %680 = vector.broadcast %679 : vector<1x96xf32> to vector<8x96xf32>
    %681 = arith.addf %677, %680 : vector<8x96xf32>
    %682 = vector.extract_strided_slice %681 {offsets = [0, 0], sizes = [8, 32], strides = [1, 1]} : vector<8x96xf32> to vector<8x32xf32>
    %683 = vector.extract_strided_slice %681 {offsets = [0, 32], sizes = [8, 32], strides = [1, 1]} : vector<8x96xf32> to vector<8x32xf32>
    %684 = vector.extract_strided_slice %681 {offsets = [0, 64], sizes = [8, 32], strides = [1, 1]} : vector<8x96xf32> to vector<8x32xf32>
    %c1_311 = arith.constant 1 : index
    %c0_312 = arith.constant 0 : index
    %c0_313 = arith.constant 0 : index
    %685 = vector.load %arg22[%c1_311, %c0_312, %c0_313] : memref<2x32x32xf32, #tpu.memory_space<vmem>>, vector<1x32x32xf32>
    %686 = vector.shape_cast %685 : vector<1x32x32xf32> to vector<32x32xf32>
    %c1_314 = arith.constant 1 : index
    %c0_315 = arith.constant 0 : index
    %c0_316 = arith.constant 0 : index
    %687 = vector.load %arg23[%c1_314, %c0_315, %c0_316] : memref<2x1x32xf32, #tpu.memory_space<vmem>>, vector<1x1x32xf32>
    %688 = vector.shape_cast %687 : vector<1x1x32xf32> to vector<1x32xf32>
    %689 = vector.extract_strided_slice %682 {offsets = [0, 0], sizes = [8, 8], strides = [1, 1]} : vector<8x32xf32> to vector<8x8xf32>
    %690 = vector.extract_strided_slice %683 {offsets = [0, 0], sizes = [8, 8], strides = [1, 1]} : vector<8x32xf32> to vector<8x8xf32>
    %691 = tpu.transpose %690, [1, 0] : vector<8x8xf32> -> vector<8x8xf32>
    %cst_317 = arith.constant dense<0.000000e+00> : vector<8x8xf32>
    %692 = tpu.matmul %689, %691, %cst_317 {dimension_numbers = #tpu.dot_dimension_numbers<[1], [0], [0], [1], [0, 0, 1, 1], [], []>} : vector<8x8xf32>, vector<8x8xf32>, vector<8x8xf32> -> vector<8x8xf32>
    %cst_318 = arith.constant 0.353553385 : f32
    %693 = vector.broadcast %cst_318 : f32 to vector<8x8xf32>
    %694 = arith.mulf %692, %693 : vector<8x8xf32>
    %695 = arith.addf %694, %371 : vector<8x8xf32>
    %cst_319 = arith.constant dense<0xFF800000> : vector<8xf32>
    %696 = vector.multi_reduction <maximumf>, %695, %cst_319 [1] : vector<8x8xf32> to vector<8xf32>
    %697 = vector.shape_cast %696 : vector<8xf32> to vector<8x1xf32>
    %698 = vector.broadcast %697 : vector<8x1xf32> to vector<8x8xf32>
    %699 = arith.subf %695, %698 : vector<8x8xf32>
    %700 = math.exp %699 : vector<8x8xf32>
    %cst_320 = arith.constant dense<0.000000e+00> : vector<8xf32>
    %701 = vector.multi_reduction <add>, %700, %cst_320 [1] : vector<8x8xf32> to vector<8xf32>
    %702 = vector.shape_cast %701 : vector<8xf32> to vector<8x1xf32>
    %703 = vector.broadcast %702 : vector<8x1xf32> to vector<8x8xf32>
    %704 = arith.divf %700, %703 : vector<8x8xf32>
    %705 = vector.extract_strided_slice %684 {offsets = [0, 0], sizes = [8, 8], strides = [1, 1]} : vector<8x32xf32> to vector<8x8xf32>
    %cst_321 = arith.constant dense<0.000000e+00> : vector<8x8xf32>
    %706 = tpu.matmul %704, %705, %cst_321 {dimension_numbers = #tpu.dot_dimension_numbers<[1], [0], [0], [1], [0, 0, 1, 1], [], []>} : vector<8x8xf32>, vector<8x8xf32>, vector<8x8xf32> -> vector<8x8xf32>
    %707 = vector.extract_strided_slice %686 {offsets = [0, 0], sizes = [8, 32], strides = [1, 1]} : vector<32x32xf32> to vector<8x32xf32>
    %cst_322 = arith.constant dense<0.000000e+00> : vector<8x32xf32>
    %708 = tpu.matmul %706, %707, %cst_322 {dimension_numbers = #tpu.dot_dimension_numbers<[1], [0], [0], [1], [0, 0, 1, 1], [], []>} : vector<8x8xf32>, vector<8x32xf32>, vector<8x32xf32> -> vector<8x32xf32>
    %709 = vector.extract_strided_slice %682 {offsets = [0, 8], sizes = [8, 8], strides = [1, 1]} : vector<8x32xf32> to vector<8x8xf32>
    %710 = vector.extract_strided_slice %683 {offsets = [0, 8], sizes = [8, 8], strides = [1, 1]} : vector<8x32xf32> to vector<8x8xf32>
    %711 = tpu.transpose %710, [1, 0] : vector<8x8xf32> -> vector<8x8xf32>
    %cst_323 = arith.constant dense<0.000000e+00> : vector<8x8xf32>
    %712 = tpu.matmul %709, %711, %cst_323 {dimension_numbers = #tpu.dot_dimension_numbers<[1], [0], [0], [1], [0, 0, 1, 1], [], []>} : vector<8x8xf32>, vector<8x8xf32>, vector<8x8xf32> -> vector<8x8xf32>
    %cst_324 = arith.constant 0.353553385 : f32
    %713 = vector.broadcast %cst_324 : f32 to vector<8x8xf32>
    %714 = arith.mulf %712, %713 : vector<8x8xf32>
    %715 = arith.addf %714, %371 : vector<8x8xf32>
    %cst_325 = arith.constant dense<0xFF800000> : vector<8xf32>
    %716 = vector.multi_reduction <maximumf>, %715, %cst_325 [1] : vector<8x8xf32> to vector<8xf32>
    %717 = vector.shape_cast %716 : vector<8xf32> to vector<8x1xf32>
    %718 = vector.broadcast %717 : vector<8x1xf32> to vector<8x8xf32>
    %719 = arith.subf %715, %718 : vector<8x8xf32>
    %720 = math.exp %719 : vector<8x8xf32>
    %cst_326 = arith.constant dense<0.000000e+00> : vector<8xf32>
    %721 = vector.multi_reduction <add>, %720, %cst_326 [1] : vector<8x8xf32> to vector<8xf32>
    %722 = vector.shape_cast %721 : vector<8xf32> to vector<8x1xf32>
    %723 = vector.broadcast %722 : vector<8x1xf32> to vector<8x8xf32>
    %724 = arith.divf %720, %723 : vector<8x8xf32>
    %725 = vector.extract_strided_slice %684 {offsets = [0, 8], sizes = [8, 8], strides = [1, 1]} : vector<8x32xf32> to vector<8x8xf32>
    %cst_327 = arith.constant dense<0.000000e+00> : vector<8x8xf32>
    %726 = tpu.matmul %724, %725, %cst_327 {dimension_numbers = #tpu.dot_dimension_numbers<[1], [0], [0], [1], [0, 0, 1, 1], [], []>} : vector<8x8xf32>, vector<8x8xf32>, vector<8x8xf32> -> vector<8x8xf32>
    %727 = vector.extract_strided_slice %686 {offsets = [8, 0], sizes = [8, 32], strides = [1, 1]} : vector<32x32xf32> to vector<8x32xf32>
    %cst_328 = arith.constant dense<0.000000e+00> : vector<8x32xf32>
    %728 = tpu.matmul %726, %727, %cst_328 {dimension_numbers = #tpu.dot_dimension_numbers<[1], [0], [0], [1], [0, 0, 1, 1], [], []>} : vector<8x8xf32>, vector<8x32xf32>, vector<8x32xf32> -> vector<8x32xf32>
    %729 = arith.addf %708, %728 : vector<8x32xf32>
    %730 = vector.extract_strided_slice %682 {offsets = [0, 16], sizes = [8, 8], strides = [1, 1]} : vector<8x32xf32> to vector<8x8xf32>
    %731 = vector.extract_strided_slice %683 {offsets = [0, 16], sizes = [8, 8], strides = [1, 1]} : vector<8x32xf32> to vector<8x8xf32>
    %732 = tpu.transpose %731, [1, 0] : vector<8x8xf32> -> vector<8x8xf32>
    %cst_329 = arith.constant dense<0.000000e+00> : vector<8x8xf32>
    %733 = tpu.matmul %730, %732, %cst_329 {dimension_numbers = #tpu.dot_dimension_numbers<[1], [0], [0], [1], [0, 0, 1, 1], [], []>} : vector<8x8xf32>, vector<8x8xf32>, vector<8x8xf32> -> vector<8x8xf32>
    %cst_330 = arith.constant 0.353553385 : f32
    %734 = vector.broadcast %cst_330 : f32 to vector<8x8xf32>
    %735 = arith.mulf %733, %734 : vector<8x8xf32>
    %736 = arith.addf %735, %371 : vector<8x8xf32>
    %cst_331 = arith.constant dense<0xFF800000> : vector<8xf32>
    %737 = vector.multi_reduction <maximumf>, %736, %cst_331 [1] : vector<8x8xf32> to vector<8xf32>
    %738 = vector.shape_cast %737 : vector<8xf32> to vector<8x1xf32>
    %739 = vector.broadcast %738 : vector<8x1xf32> to vector<8x8xf32>
    %740 = arith.subf %736, %739 : vector<8x8xf32>
    %741 = math.exp %740 : vector<8x8xf32>
    %cst_332 = arith.constant dense<0.000000e+00> : vector<8xf32>
    %742 = vector.multi_reduction <add>, %741, %cst_332 [1] : vector<8x8xf32> to vector<8xf32>
    %743 = vector.shape_cast %742 : vector<8xf32> to vector<8x1xf32>
    %744 = vector.broadcast %743 : vector<8x1xf32> to vector<8x8xf32>
    %745 = arith.divf %741, %744 : vector<8x8xf32>
    %746 = vector.extract_strided_slice %684 {offsets = [0, 16], sizes = [8, 8], strides = [1, 1]} : vector<8x32xf32> to vector<8x8xf32>
    %cst_333 = arith.constant dense<0.000000e+00> : vector<8x8xf32>
    %747 = tpu.matmul %745, %746, %cst_333 {dimension_numbers = #tpu.dot_dimension_numbers<[1], [0], [0], [1], [0, 0, 1, 1], [], []>} : vector<8x8xf32>, vector<8x8xf32>, vector<8x8xf32> -> vector<8x8xf32>
    %748 = vector.extract_strided_slice %686 {offsets = [16, 0], sizes = [8, 32], strides = [1, 1]} : vector<32x32xf32> to vector<8x32xf32>
    %cst_334 = arith.constant dense<0.000000e+00> : vector<8x32xf32>
    %749 = tpu.matmul %747, %748, %cst_334 {dimension_numbers = #tpu.dot_dimension_numbers<[1], [0], [0], [1], [0, 0, 1, 1], [], []>} : vector<8x8xf32>, vector<8x32xf32>, vector<8x32xf32> -> vector<8x32xf32>
    %750 = arith.addf %729, %749 : vector<8x32xf32>
    %751 = vector.extract_strided_slice %682 {offsets = [0, 24], sizes = [8, 8], strides = [1, 1]} : vector<8x32xf32> to vector<8x8xf32>
    %752 = vector.extract_strided_slice %683 {offsets = [0, 24], sizes = [8, 8], strides = [1, 1]} : vector<8x32xf32> to vector<8x8xf32>
    %753 = tpu.transpose %752, [1, 0] : vector<8x8xf32> -> vector<8x8xf32>
    %cst_335 = arith.constant dense<0.000000e+00> : vector<8x8xf32>
    %754 = tpu.matmul %751, %753, %cst_335 {dimension_numbers = #tpu.dot_dimension_numbers<[1], [0], [0], [1], [0, 0, 1, 1], [], []>} : vector<8x8xf32>, vector<8x8xf32>, vector<8x8xf32> -> vector<8x8xf32>
    %cst_336 = arith.constant 0.353553385 : f32
    %755 = vector.broadcast %cst_336 : f32 to vector<8x8xf32>
    %756 = arith.mulf %754, %755 : vector<8x8xf32>
    %757 = arith.addf %756, %371 : vector<8x8xf32>
    %cst_337 = arith.constant dense<0xFF800000> : vector<8xf32>
    %758 = vector.multi_reduction <maximumf>, %757, %cst_337 [1] : vector<8x8xf32> to vector<8xf32>
    %759 = vector.shape_cast %758 : vector<8xf32> to vector<8x1xf32>
    %760 = vector.broadcast %759 : vector<8x1xf32> to vector<8x8xf32>
    %761 = arith.subf %757, %760 : vector<8x8xf32>
    %762 = math.exp %761 : vector<8x8xf32>
    %cst_338 = arith.constant dense<0.000000e+00> : vector<8xf32>
    %763 = vector.multi_reduction <add>, %762, %cst_338 [1] : vector<8x8xf32> to vector<8xf32>
    %764 = vector.shape_cast %763 : vector<8xf32> to vector<8x1xf32>
    %765 = vector.broadcast %764 : vector<8x1xf32> to vector<8x8xf32>
    %766 = arith.divf %762, %765 : vector<8x8xf32>
    %767 = vector.extract_strided_slice %684 {offsets = [0, 24], sizes = [8, 8], strides = [1, 1]} : vector<8x32xf32> to vector<8x8xf32>
    %cst_339 = arith.constant dense<0.000000e+00> : vector<8x8xf32>
    %768 = tpu.matmul %766, %767, %cst_339 {dimension_numbers = #tpu.dot_dimension_numbers<[1], [0], [0], [1], [0, 0, 1, 1], [], []>} : vector<8x8xf32>, vector<8x8xf32>, vector<8x8xf32> -> vector<8x8xf32>
    %769 = vector.extract_strided_slice %686 {offsets = [24, 0], sizes = [8, 32], strides = [1, 1]} : vector<32x32xf32> to vector<8x32xf32>
    %cst_340 = arith.constant dense<0.000000e+00> : vector<8x32xf32>
    %770 = tpu.matmul %768, %769, %cst_340 {dimension_numbers = #tpu.dot_dimension_numbers<[1], [0], [0], [1], [0, 0, 1, 1], [], []>} : vector<8x8xf32>, vector<8x32xf32>, vector<8x32xf32> -> vector<8x32xf32>
    %771 = arith.addf %750, %770 : vector<8x32xf32>
    %772 = vector.broadcast %688 : vector<1x32xf32> to vector<8x32xf32>
    %773 = arith.addf %771, %772 : vector<8x32xf32>
    %774 = arith.addf %674, %773 : vector<8x32xf32>
    %c1_341 = arith.constant 1 : index
    %c0_342 = arith.constant 0 : index
    %c0_343 = arith.constant 0 : index
    %775 = vector.load %arg24[%c1_341, %c0_342, %c0_343] : memref<2x1x32xf32, #tpu.memory_space<vmem>>, vector<1x1x32xf32>
    %776 = vector.shape_cast %775 : vector<1x1x32xf32> to vector<1x32xf32>
    %c1_344 = arith.constant 1 : index
    %c0_345 = arith.constant 0 : index
    %c0_346 = arith.constant 0 : index
    %777 = vector.load %arg25[%c1_344, %c0_345, %c0_346] : memref<2x1x32xf32, #tpu.memory_space<vmem>>, vector<1x1x32xf32>
    %778 = vector.shape_cast %777 : vector<1x1x32xf32> to vector<1x32xf32>
    %cst_347 = arith.constant dense<0.000000e+00> : vector<8xf32>
    %779 = vector.multi_reduction <add>, %774, %cst_347 [1] : vector<8x32xf32> to vector<8xf32>
    %780 = vector.shape_cast %779 : vector<8xf32> to vector<8x1xf32>
    %cst_348 = arith.constant 3.200000e+01 : f32
    %781 = vector.broadcast %cst_348 : f32 to vector<8x1xf32>
    %782 = arith.divf %780, %781 : vector<8x1xf32>
    %783 = vector.broadcast %782 : vector<8x1xf32> to vector<8x32xf32>
    %784 = arith.subf %774, %783 : vector<8x32xf32>
    %785 = arith.mulf %784, %784 : vector<8x32xf32>
    %cst_349 = arith.constant dense<0.000000e+00> : vector<8xf32>
    %786 = vector.multi_reduction <add>, %785, %cst_349 [1] : vector<8x32xf32> to vector<8xf32>
    %787 = vector.shape_cast %786 : vector<8xf32> to vector<8x1xf32>
    %cst_350 = arith.constant 3.200000e+01 : f32
    %788 = vector.broadcast %cst_350 : f32 to vector<8x1xf32>
    %789 = arith.divf %787, %788 : vector<8x1xf32>
    %cst_351 = arith.constant 9.99999997E-7 : f32
    %790 = vector.broadcast %cst_351 : f32 to vector<8x1xf32>
    %791 = arith.addf %789, %790 : vector<8x1xf32>
    %792 = math.rsqrt %791 : vector<8x1xf32>
    %793 = vector.broadcast %792 : vector<8x1xf32> to vector<8x32xf32>
    %794 = arith.mulf %784, %793 : vector<8x32xf32>
    %795 = vector.broadcast %776 : vector<1x32xf32> to vector<8x32xf32>
    %796 = arith.mulf %794, %795 : vector<8x32xf32>
    %797 = vector.broadcast %778 : vector<1x32xf32> to vector<8x32xf32>
    %798 = arith.addf %796, %797 : vector<8x32xf32>
    %c1_352 = arith.constant 1 : index
    %c0_353 = arith.constant 0 : index
    %c0_354 = arith.constant 0 : index
    %799 = vector.load %arg26[%c1_352, %c0_353, %c0_354] : memref<2x32x32xf32, #tpu.memory_space<vmem>>, vector<1x32x32xf32>
    %800 = vector.shape_cast %799 : vector<1x32x32xf32> to vector<32x32xf32>
    %cst_355 = arith.constant dense<0.000000e+00> : vector<8x32xf32>
    %801 = tpu.matmul %798, %800, %cst_355 {dimension_numbers = #tpu.dot_dimension_numbers<[1], [0], [0], [1], [0, 0, 1, 1], [], []>} : vector<8x32xf32>, vector<32x32xf32>, vector<8x32xf32> -> vector<8x32xf32>
    %c1_356 = arith.constant 1 : index
    %c0_357 = arith.constant 0 : index
    %c0_358 = arith.constant 0 : index
    %802 = vector.load %arg27[%c1_356, %c0_357, %c0_358] : memref<2x1x32xf32, #tpu.memory_space<vmem>>, vector<1x1x32xf32>
    %803 = vector.shape_cast %802 : vector<1x1x32xf32> to vector<1x32xf32>
    %804 = vector.broadcast %803 : vector<1x32xf32> to vector<8x32xf32>
    %805 = arith.addf %801, %804 : vector<8x32xf32>
    %c1_359 = arith.constant 1 : index
    %c0_360 = arith.constant 0 : index
    %c0_361 = arith.constant 0 : index
    %806 = vector.load %arg28[%c1_359, %c0_360, %c0_361] : memref<2x32x64xf32, #tpu.memory_space<vmem>>, vector<1x32x64xf32>
    %807 = vector.shape_cast %806 : vector<1x32x64xf32> to vector<32x64xf32>
    %cst_362 = arith.constant dense<0.000000e+00> : vector<8x64xf32>
    %808 = tpu.matmul %367, %807, %cst_362 {dimension_numbers = #tpu.dot_dimension_numbers<[1], [0], [0], [1], [0, 0, 1, 1], [], []>} : vector<8x32xf32>, vector<32x64xf32>, vector<8x64xf32> -> vector<8x64xf32>
    %c1_363 = arith.constant 1 : index
    %c0_364 = arith.constant 0 : index
    %c0_365 = arith.constant 0 : index
    %809 = vector.load %arg29[%c1_363, %c0_364, %c0_365] : memref<2x1x64xf32, #tpu.memory_space<vmem>>, vector<1x1x64xf32>
    %810 = vector.shape_cast %809 : vector<1x1x64xf32> to vector<1x64xf32>
    %811 = vector.broadcast %810 : vector<1x64xf32> to vector<8x64xf32>
    %812 = arith.addf %808, %811 : vector<8x64xf32>
    %813 = vector.extract_strided_slice %812 {offsets = [0, 0], sizes = [8, 32], strides = [1, 1]} : vector<8x64xf32> to vector<8x32xf32>
    %814 = vector.extract_strided_slice %812 {offsets = [0, 32], sizes = [8, 32], strides = [1, 1]} : vector<8x64xf32> to vector<8x32xf32>
    %c1_366 = arith.constant 1 : index
    %c0_367 = arith.constant 0 : index
    %c0_368 = arith.constant 0 : index
    %815 = vector.load %arg30[%c1_366, %c0_367, %c0_368] : memref<2x32x32xf32, #tpu.memory_space<vmem>>, vector<1x32x32xf32>
    %816 = vector.shape_cast %815 : vector<1x32x32xf32> to vector<32x32xf32>
    %c1_369 = arith.constant 1 : index
    %c0_370 = arith.constant 0 : index
    %c0_371 = arith.constant 0 : index
    %817 = vector.load %arg31[%c1_369, %c0_370, %c0_371] : memref<2x1x32xf32, #tpu.memory_space<vmem>>, vector<1x1x32xf32>
    %818 = vector.shape_cast %817 : vector<1x1x32xf32> to vector<1x32xf32>
    %819 = vector.extract_strided_slice %805 {offsets = [0, 0], sizes = [8, 8], strides = [1, 1]} : vector<8x32xf32> to vector<8x8xf32>
    %820 = vector.extract_strided_slice %813 {offsets = [0, 0], sizes = [8, 8], strides = [1, 1]} : vector<8x32xf32> to vector<8x8xf32>
    %821 = tpu.transpose %820, [1, 0] : vector<8x8xf32> -> vector<8x8xf32>
    %cst_372 = arith.constant dense<0.000000e+00> : vector<8x8xf32>
    %822 = tpu.matmul %819, %821, %cst_372 {dimension_numbers = #tpu.dot_dimension_numbers<[1], [0], [0], [1], [0, 0, 1, 1], [], []>} : vector<8x8xf32>, vector<8x8xf32>, vector<8x8xf32> -> vector<8x8xf32>
    %cst_373 = arith.constant 0.353553385 : f32
    %823 = vector.broadcast %cst_373 : f32 to vector<8x8xf32>
    %824 = arith.mulf %822, %823 : vector<8x8xf32>
    %825 = arith.addf %824, %373 : vector<8x8xf32>
    %cst_374 = arith.constant dense<0xFF800000> : vector<8xf32>
    %826 = vector.multi_reduction <maximumf>, %825, %cst_374 [1] : vector<8x8xf32> to vector<8xf32>
    %827 = vector.shape_cast %826 : vector<8xf32> to vector<8x1xf32>
    %828 = vector.broadcast %827 : vector<8x1xf32> to vector<8x8xf32>
    %829 = arith.subf %825, %828 : vector<8x8xf32>
    %830 = math.exp %829 : vector<8x8xf32>
    %cst_375 = arith.constant dense<0.000000e+00> : vector<8xf32>
    %831 = vector.multi_reduction <add>, %830, %cst_375 [1] : vector<8x8xf32> to vector<8xf32>
    %832 = vector.shape_cast %831 : vector<8xf32> to vector<8x1xf32>
    %833 = vector.broadcast %832 : vector<8x1xf32> to vector<8x8xf32>
    %834 = arith.divf %830, %833 : vector<8x8xf32>
    %835 = vector.extract_strided_slice %814 {offsets = [0, 0], sizes = [8, 8], strides = [1, 1]} : vector<8x32xf32> to vector<8x8xf32>
    %cst_376 = arith.constant dense<0.000000e+00> : vector<8x8xf32>
    %836 = tpu.matmul %834, %835, %cst_376 {dimension_numbers = #tpu.dot_dimension_numbers<[1], [0], [0], [1], [0, 0, 1, 1], [], []>} : vector<8x8xf32>, vector<8x8xf32>, vector<8x8xf32> -> vector<8x8xf32>
    %837 = vector.extract_strided_slice %816 {offsets = [0, 0], sizes = [8, 32], strides = [1, 1]} : vector<32x32xf32> to vector<8x32xf32>
    %cst_377 = arith.constant dense<0.000000e+00> : vector<8x32xf32>
    %838 = tpu.matmul %836, %837, %cst_377 {dimension_numbers = #tpu.dot_dimension_numbers<[1], [0], [0], [1], [0, 0, 1, 1], [], []>} : vector<8x8xf32>, vector<8x32xf32>, vector<8x32xf32> -> vector<8x32xf32>
    %839 = vector.extract_strided_slice %805 {offsets = [0, 8], sizes = [8, 8], strides = [1, 1]} : vector<8x32xf32> to vector<8x8xf32>
    %840 = vector.extract_strided_slice %813 {offsets = [0, 8], sizes = [8, 8], strides = [1, 1]} : vector<8x32xf32> to vector<8x8xf32>
    %841 = tpu.transpose %840, [1, 0] : vector<8x8xf32> -> vector<8x8xf32>
    %cst_378 = arith.constant dense<0.000000e+00> : vector<8x8xf32>
    %842 = tpu.matmul %839, %841, %cst_378 {dimension_numbers = #tpu.dot_dimension_numbers<[1], [0], [0], [1], [0, 0, 1, 1], [], []>} : vector<8x8xf32>, vector<8x8xf32>, vector<8x8xf32> -> vector<8x8xf32>
    %cst_379 = arith.constant 0.353553385 : f32
    %843 = vector.broadcast %cst_379 : f32 to vector<8x8xf32>
    %844 = arith.mulf %842, %843 : vector<8x8xf32>
    %845 = arith.addf %844, %373 : vector<8x8xf32>
    %cst_380 = arith.constant dense<0xFF800000> : vector<8xf32>
    %846 = vector.multi_reduction <maximumf>, %845, %cst_380 [1] : vector<8x8xf32> to vector<8xf32>
    %847 = vector.shape_cast %846 : vector<8xf32> to vector<8x1xf32>
    %848 = vector.broadcast %847 : vector<8x1xf32> to vector<8x8xf32>
    %849 = arith.subf %845, %848 : vector<8x8xf32>
    %850 = math.exp %849 : vector<8x8xf32>
    %cst_381 = arith.constant dense<0.000000e+00> : vector<8xf32>
    %851 = vector.multi_reduction <add>, %850, %cst_381 [1] : vector<8x8xf32> to vector<8xf32>
    %852 = vector.shape_cast %851 : vector<8xf32> to vector<8x1xf32>
    %853 = vector.broadcast %852 : vector<8x1xf32> to vector<8x8xf32>
    %854 = arith.divf %850, %853 : vector<8x8xf32>
    %855 = vector.extract_strided_slice %814 {offsets = [0, 8], sizes = [8, 8], strides = [1, 1]} : vector<8x32xf32> to vector<8x8xf32>
    %cst_382 = arith.constant dense<0.000000e+00> : vector<8x8xf32>
    %856 = tpu.matmul %854, %855, %cst_382 {dimension_numbers = #tpu.dot_dimension_numbers<[1], [0], [0], [1], [0, 0, 1, 1], [], []>} : vector<8x8xf32>, vector<8x8xf32>, vector<8x8xf32> -> vector<8x8xf32>
    %857 = vector.extract_strided_slice %816 {offsets = [8, 0], sizes = [8, 32], strides = [1, 1]} : vector<32x32xf32> to vector<8x32xf32>
    %cst_383 = arith.constant dense<0.000000e+00> : vector<8x32xf32>
    %858 = tpu.matmul %856, %857, %cst_383 {dimension_numbers = #tpu.dot_dimension_numbers<[1], [0], [0], [1], [0, 0, 1, 1], [], []>} : vector<8x8xf32>, vector<8x32xf32>, vector<8x32xf32> -> vector<8x32xf32>
    %859 = arith.addf %838, %858 : vector<8x32xf32>
    %860 = vector.extract_strided_slice %805 {offsets = [0, 16], sizes = [8, 8], strides = [1, 1]} : vector<8x32xf32> to vector<8x8xf32>
    %861 = vector.extract_strided_slice %813 {offsets = [0, 16], sizes = [8, 8], strides = [1, 1]} : vector<8x32xf32> to vector<8x8xf32>
    %862 = tpu.transpose %861, [1, 0] : vector<8x8xf32> -> vector<8x8xf32>
    %cst_384 = arith.constant dense<0.000000e+00> : vector<8x8xf32>
    %863 = tpu.matmul %860, %862, %cst_384 {dimension_numbers = #tpu.dot_dimension_numbers<[1], [0], [0], [1], [0, 0, 1, 1], [], []>} : vector<8x8xf32>, vector<8x8xf32>, vector<8x8xf32> -> vector<8x8xf32>
    %cst_385 = arith.constant 0.353553385 : f32
    %864 = vector.broadcast %cst_385 : f32 to vector<8x8xf32>
    %865 = arith.mulf %863, %864 : vector<8x8xf32>
    %866 = arith.addf %865, %373 : vector<8x8xf32>
    %cst_386 = arith.constant dense<0xFF800000> : vector<8xf32>
    %867 = vector.multi_reduction <maximumf>, %866, %cst_386 [1] : vector<8x8xf32> to vector<8xf32>
    %868 = vector.shape_cast %867 : vector<8xf32> to vector<8x1xf32>
    %869 = vector.broadcast %868 : vector<8x1xf32> to vector<8x8xf32>
    %870 = arith.subf %866, %869 : vector<8x8xf32>
    %871 = math.exp %870 : vector<8x8xf32>
    %cst_387 = arith.constant dense<0.000000e+00> : vector<8xf32>
    %872 = vector.multi_reduction <add>, %871, %cst_387 [1] : vector<8x8xf32> to vector<8xf32>
    %873 = vector.shape_cast %872 : vector<8xf32> to vector<8x1xf32>
    %874 = vector.broadcast %873 : vector<8x1xf32> to vector<8x8xf32>
    %875 = arith.divf %871, %874 : vector<8x8xf32>
    %876 = vector.extract_strided_slice %814 {offsets = [0, 16], sizes = [8, 8], strides = [1, 1]} : vector<8x32xf32> to vector<8x8xf32>
    %cst_388 = arith.constant dense<0.000000e+00> : vector<8x8xf32>
    %877 = tpu.matmul %875, %876, %cst_388 {dimension_numbers = #tpu.dot_dimension_numbers<[1], [0], [0], [1], [0, 0, 1, 1], [], []>} : vector<8x8xf32>, vector<8x8xf32>, vector<8x8xf32> -> vector<8x8xf32>
    %878 = vector.extract_strided_slice %816 {offsets = [16, 0], sizes = [8, 32], strides = [1, 1]} : vector<32x32xf32> to vector<8x32xf32>
    %cst_389 = arith.constant dense<0.000000e+00> : vector<8x32xf32>
    %879 = tpu.matmul %877, %878, %cst_389 {dimension_numbers = #tpu.dot_dimension_numbers<[1], [0], [0], [1], [0, 0, 1, 1], [], []>} : vector<8x8xf32>, vector<8x32xf32>, vector<8x32xf32> -> vector<8x32xf32>
    %880 = arith.addf %859, %879 : vector<8x32xf32>
    %881 = vector.extract_strided_slice %805 {offsets = [0, 24], sizes = [8, 8], strides = [1, 1]} : vector<8x32xf32> to vector<8x8xf32>
    %882 = vector.extract_strided_slice %813 {offsets = [0, 24], sizes = [8, 8], strides = [1, 1]} : vector<8x32xf32> to vector<8x8xf32>
    %883 = tpu.transpose %882, [1, 0] : vector<8x8xf32> -> vector<8x8xf32>
    %cst_390 = arith.constant dense<0.000000e+00> : vector<8x8xf32>
    %884 = tpu.matmul %881, %883, %cst_390 {dimension_numbers = #tpu.dot_dimension_numbers<[1], [0], [0], [1], [0, 0, 1, 1], [], []>} : vector<8x8xf32>, vector<8x8xf32>, vector<8x8xf32> -> vector<8x8xf32>
    %cst_391 = arith.constant 0.353553385 : f32
    %885 = vector.broadcast %cst_391 : f32 to vector<8x8xf32>
    %886 = arith.mulf %884, %885 : vector<8x8xf32>
    %887 = arith.addf %886, %373 : vector<8x8xf32>
    %cst_392 = arith.constant dense<0xFF800000> : vector<8xf32>
    %888 = vector.multi_reduction <maximumf>, %887, %cst_392 [1] : vector<8x8xf32> to vector<8xf32>
    %889 = vector.shape_cast %888 : vector<8xf32> to vector<8x1xf32>
    %890 = vector.broadcast %889 : vector<8x1xf32> to vector<8x8xf32>
    %891 = arith.subf %887, %890 : vector<8x8xf32>
    %892 = math.exp %891 : vector<8x8xf32>
    %cst_393 = arith.constant dense<0.000000e+00> : vector<8xf32>
    %893 = vector.multi_reduction <add>, %892, %cst_393 [1] : vector<8x8xf32> to vector<8xf32>
    %894 = vector.shape_cast %893 : vector<8xf32> to vector<8x1xf32>
    %895 = vector.broadcast %894 : vector<8x1xf32> to vector<8x8xf32>
    %896 = arith.divf %892, %895 : vector<8x8xf32>
    %897 = vector.extract_strided_slice %814 {offsets = [0, 24], sizes = [8, 8], strides = [1, 1]} : vector<8x32xf32> to vector<8x8xf32>
    %cst_394 = arith.constant dense<0.000000e+00> : vector<8x8xf32>
    %898 = tpu.matmul %896, %897, %cst_394 {dimension_numbers = #tpu.dot_dimension_numbers<[1], [0], [0], [1], [0, 0, 1, 1], [], []>} : vector<8x8xf32>, vector<8x8xf32>, vector<8x8xf32> -> vector<8x8xf32>
    %899 = vector.extract_strided_slice %816 {offsets = [24, 0], sizes = [8, 32], strides = [1, 1]} : vector<32x32xf32> to vector<8x32xf32>
    %cst_395 = arith.constant dense<0.000000e+00> : vector<8x32xf32>
    %900 = tpu.matmul %898, %899, %cst_395 {dimension_numbers = #tpu.dot_dimension_numbers<[1], [0], [0], [1], [0, 0, 1, 1], [], []>} : vector<8x8xf32>, vector<8x32xf32>, vector<8x32xf32> -> vector<8x32xf32>
    %901 = arith.addf %880, %900 : vector<8x32xf32>
    %902 = vector.broadcast %818 : vector<1x32xf32> to vector<8x32xf32>
    %903 = arith.addf %901, %902 : vector<8x32xf32>
    %904 = arith.addf %798, %903 : vector<8x32xf32>
    %c1_396 = arith.constant 1 : index
    %c0_397 = arith.constant 0 : index
    %c0_398 = arith.constant 0 : index
    %905 = vector.load %arg32[%c1_396, %c0_397, %c0_398] : memref<2x1x32xf32, #tpu.memory_space<vmem>>, vector<1x1x32xf32>
    %906 = vector.shape_cast %905 : vector<1x1x32xf32> to vector<1x32xf32>
    %c1_399 = arith.constant 1 : index
    %c0_400 = arith.constant 0 : index
    %c0_401 = arith.constant 0 : index
    %907 = vector.load %arg33[%c1_399, %c0_400, %c0_401] : memref<2x1x32xf32, #tpu.memory_space<vmem>>, vector<1x1x32xf32>
    %908 = vector.shape_cast %907 : vector<1x1x32xf32> to vector<1x32xf32>
    %cst_402 = arith.constant dense<0.000000e+00> : vector<8xf32>
    %909 = vector.multi_reduction <add>, %904, %cst_402 [1] : vector<8x32xf32> to vector<8xf32>
    %910 = vector.shape_cast %909 : vector<8xf32> to vector<8x1xf32>
    %cst_403 = arith.constant 3.200000e+01 : f32
    %911 = vector.broadcast %cst_403 : f32 to vector<8x1xf32>
    %912 = arith.divf %910, %911 : vector<8x1xf32>
    %913 = vector.broadcast %912 : vector<8x1xf32> to vector<8x32xf32>
    %914 = arith.subf %904, %913 : vector<8x32xf32>
    %915 = arith.mulf %914, %914 : vector<8x32xf32>
    %cst_404 = arith.constant dense<0.000000e+00> : vector<8xf32>
    %916 = vector.multi_reduction <add>, %915, %cst_404 [1] : vector<8x32xf32> to vector<8xf32>
    %917 = vector.shape_cast %916 : vector<8xf32> to vector<8x1xf32>
    %cst_405 = arith.constant 3.200000e+01 : f32
    %918 = vector.broadcast %cst_405 : f32 to vector<8x1xf32>
    %919 = arith.divf %917, %918 : vector<8x1xf32>
    %cst_406 = arith.constant 9.99999997E-7 : f32
    %920 = vector.broadcast %cst_406 : f32 to vector<8x1xf32>
    %921 = arith.addf %919, %920 : vector<8x1xf32>
    %922 = math.rsqrt %921 : vector<8x1xf32>
    %923 = vector.broadcast %922 : vector<8x1xf32> to vector<8x32xf32>
    %924 = arith.mulf %914, %923 : vector<8x32xf32>
    %925 = vector.broadcast %906 : vector<1x32xf32> to vector<8x32xf32>
    %926 = arith.mulf %924, %925 : vector<8x32xf32>
    %927 = vector.broadcast %908 : vector<1x32xf32> to vector<8x32xf32>
    %928 = arith.addf %926, %927 : vector<8x32xf32>
    %c1_407 = arith.constant 1 : index
    %c0_408 = arith.constant 0 : index
    %c0_409 = arith.constant 0 : index
    %929 = vector.load %arg34[%c1_407, %c0_408, %c0_409] : memref<2x32x64xf32, #tpu.memory_space<vmem>>, vector<1x32x64xf32>
    %930 = vector.shape_cast %929 : vector<1x32x64xf32> to vector<32x64xf32>
    %c1_410 = arith.constant 1 : index
    %c0_411 = arith.constant 0 : index
    %c0_412 = arith.constant 0 : index
    %931 = vector.load %arg35[%c1_410, %c0_411, %c0_412] : memref<2x1x64xf32, #tpu.memory_space<vmem>>, vector<1x1x64xf32>
    %932 = vector.shape_cast %931 : vector<1x1x64xf32> to vector<1x64xf32>
    %c1_413 = arith.constant 1 : index
    %c0_414 = arith.constant 0 : index
    %c0_415 = arith.constant 0 : index
    %933 = vector.load %arg36[%c1_413, %c0_414, %c0_415] : memref<2x64x32xf32, #tpu.memory_space<vmem>>, vector<1x64x32xf32>
    %934 = vector.shape_cast %933 : vector<1x64x32xf32> to vector<64x32xf32>
    %c1_416 = arith.constant 1 : index
    %c0_417 = arith.constant 0 : index
    %c0_418 = arith.constant 0 : index
    %935 = vector.load %arg37[%c1_416, %c0_417, %c0_418] : memref<2x1x32xf32, #tpu.memory_space<vmem>>, vector<1x1x32xf32>
    %936 = vector.shape_cast %935 : vector<1x1x32xf32> to vector<1x32xf32>
    %cst_419 = arith.constant dense<0.000000e+00> : vector<8x64xf32>
    %937 = tpu.matmul %928, %930, %cst_419 {dimension_numbers = #tpu.dot_dimension_numbers<[1], [0], [0], [1], [0, 0, 1, 1], [], []>} : vector<8x32xf32>, vector<32x64xf32>, vector<8x64xf32> -> vector<8x64xf32>
    %938 = vector.broadcast %932 : vector<1x64xf32> to vector<8x64xf32>
    %939 = arith.addf %937, %938 : vector<8x64xf32>
    %cst_420 = arith.constant 5.000000e-01 : f32
    %940 = vector.broadcast %cst_420 : f32 to vector<8x64xf32>
    %941 = arith.mulf %940, %939 : vector<8x64xf32>
    %cst_421 = arith.constant 0.707106769 : f32
    %942 = vector.broadcast %cst_421 : f32 to vector<8x64xf32>
    %943 = arith.mulf %939, %942 : vector<8x64xf32>
    %944 = math.erf %943 : vector<8x64xf32>
    %cst_422 = arith.constant 1.000000e+00 : f32
    %945 = vector.broadcast %cst_422 : f32 to vector<8x64xf32>
    %946 = arith.addf %945, %944 : vector<8x64xf32>
    %947 = arith.mulf %941, %946 : vector<8x64xf32>
    %cst_423 = arith.constant dense<0.000000e+00> : vector<8x32xf32>
    %948 = tpu.matmul %947, %934, %cst_423 {dimension_numbers = #tpu.dot_dimension_numbers<[1], [0], [0], [1], [0, 0, 1, 1], [], []>} : vector<8x64xf32>, vector<64x32xf32>, vector<8x32xf32> -> vector<8x32xf32>
    %949 = vector.broadcast %936 : vector<1x32xf32> to vector<8x32xf32>
    %950 = arith.addf %948, %949 : vector<8x32xf32>
    %951 = arith.addf %928, %950 : vector<8x32xf32>
    %c1_424 = arith.constant 1 : index
    %c0_425 = arith.constant 0 : index
    %c0_426 = arith.constant 0 : index
    %952 = vector.load %arg38[%c1_424, %c0_425, %c0_426] : memref<2x1x32xf32, #tpu.memory_space<vmem>>, vector<1x1x32xf32>
    %953 = vector.shape_cast %952 : vector<1x1x32xf32> to vector<1x32xf32>
    %c1_427 = arith.constant 1 : index
    %c0_428 = arith.constant 0 : index
    %c0_429 = arith.constant 0 : index
    %954 = vector.load %arg39[%c1_427, %c0_428, %c0_429] : memref<2x1x32xf32, #tpu.memory_space<vmem>>, vector<1x1x32xf32>
    %955 = vector.shape_cast %954 : vector<1x1x32xf32> to vector<1x32xf32>
    %cst_430 = arith.constant dense<0.000000e+00> : vector<8xf32>
    %956 = vector.multi_reduction <add>, %951, %cst_430 [1] : vector<8x32xf32> to vector<8xf32>
    %957 = vector.shape_cast %956 : vector<8xf32> to vector<8x1xf32>
    %cst_431 = arith.constant 3.200000e+01 : f32
    %958 = vector.broadcast %cst_431 : f32 to vector<8x1xf32>
    %959 = arith.divf %957, %958 : vector<8x1xf32>
    %960 = vector.broadcast %959 : vector<8x1xf32> to vector<8x32xf32>
    %961 = arith.subf %951, %960 : vector<8x32xf32>
    %962 = arith.mulf %961, %961 : vector<8x32xf32>
    %cst_432 = arith.constant dense<0.000000e+00> : vector<8xf32>
    %963 = vector.multi_reduction <add>, %962, %cst_432 [1] : vector<8x32xf32> to vector<8xf32>
    %964 = vector.shape_cast %963 : vector<8xf32> to vector<8x1xf32>
    %cst_433 = arith.constant 3.200000e+01 : f32
    %965 = vector.broadcast %cst_433 : f32 to vector<8x1xf32>
    %966 = arith.divf %964, %965 : vector<8x1xf32>
    %cst_434 = arith.constant 9.99999997E-7 : f32
    %967 = vector.broadcast %cst_434 : f32 to vector<8x1xf32>
    %968 = arith.addf %966, %967 : vector<8x1xf32>
    %969 = math.rsqrt %968 : vector<8x1xf32>
    %970 = vector.broadcast %969 : vector<8x1xf32> to vector<8x32xf32>
    %971 = arith.mulf %961, %970 : vector<8x32xf32>
    %972 = vector.broadcast %953 : vector<1x32xf32> to vector<8x32xf32>
    %973 = arith.mulf %971, %972 : vector<8x32xf32>
    %974 = vector.broadcast %955 : vector<1x32xf32> to vector<8x32xf32>
    %975 = arith.addf %973, %974 : vector<8x32xf32>
    %c0_435 = arith.constant 0 : index
    %c0_436 = arith.constant 0 : index
    %976 = vector.load %arg40[%c0_435, %c0_436] : memref<1x32xf32, #tpu.memory_space<vmem>>, vector<1x32xf32>
    %c0_437 = arith.constant 0 : index
    %c0_438 = arith.constant 0 : index
    %977 = vector.load %arg41[%c0_437, %c0_438] : memref<1x32xf32, #tpu.memory_space<vmem>>, vector<1x32xf32>
    %cst_439 = arith.constant dense<0.000000e+00> : vector<8xf32>
    %978 = vector.multi_reduction <add>, %975, %cst_439 [1] : vector<8x32xf32> to vector<8xf32>
    %979 = vector.shape_cast %978 : vector<8xf32> to vector<8x1xf32>
    %cst_440 = arith.constant 3.200000e+01 : f32
    %980 = vector.broadcast %cst_440 : f32 to vector<8x1xf32>
    %981 = arith.divf %979, %980 : vector<8x1xf32>
    %982 = vector.broadcast %981 : vector<8x1xf32> to vector<8x32xf32>
    %983 = arith.subf %975, %982 : vector<8x32xf32>
    %984 = arith.mulf %983, %983 : vector<8x32xf32>
    %cst_441 = arith.constant dense<0.000000e+00> : vector<8xf32>
    %985 = vector.multi_reduction <add>, %984, %cst_441 [1] : vector<8x32xf32> to vector<8xf32>
    %986 = vector.shape_cast %985 : vector<8xf32> to vector<8x1xf32>
    %cst_442 = arith.constant 3.200000e+01 : f32
    %987 = vector.broadcast %cst_442 : f32 to vector<8x1xf32>
    %988 = arith.divf %986, %987 : vector<8x1xf32>
    %cst_443 = arith.constant 9.99999997E-7 : f32
    %989 = vector.broadcast %cst_443 : f32 to vector<8x1xf32>
    %990 = arith.addf %988, %989 : vector<8x1xf32>
    %991 = math.rsqrt %990 : vector<8x1xf32>
    %992 = vector.broadcast %991 : vector<8x1xf32> to vector<8x32xf32>
    %993 = arith.mulf %983, %992 : vector<8x32xf32>
    %994 = vector.broadcast %976 : vector<1x32xf32> to vector<8x32xf32>
    %995 = arith.mulf %993, %994 : vector<8x32xf32>
    %996 = vector.broadcast %977 : vector<1x32xf32> to vector<8x32xf32>
    %997 = arith.addf %995, %996 : vector<8x32xf32>
    %c0_444 = arith.constant 0 : index
    %c0_445 = arith.constant 0 : index
    %998 = vector.load %arg42[%c0_444, %c0_445] : memref<32x128xf32, #tpu.memory_space<vmem>>, vector<32x128xf32>
    %cst_446 = arith.constant dense<0.000000e+00> : vector<8x128xf32>
    %999 = tpu.matmul %997, %998, %cst_446 {dimension_numbers = #tpu.dot_dimension_numbers<[1], [0], [0], [1], [0, 0, 1, 1], [], []>} : vector<8x32xf32>, vector<32x128xf32>, vector<8x128xf32> -> vector<8x128xf32>
    %c0_447 = arith.constant 0 : index
    %c0_448 = arith.constant 0 : index
    %1000 = vector.load %arg43[%c0_447, %c0_448] : memref<1x128xf32, #tpu.memory_space<vmem>>, vector<1x128xf32>
    %1001 = vector.broadcast %1000 : vector<1x128xf32> to vector<8x128xf32>
    %1002 = arith.addf %999, %1001 : vector<8x128xf32>
    %c0_449 = arith.constant 0 : index
    %c0_450 = arith.constant 0 : index
    %c0_451 = arith.constant 0 : index
    %1003 = vector.load %arg44[%c0_449, %c0_450, %c0_451] : memref<1x8x128xf32, #tpu.memory_space<vmem>>, vector<1x8x128xf32>
    %1004 = vector.shape_cast %1003 : vector<1x8x128xf32> to vector<8x128xf32>
    %1005 = vector.shape_cast %1002 : vector<8x128xf32> to vector<1x8x128xf32>
    tpu.vector_store %arg44[%c0_449, %c0_450, %c0_451], %1005 {strides = array<i32>} : memref<1x8x128xf32, #tpu.memory_space<vmem>>, vector<1x8x128xf32>,
    return
  }
  func.func @transform_0(%arg0: i32) -> (i32, i32, i32) {
    %c0_i32 = arith.constant 0 : i32
    %c0_i32_0 = arith.constant 0 : i32
    %c0_i32_1 = arith.constant 0 : i32
    return %arg0, %c0_i32, %c0_i32_0 : i32, i32, i32
  }
  func.func @transform_1(%arg0: i32) -> (i32, i32, i32) {
    %c0_i32 = arith.constant 0 : i32
    %c0_i32_0 = arith.constant 0 : i32
    %c0_i32_1 = arith.constant 0 : i32
    return %arg0, %c0_i32, %c0_i32_0 : i32, i32, i32
  }
  func.func @transform_2(%arg0: i32) -> (i32, i32, i32) {
    %c0_i32 = arith.constant 0 : i32
    %c0_i32_0 = arith.constant 0 : i32
    %c0_i32_1 = arith.constant 0 : i32
    return %arg0, %c0_i32, %c0_i32_0 : i32, i32, i32
  }
  func.func @transform_3(%arg0: i32) -> (i32, i32, i32) {
    %c0_i32 = arith.constant 0 : i32
    %c0_i32_0 = arith.constant 0 : i32
    %c0_i32_1 = arith.constant 0 : i32
    return %arg0, %c0_i32, %c0_i32_0 : i32, i32, i32
  }
  func.func @transform_4(%arg0: i32) -> (i32, i32, i32) {
    %c0_i32 = arith.constant 0 : i32
    %c0_i32_0 = arith.constant 0 : i32
    %c0_i32_1 = arith.constant 0 : i32
    return %arg0, %c0_i32, %c0_i32_0 : i32, i32, i32
  }
  func.func @transform_5(%arg0: i32) -> (i32, i32, i32) {
    %c0_i32 = arith.constant 0 : i32
    %c0_i32_0 = arith.constant 0 : i32
    %c0_i32_1 = arith.constant 0 : i32
    %c0_i32_2 = arith.constant 0 : i32
    return %c0_i32, %c0_i32_0, %c0_i32_1 : i32, i32, i32
  }
  func.func @transform_6(%arg0: i32) -> (i32, i32, i32) {
    %c0_i32 = arith.constant 0 : i32
    %c0_i32_0 = arith.constant 0 : i32
    %c0_i32_1 = arith.constant 0 : i32
    %c0_i32_2 = arith.constant 0 : i32
    return %c0_i32, %c0_i32_0, %c0_i32_1 : i32, i32, i32
  }
  func.func @transform_7(%arg0: i32) -> (i32, i32, i32) {
    %c0_i32 = arith.constant 0 : i32
    %c0_i32_0 = arith.constant 0 : i32
    %c0_i32_1 = arith.constant 0 : i32
    %c0_i32_2 = arith.constant 0 : i32
    return %c0_i32, %c0_i32_0, %c0_i32_1 : i32, i32, i32
  }
  func.func @transform_8(%arg0: i32) -> (i32, i32, i32) {
    %c0_i32 = arith.constant 0 : i32
    %c0_i32_0 = arith.constant 0 : i32
    %c0_i32_1 = arith.constant 0 : i32
    %c0_i32_2 = arith.constant 0 : i32
    return %c0_i32, %c0_i32_0, %c0_i32_1 : i32, i32, i32
  }
  func.func @transform_9(%arg0: i32) -> (i32, i32, i32) {
    %c0_i32 = arith.constant 0 : i32
    %c0_i32_0 = arith.constant 0 : i32
    %c0_i32_1 = arith.constant 0 : i32
    %c0_i32_2 = arith.constant 0 : i32
    return %c0_i32, %c0_i32_0, %c0_i32_1 : i32, i32, i32
  }
  func.func @transform_10(%arg0: i32) -> (i32, i32, i32) {
    %c0_i32 = arith.constant 0 : i32
    %c0_i32_0 = arith.constant 0 : i32
    %c0_i32_1 = arith.constant 0 : i32
    %c0_i32_2 = arith.constant 0 : i32
    return %c0_i32, %c0_i32_0, %c0_i32_1 : i32, i32, i32
  }
  func.func @transform_11(%arg0: i32) -> (i32, i32, i32) {
    %c0_i32 = arith.constant 0 : i32
    %c0_i32_0 = arith.constant 0 : i32
    %c0_i32_1 = arith.constant 0 : i32
    %c0_i32_2 = arith.constant 0 : i32
    return %c0_i32, %c0_i32_0, %c0_i32_1 : i32, i32, i32
  }
  func.func @transform_12(%arg0: i32) -> (i32, i32, i32) {
    %c0_i32 = arith.constant 0 : i32
    %c0_i32_0 = arith.constant 0 : i32
    %c0_i32_1 = arith.constant 0 : i32
    %c0_i32_2 = arith.constant 0 : i32
    return %c0_i32, %c0_i32_0, %c0_i32_1 : i32, i32, i32
  }
  func.func @transform_13(%arg0: i32) -> (i32, i32, i32) {
    %c0_i32 = arith.constant 0 : i32
    %c0_i32_0 = arith.constant 0 : i32
    %c0_i32_1 = arith.constant 0 : i32
    %c0_i32_2 = arith.constant 0 : i32
    return %c0_i32, %c0_i32_0, %c0_i32_1 : i32, i32, i32
  }
  func.func @transform_14(%arg0: i32) -> (i32, i32, i32) {
    %c0_i32 = arith.constant 0 : i32
    %c0_i32_0 = arith.constant 0 : i32
    %c0_i32_1 = arith.constant 0 : i32
    %c0_i32_2 = arith.constant 0 : i32
    return %c0_i32, %c0_i32_0, %c0_i32_1 : i32, i32, i32
  }
  func.func @transform_15(%arg0: i32) -> (i32, i32, i32) {
    %c0_i32 = arith.constant 0 : i32
    %c0_i32_0 = arith.constant 0 : i32
    %c0_i32_1 = arith.constant 0 : i32
    %c0_i32_2 = arith.constant 0 : i32
    return %c0_i32, %c0_i32_0, %c0_i32_1 : i32, i32, i32
  }
  func.func @transform_16(%arg0: i32) -> (i32, i32, i32) {
    %c0_i32 = arith.constant 0 : i32
    %c0_i32_0 = arith.constant 0 : i32
    %c0_i32_1 = arith.constant 0 : i32
    %c0_i32_2 = arith.constant 0 : i32
    return %c0_i32, %c0_i32_0, %c0_i32_1 : i32, i32, i32
  }
  func.func @transform_17(%arg0: i32) -> (i32, i32) {
    %c0_i32 = arith.constant 0 : i32
    %c0_i32_0 = arith.constant 0 : i32
    %c0_i32_1 = arith.constant 0 : i32
    return %c0_i32, %c0_i32_0 : i32, i32
  }
  func.func @transform_18(%arg0: i32) -> (i32, i32) {
    %c0_i32 = arith.constant 0 : i32
    %c0_i32_0 = arith.constant 0 : i32
    %c0_i32_1 = arith.constant 0 : i32
    return %c0_i32, %c0_i32_0 : i32, i32
  }
  func.func @transform_19(%arg0: i32) -> (i32, i32, i32) {
    %c0_i32 = arith.constant 0 : i32
    %c0_i32_0 = arith.constant 0 : i32
    %c0_i32_1 = arith.constant 0 : i32
    %c0_i32_2 = arith.constant 0 : i32
    return %c0_i32, %c0_i32_0, %c0_i32_1 : i32, i32, i32
  }
  func.func @transform_20(%arg0: i32) -> (i32, i32, i32) {
    %c0_i32 = arith.constant 0 : i32
    %c0_i32_0 = arith.constant 0 : i32
    %c0_i32_1 = arith.constant 0 : i32
    %c0_i32_2 = arith.constant 0 : i32
    return %c0_i32, %c0_i32_0, %c0_i32_1 : i32, i32, i32
  }
  func.func @transform_21(%arg0: i32) -> (i32, i32, i32) {
    %c0_i32 = arith.constant 0 : i32
    %c0_i32_0 = arith.constant 0 : i32
    %c0_i32_1 = arith.constant 0 : i32
    %c0_i32_2 = arith.constant 0 : i32
    return %c0_i32, %c0_i32_0, %c0_i32_1 : i32, i32, i32
  }
  func.func @transform_22(%arg0: i32) -> (i32, i32, i32) {
    %c0_i32 = arith.constant 0 : i32
    %c0_i32_0 = arith.constant 0 : i32
    %c0_i32_1 = arith.constant 0 : i32
    %c0_i32_2 = arith.constant 0 : i32
    return %c0_i32, %c0_i32_0, %c0_i32_1 : i32, i32, i32
  }
  func.func @transform_23(%arg0: i32) -> (i32, i32, i32) {
    %c0_i32 = arith.constant 0 : i32
    %c0_i32_0 = arith.constant 0 : i32
    %c0_i32_1 = arith.constant 0 : i32
    %c0_i32_2 = arith.constant 0 : i32
    return %c0_i32, %c0_i32_0, %c0_i32_1 : i32, i32, i32
  }
  func.func @transform_24(%arg0: i32) -> (i32, i32, i32) {
    %c0_i32 = arith.constant 0 : i32
    %c0_i32_0 = arith.constant 0 : i32
    %c0_i32_1 = arith.constant 0 : i32
    %c0_i32_2 = arith.constant 0 : i32
    return %c0_i32, %c0_i32_0, %c0_i32_1 : i32, i32, i32
  }
  func.func @transform_25(%arg0: i32) -> (i32, i32, i32) {
    %c0_i32 = arith.constant 0 : i32
    %c0_i32_0 = arith.constant 0 : i32
    %c0_i32_1 = arith.constant 0 : i32
    %c0_i32_2 = arith.constant 0 : i32
    return %c0_i32, %c0_i32_0, %c0_i32_1 : i32, i32, i32
  }
  func.func @transform_26(%arg0: i32) -> (i32, i32, i32) {
    %c0_i32 = arith.constant 0 : i32
    %c0_i32_0 = arith.constant 0 : i32
    %c0_i32_1 = arith.constant 0 : i32
    %c0_i32_2 = arith.constant 0 : i32
    return %c0_i32, %c0_i32_0, %c0_i32_1 : i32, i32, i32
  }
  func.func @transform_27(%arg0: i32) -> (i32, i32, i32) {
    %c0_i32 = arith.constant 0 : i32
    %c0_i32_0 = arith.constant 0 : i32
    %c0_i32_1 = arith.constant 0 : i32
    %c0_i32_2 = arith.constant 0 : i32
    return %c0_i32, %c0_i32_0, %c0_i32_1 : i32, i32, i32
  }
  func.func @transform_28(%arg0: i32) -> (i32, i32, i32) {
    %c0_i32 = arith.constant 0 : i32
    %c0_i32_0 = arith.constant 0 : i32
    %c0_i32_1 = arith.constant 0 : i32
    %c0_i32_2 = arith.constant 0 : i32
    return %c0_i32, %c0_i32_0, %c0_i32_1 : i32, i32, i32
  }
  func.func @transform_29(%arg0: i32) -> (i32, i32, i32) {
    %c0_i32 = arith.constant 0 : i32
    %c0_i32_0 = arith.constant 0 : i32
    %c0_i32_1 = arith.constant 0 : i32
    %c0_i32_2 = arith.constant 0 : i32
    return %c0_i32, %c0_i32_0, %c0_i32_1 : i32, i32, i32
  }
  func.func @transform_30(%arg0: i32) -> (i32, i32, i32) {
    %c0_i32 = arith.constant 0 : i32
    %c0_i32_0 = arith.constant 0 : i32
    %c0_i32_1 = arith.constant 0 : i32
    %c0_i32_2 = arith.constant 0 : i32
    return %c0_i32, %c0_i32_0, %c0_i32_1 : i32, i32, i32
  }
  func.func @transform_31(%arg0: i32) -> (i32, i32, i32) {
    %c0_i32 = arith.constant 0 : i32
    %c0_i32_0 = arith.constant 0 : i32
    %c0_i32_1 = arith.constant 0 : i32
    %c0_i32_2 = arith.constant 0 : i32
    return %c0_i32, %c0_i32_0, %c0_i32_1 : i32, i32, i32
  }
  func.func @transform_32(%arg0: i32) -> (i32, i32, i32) {
    %c0_i32 = arith.constant 0 : i32
    %c0_i32_0 = arith.constant 0 : i32
    %c0_i32_1 = arith.constant 0 : i32
    %c0_i32_2 = arith.constant 0 : i32
    return %c0_i32, %c0_i32_0, %c0_i32_1 : i32, i32, i32
  }
  func.func @transform_33(%arg0: i32) -> (i32, i32, i32) {
    %c0_i32 = arith.constant 0 : i32
    %c0_i32_0 = arith.constant 0 : i32
    %c0_i32_1 = arith.constant 0 : i32
    %c0_i32_2 = arith.constant 0 : i32
    return %c0_i32, %c0_i32_0, %c0_i32_1 : i32, i32, i32
  }
  func.func @transform_34(%arg0: i32) -> (i32, i32, i32) {
    %c0_i32 = arith.constant 0 : i32
    %c0_i32_0 = arith.constant 0 : i32
    %c0_i32_1 = arith.constant 0 : i32
    %c0_i32_2 = arith.constant 0 : i32
    return %c0_i32, %c0_i32_0, %c0_i32_1 : i32, i32, i32
  }
  func.func @transform_35(%arg0: i32) -> (i32, i32, i32) {
    %c0_i32 = arith.constant 0 : i32
    %c0_i32_0 = arith.constant 0 : i32
    %c0_i32_1 = arith.constant 0 : i32
    %c0_i32_2 = arith.constant 0 : i32
    return %c0_i32, %c0_i32_0, %c0_i32_1 : i32, i32, i32
  }
  func.func @transform_36(%arg0: i32) -> (i32, i32, i32) {
    %c0_i32 = arith.constant 0 : i32
    %c0_i32_0 = arith.constant 0 : i32
    %c0_i32_1 = arith.constant 0 : i32
    %c0_i32_2 = arith.constant 0 : i32
    return %c0_i32, %c0_i32_0, %c0_i32_1 : i32, i32, i32
  }
  func.func @transform_37(%arg0: i32) -> (i32, i32, i32) {
    %c0_i32 = arith.constant 0 : i32
    %c0_i32_0 = arith.constant 0 : i32
    %c0_i32_1 = arith.constant 0 : i32
    %c0_i32_2 = arith.constant 0 : i32
    return %c0_i32, %c0_i32_0, %c0_i32_1 : i32, i32, i32
  }
  func.func @transform_38(%arg0: i32) -> (i32, i32, i32) {
    %c0_i32 = arith.constant 0 : i32
    %c0_i32_0 = arith.constant 0 : i32
    %c0_i32_1 = arith.constant 0 : i32
    %c0_i32_2 = arith.constant 0 : i32
    return %c0_i32, %c0_i32_0, %c0_i32_1 : i32, i32, i32
  }
  func.func @transform_39(%arg0: i32) -> (i32, i32) {
    %c0_i32 = arith.constant 0 : i32
    %c0_i32_0 = arith.constant 0 : i32
    %c0_i32_1 = arith.constant 0 : i32
    return %c0_i32, %c0_i32_0 : i32, i32
  }
  func.func @transform_40(%arg0: i32) -> (i32, i32) {
    %c0_i32 = arith.constant 0 : i32
    %c0_i32_0 = arith.constant 0 : i32
    %c0_i32_1 = arith.constant 0 : i32
    return %c0_i32, %c0_i32_0 : i32, i32
  }
  func.func @transform_41(%arg0: i32) -> (i32, i32) {
    %c0_i32 = arith.constant 0 : i32
    %c0_i32_0 = arith.constant 0 : i32
    %c0_i32_1 = arith.constant 0 : i32
    return %c0_i32, %c0_i32_0 : i32, i32
  }
  func.func @transform_42(%arg0: i32) -> (i32, i32) {
    %c0_i32 = arith.constant 0 : i32
    %c0_i32_0 = arith.constant 0 : i32
    %c0_i32_1 = arith.constant 0 : i32
    return %c0_i32, %c0_i32_0 : i32, i32
  }
  func.func @transform_43(%arg0: i32) -> (i32, i32, i32) {
    %c0_i32 = arith.constant 0 : i32
    %c0_i32_0 = arith.constant 0 : i32
    %c0_i32_1 = arith.constant 0 : i32
    return %arg0, %c0_i32, %c0_i32_0 : i32, i32, i32
  }
}

</mosaic_0001>

<bundles_post_ra>
// kernel: _lambda_.1
= control target key start
LH: loop header
LB: loop body
LE: loop exit
PB: predicated region body
PF: predicated region fallthrough
CT: control target
= control target key end

     0   :  { %s10471_s6 = smov 1   ;;  %s10472_s10 = smov 2   ;;  %s11682_s0 = inlined_call_operand.smem [shape: u32[44], index: -1, kind: input, shape index: {}] }
   0x1   :  { %s10535_s5 = sld [smem:[%s11682_s0]]   ;;  %s10473_s14 = smov 3  }
   0x2   :  { %s10540_s9 = sld [smem:[%s11682_s0 + %s10471_s6]]   ;;  %s10474_s18 = smov 4  }
   0x3   :  { %s10545_s13 = sld [smem:[%s11682_s0 + %s10472_s10]]   ;;  %s10475_s22 = smov 5  }
   0x4   :  { %s10550_s17 = sld [smem:[%s11682_s0 + %s10473_s14]]   ;;  %s10476_s26 = smov 6  }
   0x5   :  { %s10555_s21 = sld [smem:[%s11682_s0 + %s10474_s18]]   ;;  %s10477_s30 = smov 7  }
   0x6   :  { %s10560_s25 = sld [smem:[%s11682_s0 + %s10475_s22]]   ;;  %s10478_s4 = smov 8  }
   0x7   :  { %11738 = sst [smem:[#allocation2_spill]] %s10535_s5  ;;  %s10479_s10 = smov 9  }
   0x8   :  { %11739 = sst [smem:[#allocation3_spill]] %s10540_s9  ;;  %s10480_s15 = smov 10  }
   0x9   :  { %11740 = sst [smem:[#allocation4_spill]] %s10545_s13  ;;  %s10481_s20 = smov 11  }
   0xa   :  { %11741 = sst [smem:[#allocation5_spill]] %s10550_s17  ;;  %s10483_s1 = smov 13  }
   0xb   :  { %11742 = sst [smem:[#allocation6_spill]] %s10555_s21  ;;  %s10484_s7 = smov 14  }
   0xc   :  { %11743 = sst [smem:[#allocation7_spill]] %s10560_s25  ;;  %s10486_s22 = smov 16  }
   0xd   :  { %s10565_s29 = sld [smem:[%s11682_s0 + %s10476_s26]]   ;;  %s10482_s26 = smov 12  }
   0xe   :  { %s10570_s3 = sld [smem:[%s11682_s0 + %s10477_s30]]   ;;  %s10487_s28 = smov 17  }
   0xf   :  { %s10575_s8 = sld [smem:[%s11682_s0 + %s10478_s4]]  }
  0x10   :  { %s10580_s14 = sld [smem:[%s11682_s0 + %s10479_s10]]  }
  0x11   :  { %s10585_s19 = sld [smem:[%s11682_s0 + %s10480_s15]]   ;;  %s10485_s15 = smov 15  }
  0x12   :  { %s10590_s24 = sld [smem:[%s11682_s0 + %s10481_s20]]  }
  0x13   :  { %11744 = sst [smem:[#allocation8_spill]] %s10565_s29 }
  0x14   :  { %11745 = sst [smem:[#allocation9_spill]] %s10570_s3 }
  0x15   :  { %11746 = sst [smem:[#allocation10_spill]] %s10575_s8 }
  0x16   :  { %11747 = sst [smem:[#allocation11_spill]] %s10580_s14 }
  0x17   :  { %11748 = sst [smem:[#allocation12_spill]] %s10585_s19 }
  0x18   :  { %11749 = sst [smem:[#allocation13_spill]] %s10590_s24 }
  0x19   :  { %s10595_s30 = sld [smem:[%s11682_s0 + %s10482_s26]]  }
  0x1a   :  { %s10600_s6 = sld [smem:[%s11682_s0 + %s10483_s1]]  }
  0x1b   :  { %s10605_s12 = sld [smem:[%s11682_s0 + %s10484_s7]]   ;;  %s10488_s7 = smov 18  }
  0x1c   :  { %s10610_s20 = sld [smem:[%s11682_s0 + %s10485_s15]]   ;;  %s10489_s15 = smov 19  }
  0x1d   :  { %s10615_s27 = sld [smem:[%s11682_s0 + %s10486_s22]]   ;;  %s10490_s22 = smov 20  }
  0x1e   :  { %s10620_s4 = sld [smem:[%s11682_s0 + %s10487_s28]]   ;;  %s10491_s28 = smov 21  }
  0x1f   :  { %11750 = sst [smem:[#allocation14_spill]] %s10595_s30 }
  0x20   :  { %11751 = sst [smem:[#allocation15_spill]] %s10600_s6 }
  0x21   :  { %11752 = sst [smem:[#allocation16_spill]] %s10605_s12 }
  0x22   :  { %11753 = sst [smem:[#allocation17_spill]] %s10610_s20 }
  0x23   :  { %11754 = sst [smem:[#allocation18_spill]] %s10615_s27 }
  0x24   :  { %11755 = sst [smem:[#allocation19_spill]] %s10620_s4 }
  0x25   :  { %s10625_s21 = sld [smem:[%s11682_s0 + %s10488_s7]]   ;;  %s10492_s7 = smov 22  }
  0x26   :  { %s10630_s17 = sld [smem:[%s11682_s0 + %s10489_s15]]   ;;  %s10493_s15 = smov 23  }
  0x27   :  { %s10635_s9 = sld [smem:[%s11682_s0 + %s10490_s22]]   ;;  %s10494_s22 = smov 24  }
  0x28   :  { %s10640_s4 = sld [smem:[%s11682_s0 + %s10491_s28]]   ;;  %s10495_s28 = smov 25  }
  0x2b   :  { %11756 = sst [smem:[#allocation20_spill]] %s10625_s21 }
  0x2c   :  { %11757 = sst [smem:[#allocation21_spill]] %s10630_s17 }
  0x2d   :  { %11758 = sst [smem:[#allocation22_spill]] %s10635_s9 }
  0x2e   :  { %11759 = sst [smem:[#allocation23_spill]] %s10640_s4 }
  0x2f   :  { %s10645_s21 = sld [smem:[%s11682_s0 + %s10492_s7]]   ;;  %s10496_s7 = smov 26  }
  0x30   :  { %s10650_s17 = sld [smem:[%s11682_s0 + %s10493_s15]]   ;;  %s10497_s15 = smov 27  }
  0x31   :  { %s10655_s9 = sld [smem:[%s11682_s0 + %s10494_s22]]   ;;  %s10498_s22 = smov 28  }
  0x32   :  { %s10660_s4 = sld [smem:[%s11682_s0 + %s10495_s28]]   ;;  %s10499_s28 = smov 29  }
  0x35   :  { %11760 = sst [smem:[#allocation24_spill]] %s10645_s21 }
  0x36   :  { %11761 = sst [smem:[#allocation25_spill]] %s10650_s17 }
  0x37   :  { %11762 = sst [smem:[#allocation26_spill]] %s10655_s9 }
  0x38   :  { %11763 = sst [smem:[#allocation27_spill]] %s10660_s4 }
  0x39   :  { %s10665_s21 = sld [smem:[%s11682_s0 + %s10496_s7]]   ;;  %s10500_s7 = smov 30  }
  0x3a   :  { %s10670_s17 = sld [smem:[%s11682_s0 + %s10497_s15]]   ;;  %s10501_s15 = smov 31  }
  0x3b   :  { %s10675_s9 = sld [smem:[%s11682_s0 + %s10498_s22]]   ;;  %s10502_s22 = smov 32  }
  0x3c   :  { %s10680_s4 = sld [smem:[%s11682_s0 + %s10499_s28]]   ;;  %s10503_s28 = smov 33  }
  0x3f   :  { %11764 = sst [smem:[#allocation28_spill]] %s10665_s21 }
  0x40   :  { %11765 = sst [smem:[#allocation29_spill]] %s10670_s17 }
  0x41   :  { %11766 = sst [smem:[#allocation30_spill]] %s10675_s9 }
  0x42   :  { %11767 = sst [smem:[#allocation31_spill]] %s10680_s4 }
  0x43   :  { %s10685_s21 = sld [smem:[%s11682_s0 + %s10500_s7]]   ;;  %s10504_s7 = smov 34  }
  0x44   :  { %s10690_s17 = sld [smem:[%s11682_s0 + %s10501_s15]]   ;;  %s10505_s15 = smov 35  }
  0x45   :  { %s10695_s9 = sld [smem:[%s11682_s0 + %s10502_s22]]   ;;  %s10506_s22 = smov 36  }
  0x46   :  { %s10700_s4 = sld [smem:[%s11682_s0 + %s10503_s28]]   ;;  %s10507_s28 = smov 37  }
  0x49   :  { %11768 = sst [smem:[#allocation32_spill]] %s10685_s21 }
  0x4a   :  { %11769 = sst [smem:[#allocation33_spill]] %s10690_s17 }
  0x4b   :  { %11770 = sst [smem:[#allocation34_spill]] %s10695_s9 }
  0x4c   :  { %11771 = sst [smem:[#allocation35_spill]] %s10700_s4 }
  0x4d   :  { %s10705_s21 = sld [smem:[%s11682_s0 + %s10504_s7]]   ;;  %s10508_s7 = smov 38  }
  0x4e   :  { %s10710_s17 = sld [smem:[%s11682_s0 + %s10505_s15]]   ;;  %s10509_s15 = smov 39  }
  0x4f   :  { %s10715_s9 = sld [smem:[%s11682_s0 + %s10506_s22]]   ;;  %s10510_s22 = smov 40  }
  0x50   :  { %s10720_s4 = sld [smem:[%s11682_s0 + %s10507_s28]]   ;;  %s10511_s28 = smov 41  }
  0x53   :  { %11772 = sst [smem:[#allocation36_spill]] %s10705_s21 }
  0x54   :  { %11773 = sst [smem:[#allocation37_spill]] %s10710_s17 }
  0x55   :  { %11774 = sst [smem:[#allocation38_spill]] %s10715_s9 }
  0x56   :  { %11775 = sst [smem:[#allocation39_spill]] %s10720_s4 }
  0x57   :  { %s10725_s21 = sld [smem:[%s11682_s0 + %s10508_s7]]   ;;  %s10512_s7 = smov 42  }
  0x58   :  { %s10730_s17 = sld [smem:[%s11682_s0 + %s10509_s15]]   ;;  %s10513_s15 = smov 43  }
  0x59   :  { %s10735_s9 = sld [smem:[%s11682_s0 + %s10510_s22]]   ;;  %s10752_s22 = smov 0  }
  0x5a   :  { %s10740_s4 = sld [smem:[%s11682_s0 + %s10511_s28]]  }
  0x5d   :  { %11776 = sst [smem:[#allocation40_spill]] %s10725_s21 }
  0x5e   :  { %11777 = sst [smem:[#allocation41_spill]] %s10730_s17 }
  0x5f   :  { %11778 = sst [smem:[#allocation42_spill]] %s10735_s9 }
  0x60   :  { %11779 = sst [smem:[#allocation43_spill]] %s10740_s4 }
  0x61   :  { %s10745_s21 = sld [smem:[%s11682_s0 + %s10512_s7]]  }
  0x62   :  { %s10750_s17 = sld [smem:[%s11682_s0 + %s10513_s15]]  }
  0x67   :  { %11780 = sst [smem:[#allocation44_spill]] %s10745_s21 }
  0x68   :  { %11781 = sst [smem:[#allocation45_spill]] %s10750_s17 }
  0x69 LB: > { %s11782_s30 = sld [smem:[#allocation14_spill]]  ;;  %s9199_s23 = sadd.s32 4294967295, %s10469_s22   ;;  %s10469_s22 = sphi %s10752_s22, %s97_s22  }
  0x6a   : > { %s11783_s29 = sld [smem:[#allocation8_spill]]  ;;  %p9203_p0 = scmp.ge.s32.totalorder %s10469_s22, 1 }
  0x6b   : > { %s11784_s27 = sld [smem:[#allocation18_spill]]  ;;  %p1216_p1 = scmp.lt.s32.totalorder %s10469_s22, 3 }
  0x6c   : > { %s11785_s25 = sld [smem:[#allocation7_spill]] }
  0x6d   : > { %s11786_s24 = sld [smem:[#allocation13_spill]]  ;;  %p1217_p2 = pnand %p9203_p0, %p1216_p1 }
  0x6e   : > { %s11787_s20 = sld [smem:[#allocation17_spill]] }
  0x6f   : > { %s11788_s19 = sld [smem:[#allocation12_spill]] }
  0x70   : > { %s11789_s14 = sld [smem:[#allocation11_spill]] }
  0x71   : > { %s11790_s12 = sld [smem:[#allocation16_spill]]  ;;  %1220 = sbr.rel (%p1217_p2) target bundleno = 19255 (0x4b37), region = 192 }
  0x72   : > { %s11791_s8 = sld [smem:[#allocation10_spill]] }
  0x73   : > { %s11792_s6 = sld [smem:[#allocation15_spill]] }
  0x74   : > { %s11793_s3 = sld [smem:[#allocation9_spill]] }
  0x75   : > { %11794 = sst [smem:[#allocation46_spill]] %s10469_s22 }
  0x76   : > { %v1363_v0 = vld [vmem:[%s11785_s25 + $0x18] sm:$0xff]  ;;  %p1334_p3 = scmp.lt.s32.totalorder %s9199_s23, 1  ;;  %s11795_s5 = sld [smem:[#allocation2_spill]]  ;;  %v10514_v1 = vmov 0.0   ;;  %v1362_v2 = vld [vmem:[%s11785_s25 + $0x10] sm:$0xff]  ;;  %vm10515_vm0 = vmmov 0  }
  0x77   : > { %9690 = vmatprep.subr.mxu0 %v10514_v1  ;;  %9698 = vmatprep.mubr.msk.f32.mxu0 %vm10515_vm0, %v10514_v1  ;;  %v1361_v3 = vld [vmem:[%s11785_s25 + $0x8] sm:$0xff]  ;;  %v1360_v4 = vld [vmem:[%s11785_s25] sm:$0xff]  ;;  %vm1371_vm1 = vcmask 261120   ;;  %s11721_s28 = smov 120   ;;  %s11709_s1 = smov 96   ;;  %vm1453_vm2 = vcmask 64512  }
  0x78   : > { %9691 = vmatpush3.msra.mxu0 %v1363_v0  ;;  %s11846_s23 = smov (!%p1334_p3, %s9199_s23), 1  ;;  %9701 = vmatprep.subr.mxu1 %v10514_v1  ;;  %v9210_v6 = vld [vmem:[%s11783_s29] ss:$0 sm:$0xff]  ;;  %s11797_s13 = sld [smem:[#allocation4_spill]]  ;;  %vm2554_vm3 = vcmask 523264  }
  0x79   : > { %9692 = vmatprep.subr.mxu0 %v10514_v1  ;;  %9703 = vmatprep.mubr.msk.f32.mxu1 %vm10515_vm0, %v10514_v1  ;;  %s10770_s0 = sshll.u32 %s11846_s23, 3  ;;  %s11719_s2 = smov 88  }
  0x7a   : > { %9693 = vmatpush3.msra.mxu0 %v1362_v2  ;;  %11796 = sst [smem:[#allocation47_spill]] %s10770_s0  ;;  %s11712_s10 = smov 56   ;;  %v1445_v42 = vld [vmem:[%s11793_s3] sm:$0xff]  ;;  %v1446_v43 = vld [vmem:[%s11793_s3 + $0x8] sm:$0xff] }
  0x7b   : > { %9694 = vmatprep.subr.mxu0 %v10514_v1  ;;  %s11711_s11 = smov 64   ;;  %s11715_s15 = smov 80  }
  0x7c   : > { %s1337_s26 = scalar_lea.vmem %s11795_s5, %s10770_s0  ;;  %9695 = vmatpush3.msra.mxu0 %v1361_v3  ;;  %s11717_s16 = smov 112  }
  0x7d   : > { %v10776_v5 = vld [vmem:[%s1337_s26] sm:$0xff]  ;;  %9696 = vmatprep.subr.mxu0 %v10514_v1  ;;  %s11713_s18 = smov 72   ;;  %s11707_s23 = smov 104  }
  0x7e   : > { %9697 = vmatpush3.msra.mxu0 %v1360_v4  ;;  %s1345_s7 = scalar_lea.vmem %s11797_s13, %s10770_s0  ;;  %s11705_s26 = smov 48  }
  0x7f   : > { %9699 = vmatmul.mubr.msk.f32.vlgmr.msra.gmra.mxu0 %vm1371_vm1, %v10776_v5  ;;  %9711 = vmatprep.subr.mxu0 %v10514_v1  ;;  %v10806_v14 = vld [vmem:[%s1345_s7] sm:$0xff]  ;;  %s11703_s7 = smov 40   ;;  %s11811_s5 = sld [smem:[#allocation25_spill]] }
  0x80   : > { %9713 = vmatprep.mubr.msk.f32.mxu0 %vm10515_vm0, %v10514_v1  ;;  %s11826_s22 = sld [smem:[#allocation34_spill]] }
  0x81   : > { %s11831_s9 = sld [smem:[#allocation38_spill]] }
  0x86   : > { %s11827_s17 = smov %s11826_s22 }
 0x13f   : > { %v1441_v7 = vpop.f32.mrf.mxu0 }
 0x140   : > { %v10785_v8 = vadd.f32 %v9210_v6, %v1441_v7 }
 0x141   : > { %v9700_v9 = vpop.f32.mrf.mxu0 }
 0x142   : > { %1617 = vrot.lane.b32.xlu1 %v10785_v8, %s11721_s28  ;;  %1451 = vrot.lane.b32.xlu0 %v10785_v8, %s11709_s1 }
 0x146   : > { %1619 = vrot.lane.b32.xlu0 %v10785_v8, %s11719_s2 }
 0x1b4   : > { %v1452_v10 = vpop.permute.xlu0 %1451  ;;  %v1618_v12 = vpop.permute.xlu1 %1617 }
 0x1b5   : > { %9702 = vmatpush3.xpose.msk.msra.mxu1 %vm1453_vm2, %v1452_v10  ;;  %v1447_v10 = vld [vmem:[%s11793_s3 + $0x10] sm:$0xff] }
 0x1b6   : > { %9706 = vmatprep.subr.mxu1 %v10514_v1 }
 0x1b8   : > { %9704 = vmatmul.mubr.msk.f32.vlgmr.msra.gmra.mxu1 %vm1453_vm2, %v10785_v8  ;;  %v1620_v11 = vpop.permute.xlu0 %1619 }
 0x1b9   : > { %9712 = vmatpush3.xpose.msk.msra.mxu0 %vm1453_vm2, %v1620_v11  ;;  %9708 = vmatprep.mubr.msk.f32.mxu1 %vm10515_vm0, %v10514_v1 }
 0x1ba   : > { %9721 = vmatprep.subr.mxu0 %v10514_v1 }
 0x1bc   : > { %9714 = vmatmul.mubr.msk.f32.vlgmr.msra.gmra.mxu0 %vm1453_vm2, %v1618_v12 }
 0x1bd   : > { %9723 = vmatprep.mubr.msk.f32.mxu0 %vm10515_vm0, %v10514_v1  ;;  %9722 = vmatpush3.msra.mxu0 %v1446_v43 }
 0x1be   : > { %9731 = vmatprep.subr.mxu0 %v10514_v1 }
 0x278   : > { %v1524_v13 = vpop.f32.mrf.mxu1 }
 0x279   : > { %v1528_v15 = vmul.f32 0.35355338, %v1524_v13 }
 0x27a   : > { %v9705_v16 = vpop.f32.mrf.mxu1 }
 0x27b   : > { %v1529_v17 = vadd.f32 %v1528_v15, %v10806_v14 }
 0x27c   : > { %v1691_v18 = vpop.f32.mrf.mxu0 }
 0x27d   : > { %v1695_v19 = vmul.f32 0.35355338, %v1691_v18  ;;  %v1530_v20 = vsel %vm1453_vm2, %v1529_v17, -inf }
 0x27e   : > { %1531 = vmax.xlane.f32.xlu1 %v1530_v20  ;;  %v9715_v21 = vpop.f32.mrf.mxu0 }
 0x27f   : > { %v1696_v22 = vadd.f32 %v1695_v19, %v10806_v14 }
 0x281   : > { %v1697_v23 = vsel %vm1453_vm2, %v1696_v22, -inf }
 0x282   : > { %1698 = vmax.xlane.f32.xlu0 %v1697_v23 }
 0x307   : > { %v1532_v24 = vpop.xlane.xlu1 %1531 }
 0x308   : > { %v1533_v25 = vsub.f32 %v1529_v17, %v1532_v24 }
 0x30a   : > { %v1534_v26 = vmul.f32 1.442695, %v1533_v25 }
 0x30b   : > { %v1699_v27 = vpop.xlane.xlu0 %1698 }
 0x30c   : > { %10333 = vpow2.f32 %v1534_v26  ;;  %v1700_v28 = vsub.f32 %v1696_v22, %v1699_v27  ;;  %v1448_v26 = vld [vmem:[%s11793_s3 + $0x18] sm:$0xff] }
 0x30e   : > { %v1701_v29 = vmul.f32 1.442695, %v1700_v28 }
 0x310   : > { %10335 = vpow2.f32 %v1701_v29 }
 0x319   : > { %v10334_v30 = vpop.eup %10333 }
 0x31a   : > { %v1536_v31 = vsel %vm1453_vm2, %v10334_v30, 0.0 }
 0x31b   : > { %1537 = vadd.xlane.f32.xlu0 %v1536_v31 }
 0x31d   : > { %v10336_v32 = vpop.eup %10335 }
 0x31e   : > { %v1703_v33 = vsel %vm1453_vm2, %v10336_v32, 0.0 }
 0x31f   : > { %1704 = vadd.xlane.f32.xlu1 %v1703_v33  ;;  %v9228_v33 = vld [vmem:[%s11791_s8] ss:$0 sm:$0xff] }
 0x330   : > { %1708 = vrot.lane.b32.xlu1 %v10785_v8, %s11712_s10 }
 0x331   : > { %1541 = vrot.lane.b32.xlu0 %v10785_v8, %s11711_s11 }
 0x334   : > { %1932 = vrot.lane.b32.xlu1 %v10785_v8, %s11715_s15 }
 0x335   : > { %1930 = vrot.lane.b32.xlu0 %v10785_v8, %s11717_s16 }
 0x3a4   : > { %v1538_v34 = vpop.xlane.xlu0 %1537 }
 0x3a5   : > { %10337 = vrcp.f32 %v1538_v34 }
 0x3a8   : > { %v1705_v35 = vpop.xlane.xlu1 %1704  ;;  %v1542_v36 = vpop.permute.xlu0 %1541 }
 0x3a9   : > { %10339 = vrcp.f32 %v1705_v35  ;;  %9707 = vmatpush3.msra.mxu1 %v1542_v36 }
 0x3aa   : > { %9716 = vmatprep.subr.mxu1 %v10514_v1 }
 0x3ac   : > { %v1709_v39 = vpop.permute.xlu1 %1708  ;;  %v1931_v49 = vpop.permute.xlu0 %1930 }
 0x3b0   : > { %v1933_v47 = vpop.permute.xlu1 %1932 }
 0x3b2   : > { %v10338_v37 = vpop.eup %10337 }
 0x3b3   : > { %v1540_v38 = vmul.f32 %v10338_v37, %v10334_v30 }
 0x3b5   : > { %9709 = vmatmul.mubr.msk.f32.vlgmr.msra.gmra.mxu1 %vm1453_vm2, %v1540_v38 }
 0x3b6   : > { %v10340_v40 = vpop.eup %10339  ;;  %9717 = vmatpush3.msra.mxu1 %v1709_v39  ;;  %9718 = vmatprep.mubr.msk.f32.mxu1 %vm10515_vm0, %v10514_v1 }
 0x3b7   : > { %v1707_v41 = vmul.f32 %v10340_v40, %v10336_v32  ;;  %9726 = vmatprep.subr.mxu1 %v10514_v1 }
 0x3b9   : > { %9719 = vmatmul.mubr.msk.f32.vlgmr.msra.gmra.mxu1 %vm1453_vm2, %v1707_v41 }
 0x3ba   : > { %9728 = vmatprep.mubr.msk.f32.mxu1 %vm10515_vm0, %v10514_v1  ;;  %9727 = vmatpush3.msra.mxu1 %v1445_v42 }
 0x3bb   : > { %9736 = vmatprep.subr.mxu1 %v10514_v1 }
 0x475   : > { %v1613_v44 = vpop.f32.mrf.mxu1 }
 0x476   : > { %9729 = vmatmul.mubr.msk.f32.vlgmr.msra.gmra.mxu1 %vm1453_vm2, %v1613_v44 }
 0x477   : > { %v9710_v45 = vpop.f32.mrf.mxu1  ;;  %9738 = vmatprep.mubr.msk.f32.mxu1 %vm10515_vm0, %v10514_v1 }
 0x478   : > { %v2453_v45 = vld [vmem:[%s11786_s24 + $0x18] sm:$0xff] }
 0x479   : > { %v1780_v46 = vpop.f32.mrf.mxu1 }
 0x47a   : > { %9724 = vmatmul.mubr.msk.f32.vlgmr.msra.gmra.mxu0 %vm1453_vm2, %v1780_v46  ;;  %v2452_v46 = vld [vmem:[%s11786_s24 + $0x10] sm:$0xff] }
 0x47b   : > { %9732 = vmatpush3.xpose.msk.msra.mxu0 %vm1453_vm2, %v1933_v47  ;;  %v9720_v48 = vpop.f32.mrf.mxu1  ;;  %9733 = vmatprep.mubr.msk.f32.mxu0 %vm10515_vm0, %v10514_v1  ;;  %v2451_v47 = vld [vmem:[%s11786_s24 + $0x8] sm:$0xff] }
 0x47c   : > { %9741 = vmatprep.subr.mxu0 %v10514_v1 }
 0x47e   : > { %9734 = vmatmul.mubr.msk.f32.vlgmr.msra.gmra.mxu0 %vm1453_vm2, %v1931_v49 }
 0x47f   : > { %9743 = vmatprep.mubr.msk.f32.mxu0 %vm10515_vm0, %v10514_v1  ;;  %9742 = vmatpush3.msra.mxu0 %v1447_v10 }
 0x480   : > { %9751 = vmatprep.subr.mxu0 %v10514_v1 }
 0x536   : > { %v1926_v50 = vpop.f32.mrf.mxu1 }
 0x538   : > { %v9730_v51 = vpop.f32.mrf.mxu1 }
 0x53a   : > { %v1853_v52 = vpop.f32.mrf.mxu0 }
 0x53b   : > { %v10845_v53 = vadd.f32 %v1926_v50, %v1853_v52  ;;  %v9229_v52 = vld [vmem:[%s11789_s14] ss:$0 sm:$0xff] }
 0x53c   : > { %v9725_v54 = vpop.f32.mrf.mxu0 }
 0x53d   : > { %v9230_v54 = vld [vmem:[%s11788_s19] ss:$0 sm:$0xff] }
 0x53e   : > { %v2004_v55 = vpop.f32.mrf.mxu0 }
 0x53f   : > { %v2008_v56 = vmul.f32 0.35355338, %v2004_v55 }
 0x540   : > { %v9735_v57 = vpop.f32.mrf.mxu0 }
 0x541   : > { %v2009_v58 = vadd.f32 %v2008_v56, %v10806_v14  ;;  %v2462_v57 = vld [vmem:[%s11792_s6 + $0x38] sm:$0xff] }
 0x543   : > { %v2010_v59 = vsel %vm1453_vm2, %v2009_v58, -inf }
 0x544   : > { %2011 = vmax.xlane.f32.xlu1 %v2010_v59  ;;  %v2460_v59 = vld [vmem:[%s11792_s6 + $0x28] sm:$0xff] }
 0x555   : > { %2173 = vrot.lane.b32.xlu1 %v10785_v8, %s11713_s18 }
 0x559   : > { %2171 = vrot.lane.b32.xlu1 %v10785_v8, %s11707_s23 }
 0x5cd   : > { %v2012_v60 = vpop.xlane.xlu1 %2011 }
 0x5ce   : > { %v2013_v61 = vsub.f32 %v2009_v58, %v2012_v60  ;;  %v2461_v58 = vld [vmem:[%s11792_s6 + $0x30] sm:$0xff]  ;;  %v2459_v60 = vld [vmem:[%s11792_s6 + $0x20] sm:$0xff] }
 0x5d0   : > { %v2014_v62 = vmul.f32 1.442695, %v2013_v61  ;;  %v2458_v61 = vld [vmem:[%s11792_s6 + $0x18] sm:$0xff] }
 0x5d1   : > { %v2174_v6 = vpop.permute.xlu1 %2173 }
 0x5d2   : > { %10341 = vpow2.f32 %v2014_v62  ;;  %v2457_v62 = vld [vmem:[%s11792_s6 + $0x10] sm:$0xff] }
 0x5d5   : > { %v2172_v9 = vpop.permute.xlu1 %2171 }
 0x5df   : > { %v10342_v63 = vpop.eup %10341 }
 0x5e0   : > { %v2016_v0 = vsel %vm1453_vm2, %v10342_v63, 0.0 }
 0x5e1   : > { %2017 = vadd.xlane.f32.xlu0 %v2016_v0  ;;  %v2455_v0 = vld [vmem:[%s11792_s6] sm:$0xff] }
 0x5f7   : > { %2021 = vrot.lane.b32.xlu0 %v10785_v8, %s11705_s26 }
 0x66a   : > { %v2018_v2 = vpop.xlane.xlu0 %2017 }
 0x66b   : > { %10343 = vrcp.f32 %v2018_v2  ;;  %v9231_v2 = vld [vmem:[%s11782_s30] ss:$0 sm:$0xff] }
 0x66e   : > { %v2022_v3 = vpop.permute.xlu0 %2021 }
 0x66f   : > { %9737 = vmatpush3.msra.mxu1 %v2022_v3 }
 0x670   : > { %9746 = vmatprep.subr.mxu1 %v10514_v1 }
 0x678   : > { %v10344_v4 = vpop.eup %10343 }
 0x679   : > { %v2020_v7 = vmul.f32 %v10344_v4, %v10342_v63  ;;  %v2456_v63 = vld [vmem:[%s11792_s6 + $0x8] sm:$0xff] }
 0x67b   : > { %9739 = vmatmul.mubr.msk.f32.vlgmr.msra.gmra.mxu1 %vm1453_vm2, %v2020_v7 }
 0x67c   : > { %9747 = vmatpush3.xpose.msk.msra.mxu1 %vm1453_vm2, %v2174_v6  ;;  %9748 = vmatprep.mubr.msk.f32.mxu1 %vm10515_vm0, %v10514_v1 }
 0x67d   : > { %9756 = vmatprep.subr.mxu1 %v10514_v1 }
 0x67f   : > { %9749 = vmatmul.mubr.msk.f32.vlgmr.msra.gmra.mxu1 %vm1453_vm2, %v2172_v9 }
 0x680   : > { %9758 = vmatprep.mubr.msk.f32.mxu1 %vm10515_vm0, %v10514_v1  ;;  %9757 = vmatpush3.msra.mxu1 %v1448_v26  ;;  %v9239_v26 = vld [vmem:[%s11785_s25 + $0x30] sm:$0xff] }
 0x681   : > { %9772 = vmatprep.subr.mxu1 %v10514_v1 }
 0x73b   : > { %v2093_v11 = vpop.f32.mrf.mxu1 }
 0x73c   : > { %9744 = vmatmul.mubr.msk.f32.vlgmr.msra.gmra.mxu0 %vm1453_vm2, %v2093_v11 }
 0x73d   : > { %v9740_v12 = vpop.f32.mrf.mxu1  ;;  %9753 = vmatprep.mubr.msk.f32.mxu0 %vm10515_vm0, %v10514_v1 }
 0x73f   : > { %v2245_v13 = vpop.f32.mrf.mxu1 }
 0x740   : > { %v2249_v15 = vmul.f32 0.35355338, %v2245_v13  ;;  %v9233_v13 = vld [vmem:[%s11790_s12] ss:$0 sm:$0xff] }
 0x741   : > { %v9750_v16 = vpop.f32.mrf.mxu1 }
 0x742   : > { %v2250_v17 = vadd.f32 %v2249_v15, %v10806_v14 }
 0x744   : > { %v2251_v18 = vsel %vm1453_vm2, %v2250_v17, -inf }
 0x745   : > { %2252 = vmax.xlane.f32.xlu0 %v2251_v18 }
 0x75b   : > { %2262 = vrot.lane.b32.xlu0 %v10785_v8, %s11703_s7 }
 0x7ce   : > { %v2253_v19 = vpop.xlane.xlu0 %2252 }
 0x7cf   : > { %v2254_v20 = vsub.f32 %v2250_v17, %v2253_v19 }
 0x7d1   : > { %v2255_v21 = vmul.f32 1.442695, %v2254_v20 }
 0x7d2   : > { %v2263_v22 = vpop.permute.xlu0 %2262 }
 0x7d3   : > { %10345 = vpow2.f32 %v2255_v21  ;;  %9752 = vmatpush3.msra.mxu0 %v2263_v22 }
 0x7d4   : > { %9761 = vmatprep.subr.mxu0 %v10514_v1 }
 0x7e0   : > { %v10346_v23 = vpop.eup %10345 }
 0x7e1   : > { %v2257_v24 = vsel %vm1453_vm2, %v10346_v23, 0.0 }
 0x7e2   : > { %2258 = vadd.xlane.f32.xlu1 %v2257_v24 }
 0x7fc   : > { %v2166_v25 = vpop.f32.mrf.mxu0 }
 0x7fd   : > { %v2170_v27 = vadd.f32 %v2166_v25, %v10845_v53  ;;  %v9240_v25 = vld [vmem:[%s11785_s25 + $0x38] sm:$0xff] }
 0x7fe   : > { %v9745_v28 = vpop.f32.mrf.mxu0 }
 0x7ff   : > { %v9237_v28 = vld [vmem:[%s11785_s25 + $0x20] sm:$0xff] }
 0x86b   : > { %v2259_v8 = vpop.xlane.xlu1 %2258 }
 0x86c   : > { %10347 = vrcp.f32 %v2259_v8 }
 0x879   : > { %v10348_v29 = vpop.eup %10347 }
 0x87a   : > { %v2261_v30 = vmul.f32 %v10348_v29, %v10346_v23 }
 0x87c   : > { %9754 = vmatmul.mubr.msk.f32.vlgmr.msra.gmra.mxu0 %vm1453_vm2, %v2261_v30 }
 0x87d   : > { %9769 = vmatprep.mubr.msk.f32.mxu0 %vm10515_vm0, %v10514_v1  ;;  %9762 = vmatpush3.msra.mxu0 %v2453_v45 }
 0x87e   : > { %9763 = vmatprep.subr.mxu0 %v10514_v1 }
 0x87f   : > { %9764 = vmatpush3.msra.mxu0 %v2452_v46 }
 0x880   : > { %9765 = vmatprep.subr.mxu0 %v10514_v1 }
 0x881   : > { %9766 = vmatpush3.msra.mxu0 %v2451_v47 }
 0x882   : > { %9767 = vmatprep.subr.mxu0 %v10514_v1 }
 0x93c   : > { %v2334_v31 = vpop.f32.mrf.mxu0 }
 0x93d   : > { %9759 = vmatmul.mubr.msk.f32.vlgmr.msra.gmra.mxu1 %vm1453_vm2, %v2334_v31 }
 0x93e   : > { %v9755_v32 = vpop.f32.mrf.mxu0  ;;  %9788 = vmatprep.mubr.msk.f32.mxu1 %vm10515_vm0, %v10514_v1  ;;  %9773 = vmatpush3.msra.mxu1 %v2462_v57 }
 0x93f   : > { %9774 = vmatprep.subr.mxu1 %v10514_v1  ;;  %v9235_v32 = vld [vmem:[%s11787_s20] ss:$0 sm:$0xff] }
 0x940   : > { %9775 = vmatpush3.msra.mxu1 %v2461_v58 }
 0x941   : > { %9776 = vmatprep.subr.mxu1 %v10514_v1 }
 0x942   : > { %9777 = vmatpush3.msra.mxu1 %v2460_v59 }
 0x943   : > { %9778 = vmatprep.subr.mxu1 %v10514_v1 }
 0x944   : > { %9779 = vmatpush3.msra.mxu1 %v2459_v60 }
 0x945   : > { %9780 = vmatprep.subr.mxu1 %v10514_v1 }
 0x946   : > { %9781 = vmatpush3.msra.mxu1 %v2458_v61 }
 0x947   : > { %9782 = vmatprep.subr.mxu1 %v10514_v1 }
 0x948   : > { %9783 = vmatpush3.msra.mxu1 %v2457_v62 }
 0x949   : > { %9784 = vmatprep.subr.mxu1 %v10514_v1 }
 0x94a   : > { %9785 = vmatpush3.msra.mxu1 %v2456_v63 }
 0x94b   : > { %9786 = vmatprep.subr.mxu1 %v10514_v1 }
 0x94c   : > { %9787 = vmatpush3.msra.mxu1 %v2455_v0 }
 0x94d   : > { %9807 = vmatprep.subr.mxu1 %v10514_v1 }
 0x9fd   : > { %v2407_v34 = vpop.f32.mrf.mxu1 }
 0x9fe   : > { %v2411_v35 = vadd.f32 %v2407_v34, %v2170_v27  ;;  %v9238_v27 = vld [vmem:[%s11785_s25 + $0x28] sm:$0xff]  ;;  %v9236_v34 = vld [vmem:[%s11784_s27] ss:$0 sm:$0xff]  ;;  %s11822_s25 = smov 72  }
 0x9ff   : > { %v9760_v36 = vpop.f32.mrf.mxu1 }
 0xa00   : > { %v2418_v37 = vadd.f32 %v9228_v33, %v2411_v35 }
 0xa02   : > { %v2419_v38 = vadd.f32 %v2418_v37, %v10776_v5  ;;  %v2450_v5 = vld [vmem:[%s11786_s24] sm:$0xff] }
 0xa03   : > { %9768 = vmatpush3.msra.mxu0 %v2450_v5  ;;  %v9242_v37 = vld [vmem:[%s11783_s29 + $0x1] ss:$0 sm:$0xff]  ;;  %s11824_s29 = sld [smem:[#allocation35_spill]] }
 0xa04   : > { %v2422_v39 = vsel %vm1371_vm1, %v2419_v38, 0.0  ;;  %9791 = vmatprep.subr.mxu0 %v10514_v1 }
 0xa05   : > { %2423 = vadd.xlane.f32.xlu1 %v2422_v39 }
 0xa8e   : > { %v2424_v40 = vpop.xlane.xlu1 %2423 }
 0xa8f   : > { %v2426_v41 = vmul.f32 0.03125, %v2424_v40 }
 0xa91   : > { %v2427_v42 = vsub.f32 %v2419_v38, %v2426_v41 }
 0xa93   : > { %v2428_v43 = vmul.f32 %v2427_v42, %v2427_v42 }
 0xa95   : > { %v2429_v44 = vsel %vm1371_vm1, %v2428_v43, 0.0 }
 0xa96   : > { %2430 = vadd.xlane.f32.xlu1 %v2429_v44 }
 0xb1f   : > { %v2431_v48 = vpop.xlane.xlu1 %2430 }
 0xb20   : > { %v2432_v49 = vmul.f32 0.03125, %v2431_v48 }
 0xb22   : > { %v2433_v50 = vadd.f32 1e-06, %v2432_v49 }
 0xb24   : > { %10349 = vrsqrt.f32 %v2433_v50 }
 0xb31   : > { %v10350_v51 = vpop.eup %10349 }
 0xb32   : > { %v2435_v53 = vmul.f32 %v10350_v51, %v2427_v42 }
 0xb34   : > { %v2442_v55 = vmul.f32 %v9229_v52, %v2435_v53 }
 0xb36   : > { %v2449_v56 = vadd.f32 %v9230_v54, %v2442_v55 }
 0xb38   : > { %9770 = vmatmul.mubr.msk.f32.vlgmr.msra.gmra.mxu0 %vm1371_vm1, %v2449_v56 }
 0xb39   : > { %9799 = vmatprep.mubr.msk.f32.mxu0 %vm10515_vm0, %v10514_v1  ;;  %9792 = vmatpush3.msra.mxu0 %v9240_v25 }
 0xb3a   : > { %9793 = vmatprep.subr.mxu0 %v10514_v1 }
 0xb3b   : > { %9794 = vmatpush3.msra.mxu0 %v9239_v26 }
 0xb3c   : > { %9795 = vmatprep.subr.mxu0 %v10514_v1 }
 0xb3d   : > { %9796 = vmatpush3.msra.mxu0 %v9238_v27 }
 0xb3e   : > { %9797 = vmatprep.subr.mxu0 %v10514_v1 }
 0xb3f   : > { %9798 = vmatpush3.msra.mxu0 %v9237_v28 }
 0xb40   : > { %9802 = vmatprep.subr.mxu0 %v10514_v1 }
 0xbf8   : > { %v2539_v3 = vpop.f32.mrf.mxu0 }
 0xbf9   : > { %v2540_v4 = vadd.f32 %v9231_v2, %v2539_v3 }
 0xbfa   : > { %v9771_v6 = vpop.f32.mrf.mxu0 }
 0xbfb   : > { %v2544_v7 = vmul.f32 0.70710677, %v2540_v4  ;;  %v2543_v10 = vmul.f32 0.5, %v2540_v4 }
 0xbfd   : > { %10351 = verf.f32 %v2544_v7 }
 0xc0a   : > { %v10352_v9 = vpop.eup %10351 }
 0xc0b   : > { %v2546_v11 = vadd.f32 1.0, %v10352_v9 }
 0xc0d   : > { %v2547_v12 = vmul.f32 %v2546_v11, %v2543_v10  ;;  %v9244_v10 = vld [vmem:[%s11793_s3 + $0x20] sm:$0xff]  ;;  %v9245_v11 = vld [vmem:[%s11793_s3 + $0x28] sm:$0xff] }
 0xc0f   : > { %9789 = vmatmul.mubr.msk.f32.vlgmr.msra.gmra.mxu1 %vm2554_vm3, %v2547_v12 }
 0xc10   : > { %9809 = vmatprep.mubr.msk.f32.mxu1 %vm10515_vm0, %v10514_v1 }
 0xccf   : > { %v2624_v15 = vpop.f32.mrf.mxu1 }
 0xcd0   : > { %v2625_v16 = vadd.f32 %v9233_v13, %v2624_v15 }
 0xcd1   : > { %v9790_v17 = vpop.f32.mrf.mxu1 }
 0xcd2   : > { %v2628_v18 = vadd.f32 %v2625_v16, %v2449_v56 }
 0xcd4   : > { %v2631_v19 = vsel %vm1371_vm1, %v2628_v18, 0.0 }
 0xcd5   : > { %2632 = vadd.xlane.f32.xlu1 %v2631_v19 }
 0xd5e   : > { %v2633_v20 = vpop.xlane.xlu1 %2632 }
 0xd5f   : > { %v2634_v21 = vmul.f32 0.03125, %v2633_v20 }
 0xd61   : > { %v2635_v22 = vsub.f32 %v2628_v18, %v2634_v21 }
 0xd63   : > { %v2636_v23 = vmul.f32 %v2635_v22, %v2635_v22 }
 0xd65   : > { %v2637_v24 = vsel %vm1371_vm1, %v2636_v23, 0.0 }
 0xd66   : > { %2638 = vadd.xlane.f32.xlu1 %v2637_v24 }
 0xdef   : > { %v2639_v8 = vpop.xlane.xlu1 %2638 }
 0xdf0   : > { %v2640_v29 = vmul.f32 0.03125, %v2639_v8 }
 0xdf2   : > { %v2641_v30 = vadd.f32 1e-06, %v2640_v29 }
 0xdf4   : > { %10353 = vrsqrt.f32 %v2641_v30 }
 0xe01   : > { %v10354_v31 = vpop.eup %10353 }
 0xe02   : > { %v2643_v33 = vmul.f32 %v10354_v31, %v2635_v22 }
 0xe04   : > { %v2650_v35 = vmul.f32 %v9235_v32, %v2643_v33 }
 0xe06   : > { %v10935_v36 = vadd.f32 %v9236_v34, %v2650_v35 }
 0xe08   : > { %9800 = vmatmul.mubr.msk.f32.vlgmr.msra.gmra.mxu0 %vm1371_vm1, %v10935_v36 }
 0xe09   : > { %9804 = vmatprep.mubr.msk.f32.mxu0 %vm10515_vm0, %v10514_v1 }
 0xec8   : > { %v2740_v38 = vpop.f32.mrf.mxu0 }
 0xec9   : > { %v10942_v39 = vadd.f32 %v9242_v37, %v2740_v38 }
 0xeca   : > { %v9801_v40 = vpop.f32.mrf.mxu0 }
 0xecb   : > { %2919 = vrot.lane.b32.xlu0 %v10942_v39, %s11719_s2  ;;  %2752 = vrot.lane.b32.xlu1 %v10942_v39, %s11709_s1 }
 0xecf   : > { %2917 = vrot.lane.b32.xlu0 %v10942_v39, %s11721_s28 }
 0xf3d   : > { %v2753_v41 = vpop.permute.xlu1 %2752  ;;  %v2920_v42 = vpop.permute.xlu0 %2919 }
 0xf3e   : > { %9803 = vmatpush3.xpose.msk.msra.mxu0 %vm1453_vm2, %v2753_v41  ;;  %v9246_v41 = vld [vmem:[%s11793_s3 + $0x30] sm:$0xff] }
 0xf3f   : > { %9812 = vmatprep.subr.mxu0 %v10514_v1 }
 0xf41   : > { %9805 = vmatmul.mubr.msk.f32.vlgmr.msra.gmra.mxu0 %vm1453_vm2, %v10942_v39  ;;  %v2918_v43 = vpop.permute.xlu0 %2917 }
 0xf42   : > { %9813 = vmatpush3.xpose.msk.msra.mxu0 %vm1453_vm2, %v2920_v42  ;;  %9814 = vmatprep.mubr.msk.f32.mxu0 %vm10515_vm0, %v10514_v1 }
 0xf43   : > { %9822 = vmatprep.subr.mxu0 %v10514_v1 }
 0xf45   : > { %9815 = vmatmul.mubr.msk.f32.vlgmr.msra.gmra.mxu0 %vm1453_vm2, %v2918_v43 }
 0xf46   : > { %9824 = vmatprep.mubr.msk.f32.mxu0 %vm10515_vm0, %v10514_v1  ;;  %9823 = vmatpush3.msra.mxu0 %v9245_v11 }
 0xf47   : > { %9832 = vmatprep.subr.mxu0 %v10514_v1 }
0x1001   : > { %v2824_v44 = vpop.f32.mrf.mxu0 }
0x1002   : > { %v2828_v45 = vmul.f32 0.35355338, %v2824_v44 }
0x1003   : > { %v9806_v46 = vpop.f32.mrf.mxu0 }
0x1004   : > { %v2829_v47 = vadd.f32 %v2828_v45, %v10806_v14 }
0x1005   : > { %v2991_v5 = vpop.f32.mrf.mxu0 }
0x1006   : > { %v2995_v48 = vmul.f32 0.35355338, %v2991_v5  ;;  %v2830_v49 = vsel %vm1453_vm2, %v2829_v47, -inf }
0x1007   : > { %2831 = vmax.xlane.f32.xlu0 %v2830_v49  ;;  %v9816_v50 = vpop.f32.mrf.mxu0 }
0x1008   : > { %v2996_v51 = vadd.f32 %v2995_v48, %v10806_v14 }
0x100a   : > { %v2997_v52 = vsel %vm1453_vm2, %v2996_v51, -inf }
0x100b   : > { %2998 = vmax.xlane.f32.xlu1 %v2997_v52 }
0x101c   : > { %3008 = vrot.lane.b32.xlu1 %v10942_v39, %s11712_s10 }
0x1020   : > { %3230 = vrot.lane.b32.xlu1 %v10942_v39, %s11717_s16 }
0x1090   : > { %v2832_v53 = vpop.xlane.xlu0 %2831 }
0x1091   : > { %v2833_v54 = vsub.f32 %v2829_v47, %v2832_v53 }
0x1093   : > { %v2834_v55 = vmul.f32 1.442695, %v2833_v54  ;;  %v9247_v54 = vld [vmem:[%s11793_s3 + $0x38] sm:$0xff]  ;;  %s11810_s3 = sld [smem:[#allocation27_spill]] }
0x1094   : > { %v2999_v56 = vpop.xlane.xlu1 %2998 }
0x1095   : > { %10355 = vpow2.f32 %v2834_v55  ;;  %v3000_v57 = vsub.f32 %v2996_v51, %v2999_v56 }
0x1097   : > { %v3001_v58 = vmul.f32 1.442695, %v3000_v57 }
0x1098   : > { %v3009_v6 = vpop.permute.xlu1 %3008 }
0x1099   : > { %10357 = vpow2.f32 %v3001_v58 }
0x109c   : > { %v3231_v18 = vpop.permute.xlu1 %3230 }
0x10a2   : > { %v10356_v59 = vpop.eup %10355 }
0x10a3   : > { %v2836_v60 = vsel %vm1453_vm2, %v10356_v59, 0.0 }
0x10a4   : > { %2837 = vadd.xlane.f32.xlu0 %v2836_v60 }
0x10a6   : > { %v10358_v61 = vpop.eup %10357 }
0x10a7   : > { %v3003_v62 = vsel %vm1453_vm2, %v10358_v61, 0.0 }
0x10a8   : > { %3004 = vadd.xlane.f32.xlu0 %v3003_v62 }
0x10be   : > { %2841 = vrot.lane.b32.xlu0 %v10942_v39, %s11711_s11 }
0x10c2   : > { %3232 = vrot.lane.b32.xlu0 %v10942_v39, %s11715_s15 }
0x112d   : > { %v2838_v63 = vpop.xlane.xlu0 %2837 }
0x112e   : > { %10359 = vrcp.f32 %v2838_v63 }
0x1131   : > { %v3005_v0 = vpop.xlane.xlu0 %3004 }
0x1132   : > { %10361 = vrcp.f32 %v3005_v0 }
0x1135   : > { %v2842_v2 = vpop.permute.xlu0 %2841 }
0x1136   : > { %9808 = vmatpush3.msra.mxu1 %v2842_v2 }
0x1137   : > { %9817 = vmatprep.subr.mxu1 %v10514_v1 }
0x1139   : > { %v3233_v16 = vpop.permute.xlu0 %3232 }
0x113b   : > { %v10360_v3 = vpop.eup %10359 }
0x113c   : > { %v2840_v4 = vmul.f32 %v10360_v3, %v10356_v59 }
0x113e   : > { %9810 = vmatmul.mubr.msk.f32.vlgmr.msra.gmra.mxu1 %vm1453_vm2, %v2840_v4 }
0x113f   : > { %v10362_v7 = vpop.eup %10361  ;;  %9818 = vmatpush3.msra.mxu1 %v3009_v6  ;;  %9819 = vmatprep.mubr.msk.f32.mxu1 %vm10515_vm0, %v10514_v1 }
0x1140   : > { %v3007_v9 = vmul.f32 %v10362_v7, %v10358_v61  ;;  %9827 = vmatprep.subr.mxu1 %v10514_v1  ;;  %v9265_v61 = vld [vmem:[%s11791_s8 + $0x1] ss:$0 sm:$0xff]  ;;  %s11815_s8 = smov 120  }
0x1142   : > { %9820 = vmatmul.mubr.msk.f32.vlgmr.msra.gmra.mxu1 %vm1453_vm2, %v3007_v9 }
0x1143   : > { %9829 = vmatprep.mubr.msk.f32.mxu1 %vm10515_vm0, %v10514_v1  ;;  %9828 = vmatpush3.msra.mxu1 %v9244_v10 }
0x1144   : > { %9837 = vmatprep.subr.mxu1 %v10514_v1 }
0x11fe   : > { %v2913_v12 = vpop.f32.mrf.mxu1 }
0x11ff   : > { %9830 = vmatmul.mubr.msk.f32.vlgmr.msra.gmra.mxu1 %vm1453_vm2, %v2913_v12  ;;  %v9273_v12 = vld [vmem:[%s11786_s24 + $0x38] sm:$0xff] }
0x1200   : > { %v9811_v13 = vpop.f32.mrf.mxu1  ;;  %9839 = vmatprep.mubr.msk.f32.mxu1 %vm10515_vm0, %v10514_v1 }
0x1201   : > { %v9272_v13 = vld [vmem:[%s11786_s24 + $0x30] sm:$0xff] }
0x1202   : > { %v3080_v15 = vpop.f32.mrf.mxu1 }
0x1203   : > { %9825 = vmatmul.mubr.msk.f32.vlgmr.msra.gmra.mxu0 %vm1453_vm2, %v3080_v15  ;;  %v9271_v15 = vld [vmem:[%s11786_s24 + $0x28] sm:$0xff] }
0x1204   : > { %9833 = vmatpush3.xpose.msk.msra.mxu0 %vm1453_vm2, %v3233_v16  ;;  %v9821_v17 = vpop.f32.mrf.mxu1  ;;  %9834 = vmatprep.mubr.msk.f32.mxu0 %vm10515_vm0, %v10514_v1 }
0x1205   : > { %9842 = vmatprep.subr.mxu0 %v10514_v1 }
0x1207   : > { %9835 = vmatmul.mubr.msk.f32.vlgmr.msra.gmra.mxu0 %vm1453_vm2, %v3231_v18 }
0x1208   : > { %9844 = vmatprep.mubr.msk.f32.mxu0 %vm10515_vm0, %v10514_v1  ;;  %9843 = vmatpush3.msra.mxu0 %v9246_v41 }
0x1209   : > { %9852 = vmatprep.subr.mxu0 %v10514_v1 }
0x12bf   : > { %v3226_v19 = vpop.f32.mrf.mxu1 }
0x12c1   : > { %v9831_v20 = vpop.f32.mrf.mxu1 }
0x12c2   : > { %v9268_v20 = vld [vmem:[%s11789_s14 + $0x1] ss:$0 sm:$0xff]  ;;  %s11817_s14 = smov 88  }
0x12c3   : > { %v3153_v21 = vpop.f32.mrf.mxu0 }
0x12c4   : > { %v3227_v22 = vadd.f32 %v3226_v19, %v3153_v21 }
0x12c5   : > { %v9826_v23 = vpop.f32.mrf.mxu0 }
0x12c7   : > { %v3304_v24 = vpop.f32.mrf.mxu0 }
0x12c8   : > { %v3308_v25 = vmul.f32 0.35355338, %v3304_v24 }
0x12c9   : > { %v9836_v26 = vpop.f32.mrf.mxu0 }
0x12ca   : > { %v3309_v27 = vadd.f32 %v3308_v25, %v10806_v14 }
0x12cc   : > { %v3310_v28 = vsel %vm1453_vm2, %v3309_v27, -inf }
0x12cd   : > { %3311 = vmax.xlane.f32.xlu0 %v3310_v28 }
0x12e3   : > { %3321 = vrot.lane.b32.xlu0 %v10942_v39, %s11705_s26  ;;  %s11799_s26 = sld [smem:[#allocation3_spill]] }
0x12e7   : > { %3471 = vrot.lane.b32.xlu0 %v10942_v39, %s11707_s23 }
0x12e9   : > { %s1341_s23 = scalar_lea.vmem %s11799_s26, %s10770_s0  ;;  %s11801_s26 = sld [smem:[#allocation5_spill]] }
0x1356   : > { %v3312_v8 = vpop.xlane.xlu0 %3311 }
0x1357   : > { %v3313_v29 = vsub.f32 %v3309_v27, %v3312_v8  ;;  %v11063_v8 = vld [vmem:[%s1341_s23] sm:$0xff]  ;;  %s11800_s23 = sld [smem:[#allocation22_spill]] }
0x1359   : > { %v3314_v30 = vmul.f32 1.442695, %v3313_v29  ;;  %v9282_v29 = vld [vmem:[%s11792_s6 + $0x78] sm:$0xff] }
0x135a   : > { %v3322_v31 = vpop.permute.xlu0 %3321 }
0x135b   : > { %10363 = vpow2.f32 %v3314_v30  ;;  %9838 = vmatpush3.msra.mxu1 %v3322_v31  ;;  %v9281_v30 = vld [vmem:[%s11792_s6 + $0x70] sm:$0xff]  ;;  %v9280_v31 = vld [vmem:[%s11792_s6 + $0x68] sm:$0xff] }
0x135c   : > { %9847 = vmatprep.subr.mxu1 %v10514_v1 }
0x135e   : > { %v3472_v40 = vpop.permute.xlu0 %3471 }
0x1368   : > { %v10364_v32 = vpop.eup %10363 }
0x1369   : > { %v3316_v33 = vsel %vm1453_vm2, %v10364_v32, 0.0 }
0x136a   : > { %3317 = vadd.xlane.f32.xlu1 %v3316_v33  ;;  %v9278_v33 = vld [vmem:[%s11792_s6 + $0x58] sm:$0xff] }
0x137b   : > { %3473 = vrot.lane.b32.xlu1 %v10942_v39, %s11713_s18 }
0x13f3   : > { %v3318_v34 = vpop.xlane.xlu1 %3317 }
0x13f4   : > { %10365 = vrcp.f32 %v3318_v34  ;;  %v9277_v34 = vld [vmem:[%s11792_s6 + $0x50] sm:$0xff] }
0x13f7   : > { %v3474_v38 = vpop.permute.xlu1 %3473 }
0x1401   : > { %v10366_v35 = vpop.eup %10365 }
0x1402   : > { %v3320_v37 = vmul.f32 %v10366_v35, %v10364_v32  ;;  %v9279_v32 = vld [vmem:[%s11792_s6 + $0x60] sm:$0xff]  ;;  %v9276_v35 = vld [vmem:[%s11792_s6 + $0x48] sm:$0xff] }
0x1404   : > { %9840 = vmatmul.mubr.msk.f32.vlgmr.msra.gmra.mxu1 %vm1453_vm2, %v3320_v37  ;;  %v9275_v37 = vld [vmem:[%s11792_s6 + $0x40] sm:$0xff]  ;;  %s11812_s6 = sld [smem:[#allocation26_spill]] }
0x1405   : > { %9848 = vmatpush3.xpose.msk.msra.mxu1 %vm1453_vm2, %v3474_v38  ;;  %9849 = vmatprep.mubr.msk.f32.mxu1 %vm10515_vm0, %v10514_v1  ;;  %v9284_v38 = vld [vmem:[%s11782_s30 + $0x1] ss:$0 sm:$0xff]  ;;  %s11825_s30 = sld [smem:[#allocation33_spill]] }
0x1406   : > { %9857 = vmatprep.subr.mxu1 %v10514_v1 }
0x1408   : > { %9850 = vmatmul.mubr.msk.f32.vlgmr.msra.gmra.mxu1 %vm1453_vm2, %v3472_v40 }
0x1409   : > { %9859 = vmatprep.mubr.msk.f32.mxu1 %vm10515_vm0, %v10514_v1  ;;  %9858 = vmatpush3.msra.mxu1 %v9247_v54 }
0x140a   : > { %9873 = vmatprep.subr.mxu1 %v10514_v1 }
0x14c4   : > { %v3393_v42 = vpop.f32.mrf.mxu1 }
0x14c5   : > { %9845 = vmatmul.mubr.msk.f32.vlgmr.msra.gmra.mxu0 %vm1453_vm2, %v3393_v42 }
0x14c6   : > { %v9841_v43 = vpop.f32.mrf.mxu1  ;;  %9854 = vmatprep.mubr.msk.f32.mxu0 %vm10515_vm0, %v10514_v1 }
0x14c8   : > { %v3545_v44 = vpop.f32.mrf.mxu1 }
0x14c9   : > { %v3549_v45 = vmul.f32 0.35355338, %v3545_v44  ;;  %v9294_v44 = vld [vmem:[%s11800_s23] ss:$0 sm:$0xff] }
0x14ca   : > { %v9851_v46 = vpop.f32.mrf.mxu1 }
0x14cb   : > { %v3550_v47 = vadd.f32 %v3549_v45, %v10806_v14 }
0x14cd   : > { %v3551_v5 = vsel %vm1453_vm2, %v3550_v47, -inf }
0x14ce   : > { %3552 = vmax.xlane.f32.xlu1 %v3551_v5 }
0x1557   : > { %v3553_v48 = vpop.xlane.xlu1 %3552 }
0x1558   : > { %v3554_v49 = vsub.f32 %v3550_v47, %v3553_v48 }
0x155a   : > { %v3555_v50 = vmul.f32 1.442695, %v3554_v49 }
0x155c   : > { %10367 = vpow2.f32 %v3555_v50 }
0x1569   : > { %v10368_v51 = vpop.eup %10367 }
0x156a   : > { %v3557_v52 = vsel %vm1453_vm2, %v10368_v51, 0.0 }
0x156b   : > { %3558 = vadd.xlane.f32.xlu0 %v3557_v52 }
0x1581   : > { %3562 = vrot.lane.b32.xlu0 %v10942_v39, %s11703_s7  ;;  %s11798_s7 = sld [smem:[#allocation21_spill]] }
0x1585   : > { %v3466_v53 = vpop.f32.mrf.mxu0 }
0x1586   : > { %v3470_v55 = vadd.f32 %v3466_v53, %v3227_v22  ;;  %v9269_v22 = vld [vmem:[%s11788_s19 + $0x1] ss:$0 sm:$0xff]  ;;  %s11819_s19 = smov 112  }
0x1587   : > { %v9846_v14 = vpop.f32.mrf.mxu0  ;;  %v3999_v25 = vld [vmem:[%s11798_s7 + $0x18] sm:$0xff]  ;;  %v3998_v26 = vld [vmem:[%s11798_s7 + $0x10] sm:$0xff]  ;;  %v3997_v27 = vld [vmem:[%s11798_s7 + $0x8] sm:$0xff] }
0x1588   : > { %v3996_v28 = vld [vmem:[%s11798_s7] sm:$0xff] }
0x15f4   : > { %v3559_v56 = vpop.xlane.xlu0 %3558 }
0x15f5   : > { %10369 = vrcp.f32 %v3559_v56 }
0x15f8   : > { %v3563_v57 = vpop.permute.xlu0 %3562 }
0x15f9   : > { %9853 = vmatpush3.msra.mxu0 %v3563_v57 }
0x15fa   : > { %9862 = vmatprep.subr.mxu0 %v10514_v1 }
0x1602   : > { %v10370_v58 = vpop.eup %10369 }
0x1603   : > { %v3561_v59 = vmul.f32 %v10370_v58, %v10368_v51 }
0x1605   : > { %9855 = vmatmul.mubr.msk.f32.vlgmr.msra.gmra.mxu0 %vm1453_vm2, %v3561_v59 }
0x1606   : > { %9870 = vmatprep.mubr.msk.f32.mxu0 %vm10515_vm0, %v10514_v1  ;;  %9863 = vmatpush3.msra.mxu0 %v9273_v12 }
0x1607   : > { %9864 = vmatprep.subr.mxu0 %v10514_v1 }
0x1608   : > { %9865 = vmatpush3.msra.mxu0 %v9272_v13 }
0x1609   : > { %9866 = vmatprep.subr.mxu0 %v10514_v1 }
0x160a   : > { %9867 = vmatpush3.msra.mxu0 %v9271_v15 }
0x160b   : > { %9868 = vmatprep.subr.mxu0 %v10514_v1 }
0x16c5   : > { %v3634_v39 = vpop.f32.mrf.mxu0 }
0x16c6   : > { %9860 = vmatmul.mubr.msk.f32.vlgmr.msra.gmra.mxu1 %vm1453_vm2, %v3634_v39 }
0x16c7   : > { %v9856_v60 = vpop.f32.mrf.mxu0  ;;  %9889 = vmatprep.mubr.msk.f32.mxu1 %vm10515_vm0, %v10514_v1  ;;  %9874 = vmatpush3.msra.mxu1 %v9282_v29 }
0x16c8   : > { %9875 = vmatprep.subr.mxu1 %v10514_v1 }
0x16c9   : > { %9876 = vmatpush3.msra.mxu1 %v9281_v30 }
0x16ca   : > { %9877 = vmatprep.subr.mxu1 %v10514_v1 }
0x16cb   : > { %9878 = vmatpush3.msra.mxu1 %v9280_v31 }
0x16cc   : > { %9879 = vmatprep.subr.mxu1 %v10514_v1 }
0x16cd   : > { %9880 = vmatpush3.msra.mxu1 %v9279_v32 }
0x16ce   : > { %9881 = vmatprep.subr.mxu1 %v10514_v1 }
0x16cf   : > { %9882 = vmatpush3.msra.mxu1 %v9278_v33 }
0x16d0   : > { %9883 = vmatprep.subr.mxu1 %v10514_v1 }
0x16d1   : > { %9884 = vmatpush3.msra.mxu1 %v9277_v34 }
0x16d2   : > { %9885 = vmatprep.subr.mxu1 %v10514_v1 }
0x16d3   : > { %9886 = vmatpush3.msra.mxu1 %v9276_v35 }
0x16d4   : > { %9887 = vmatprep.subr.mxu1 %v10514_v1 }
0x16d5   : > { %9888 = vmatpush3.msra.mxu1 %v9275_v37 }
0x16d6   : > { %9908 = vmatprep.subr.mxu1 %v10514_v1 }
0x1786   : > { %v3707_v62 = vpop.f32.mrf.mxu1 }
0x1787   : > { %v3711_v63 = vadd.f32 %v3707_v62, %v3470_v55 }
0x1788   : > { %v9861_v0 = vpop.f32.mrf.mxu1 }
0x1789   : > { %v3718_v2 = vadd.f32 %v9265_v61, %v3711_v63 }
0x178b   : > { %v3719_v3 = vadd.f32 %v3718_v2, %v10935_v36  ;;  %v9270_v36 = vld [vmem:[%s11786_s24 + $0x20] sm:$0xff]  ;;  %s11821_s24 = smov 80  }
0x178c   : > { %9869 = vmatpush3.msra.mxu0 %v9270_v36 }
0x178d   : > { %v3724_v4 = vsel %vm1371_vm1, %v3719_v3, 0.0  ;;  %9892 = vmatprep.subr.mxu0 %v10514_v1 }
0x178e   : > { %3725 = vadd.xlane.f32.xlu1 %v3724_v4 }
0x1817   : > { %v3726_v6 = vpop.xlane.xlu1 %3725 }
0x1818   : > { %v3727_v7 = vmul.f32 0.03125, %v3726_v6 }
0x181a   : > { %v3728_v9 = vsub.f32 %v3719_v3, %v3727_v7 }
0x181c   : > { %v3729_v10 = vmul.f32 %v3728_v9, %v3728_v9 }
0x181e   : > { %v3730_v11 = vsel %vm1371_vm1, %v3729_v10, 0.0 }
0x181f   : > { %3731 = vadd.xlane.f32.xlu1 %v3730_v11 }
0x18a8   : > { %v3732_v16 = vpop.xlane.xlu1 %3731 }
0x18a9   : > { %v3733_v17 = vmul.f32 0.03125, %v3732_v16 }
0x18ab   : > { %v3734_v18 = vadd.f32 1e-06, %v3733_v17 }
0x18ad   : > { %10371 = vrsqrt.f32 %v3734_v18 }
0x18ba   : > { %v10372_v19 = vpop.eup %10371 }
0x18bb   : > { %v3736_v21 = vmul.f32 %v10372_v19, %v3728_v9 }
0x18bd   : > { %v3743_v23 = vmul.f32 %v9268_v20, %v3736_v21 }
0x18bf   : > { %v11049_v24 = vadd.f32 %v9269_v22, %v3743_v23 }
0x18c1   : > { %9871 = vmatmul.mubr.msk.f32.vlgmr.msra.gmra.mxu0 %vm1371_vm1, %v11049_v24 }
0x18c2   : > { %9893 = vmatpush3.msra.mxu0 %v3999_v25  ;;  %9900 = vmatprep.mubr.msk.f32.mxu0 %vm10515_vm0, %v10514_v1 }
0x18c3   : > { %9894 = vmatprep.subr.mxu0 %v10514_v1 }
0x18c4   : > { %9895 = vmatpush3.msra.mxu0 %v3998_v26 }
0x18c5   : > { %9896 = vmatprep.subr.mxu0 %v10514_v1 }
0x18c6   : > { %9897 = vmatpush3.msra.mxu0 %v3997_v27 }
0x18c7   : > { %9898 = vmatprep.subr.mxu0 %v10514_v1 }
0x18c8   : > { %9899 = vmatpush3.msra.mxu0 %v3996_v28 }
0x18c9   : > { %9901 = vmatmul.mubr.msk.f32.vlgmr.msra.gmra.mxu0 %vm1371_vm1, %v11063_v8  ;;  %9903 = vmatprep.subr.mxu0 %v10514_v1 }
0x18ca   : > { %9905 = vmatprep.mubr.msk.f32.mxu0 %vm10515_vm0, %v10514_v1 }
0x1981   : > { %v3844_v40 = vpop.f32.mrf.mxu0 }
0x1982   : > { %v3845_v41 = vadd.f32 %v9284_v38, %v3844_v40 }
0x1983   : > { %v9872_v42 = vpop.f32.mrf.mxu0 }
0x1984   : > { %v3849_v43 = vmul.f32 0.70710677, %v3845_v41  ;;  %v3848_v48 = vmul.f32 0.5, %v3845_v41 }
0x1986   : > { %10373 = verf.f32 %v3849_v43 }
0x1989   : > { %v4076_v45 = vpop.f32.mrf.mxu0 }
0x198a   : > { %v11089_v46 = vadd.f32 %v9294_v44, %v4076_v45 }
0x198b   : > { %v9902_v47 = vpop.f32.mrf.mxu0 }
0x198c   : > { %4253 = vrot.lane.b32.xlu0 %v11089_v46, %s11719_s2  ;;  %4086 = vrot.lane.b32.xlu1 %v11089_v46, %s11709_s1  ;;  %s11115_s1 = scalar_lea.vmem %s11801_s26, %s10770_s0  ;;  %s11802_s26 = sld [smem:[#allocation23_spill]] }
0x198d   : > { %v11118_v56 = vld [vmem:[%s11115_s1] sm:$0xff]  ;;  %s11808_s2 = sld [smem:[#allocation19_spill]] }
0x1990   : > { %4251 = vrot.lane.b32.xlu0 %v11089_v46, %s11721_s28  ;;  %s11809_s28 = sld [smem:[#allocation20_spill]] }
0x1992   : > { %v4080_v22 = vld [vmem:[%s11802_s26] sm:$0xff]  ;;  %v4081_v23 = vld [vmem:[%s11802_s26 + $0x8] sm:$0xff] }
0x1993   : > { %v10374_v5 = vpop.eup %10373 }
0x1994   : > { %v3851_v49 = vadd.f32 1.0, %v10374_v5 }
0x1996   : > { %v3852_v50 = vmul.f32 %v3851_v49, %v3848_v48 }
0x1998   : > { %9890 = vmatmul.mubr.msk.f32.vlgmr.msra.gmra.mxu1 %vm2554_vm3, %v3852_v50 }
0x1999   : > { %9910 = vmatprep.mubr.msk.f32.mxu1 %vm10515_vm0, %v10514_v1 }
0x19fe   : > { %v4087_v51 = vpop.permute.xlu1 %4086  ;;  %v4254_v52 = vpop.permute.xlu0 %4253 }
0x19ff   : > { %9904 = vmatpush3.xpose.msk.msra.mxu0 %vm1453_vm2, %v4087_v51 }
0x1a00   : > { %9913 = vmatprep.subr.mxu0 %v10514_v1 }
0x1a02   : > { %9906 = vmatmul.mubr.msk.f32.vlgmr.msra.gmra.mxu0 %vm1453_vm2, %v11089_v46  ;;  %v4252_v53 = vpop.permute.xlu0 %4251 }
0x1a03   : > { %9914 = vmatpush3.xpose.msk.msra.mxu0 %vm1453_vm2, %v4254_v52  ;;  %9915 = vmatprep.mubr.msk.f32.mxu0 %vm10515_vm0, %v10514_v1 }
0x1a04   : > { %9923 = vmatprep.subr.mxu0 %v10514_v1 }
0x1a06   : > { %9916 = vmatmul.mubr.msk.f32.vlgmr.msra.gmra.mxu0 %vm1453_vm2, %v4252_v53 }
0x1a07   : > { %9925 = vmatprep.mubr.msk.f32.mxu0 %vm10515_vm0, %v10514_v1  ;;  %9924 = vmatpush3.msra.mxu0 %v4081_v23  ;;  %v9290_v23 = vld [vmem:[%s11787_s20 + $0x1] ss:$0 sm:$0xff]  ;;  %s11820_s20 = sld [smem:[#allocation31_spill]] }
0x1a08   : > { %9933 = vmatprep.subr.mxu0 %v10514_v1 }
0x1a58   : > { %v11111_v54 = vpop.f32.mrf.mxu1 }
0x1a5a   : > { %v9891_v55 = vpop.f32.mrf.mxu1 }
0x1a5b   : > { %v4082_v55 = vld [vmem:[%s11802_s26 + $0x10] sm:$0xff] }
0x1ac2   : > { %v4158_v14 = vpop.f32.mrf.mxu0 }
0x1ac3   : > { %v4162_v57 = vmul.f32 0.35355338, %v4158_v14 }
0x1ac4   : > { %v9907_v58 = vpop.f32.mrf.mxu0 }
0x1ac5   : > { %v4163_v59 = vadd.f32 %v4162_v57, %v11118_v56 }
0x1ac6   : > { %v4325_v39 = vpop.f32.mrf.mxu0 }
0x1ac7   : > { %v4329_v60 = vmul.f32 0.35355338, %v4325_v39  ;;  %v4164_v61 = vsel %vm1453_vm2, %v4163_v59, -inf }
0x1ac8   : > { %4165 = vmax.xlane.f32.xlu1 %v4164_v61  ;;  %v9917_v62 = vpop.f32.mrf.mxu0 }
0x1ac9   : > { %v4330_v63 = vadd.f32 %v4329_v60, %v11118_v56 }
0x1acb   : > { %v4331_v0 = vsel %vm1453_vm2, %v4330_v63, -inf }
0x1acc   : > { %4332 = vmax.xlane.f32.xlu0 %v4331_v0 }
0x1b51   : > { %v4166_v2 = vpop.xlane.xlu1 %4165 }
0x1b52   : > { %v4167_v3 = vsub.f32 %v4163_v59, %v4166_v2 }
0x1b54   : > { %v4168_v4 = vmul.f32 1.442695, %v4167_v3  ;;  %v9286_v3 = vld [vmem:[%s11790_s12 + $0x1] ss:$0 sm:$0xff]  ;;  %s11816_s12 = sld [smem:[#allocation6_spill]] }
0x1b55   : > { %v4333_v6 = vpop.xlane.xlu0 %4332 }
0x1b56   : > { %10375 = vpow2.f32 %v4168_v4  ;;  %v4334_v7 = vsub.f32 %v4330_v63, %v4333_v6  ;;  %v3929_v4 = vadd.f32 %v9286_v3, %v11111_v54  ;;  %v5083_v3 = vld [vmem:[%s11810_s3] sm:$0xff] }
0x1b58   : > { %v4335_v9 = vmul.f32 1.442695, %v4334_v7  ;;  %v3932_v7 = vadd.f32 %v3929_v4, %v11049_v24 }
0x1b5a   : > { %10377 = vpow2.f32 %v4335_v9  ;;  %v3937_v9 = vsel %vm1371_vm1, %v3932_v7, 0.0  ;;  %s11266_s13 = scalar_lea.vmem %s11816_s12, %s10770_s0  ;;  %s11818_s12 = smov 96  }
0x1b5b   : > { %s11828_s0 = sld [smem:[#allocation37_spill]] }
0x1b63   : > { %v10376_v10 = vpop.eup %10375 }
0x1b64   : > { %v4170_v11 = vsel %vm1453_vm2, %v10376_v10, 0.0 }
0x1b65   : > { %4171 = vadd.xlane.f32.xlu0 %v4170_v11 }
0x1b67   : > { %v10378_v12 = vpop.eup %10377 }
0x1b68   : > { %v4337_v13 = vsel %vm1453_vm2, %v10378_v12, 0.0 }
0x1b69   : > { %4338 = vadd.xlane.f32.xlu1 %v4337_v13 }
0x1b7a   : > { %4342 = vrot.lane.b32.xlu1 %v11089_v46, %s11712_s10  ;;  %s11804_s10 = smov 48  }
0x1b7b   : > { %4175 = vrot.lane.b32.xlu0 %v11089_v46, %s11711_s11  ;;  %s11803_s11 = smov 104  }
0x1b7e   : > { %4566 = vrot.lane.b32.xlu1 %v11089_v46, %s11715_s15  ;;  %s11806_s15 = sld [smem:[#allocation24_spill]] }
0x1b7f   : > { %4564 = vrot.lane.b32.xlu0 %v11089_v46, %s11717_s16  ;;  %s11807_s16 = sld [smem:[#allocation29_spill]] }
0x1bee   : > { %v4172_v15 = vpop.xlane.xlu0 %4171 }
0x1bef   : > { %10379 = vrcp.f32 %v4172_v15 }
0x1bf2   : > { %v4339_v36 = vpop.xlane.xlu1 %4338  ;;  %v4176_v16 = vpop.permute.xlu0 %4175 }
0x1bf3   : > { %10381 = vrcp.f32 %v4339_v36  ;;  %9909 = vmatpush3.msra.mxu1 %v4176_v16 }
0x1bf4   : > { %9918 = vmatprep.subr.mxu1 %v10514_v1 }
0x1bf6   : > { %v4343_v19 = vpop.permute.xlu1 %4342  ;;  %v4565_v30 = vpop.permute.xlu0 %4564 }
0x1bfa   : > { %v4567_v28 = vpop.permute.xlu1 %4566 }
0x1bfc   : > { %v10380_v17 = vpop.eup %10379 }
0x1bfd   : > { %v4174_v18 = vmul.f32 %v10380_v17, %v10376_v10 }
0x1bff   : > { %9911 = vmatmul.mubr.msk.f32.vlgmr.msra.gmra.mxu1 %vm1453_vm2, %v4174_v18  ;;  %v4083_v18 = vld [vmem:[%s11802_s26 + $0x18] sm:$0xff] }
0x1c00   : > { %v10382_v20 = vpop.eup %10381  ;;  %9919 = vmatpush3.msra.mxu1 %v4343_v19  ;;  %9920 = vmatprep.mubr.msk.f32.mxu1 %vm10515_vm0, %v10514_v1 }
0x1c01   : > { %v4341_v21 = vmul.f32 %v10382_v20, %v10378_v12  ;;  %9928 = vmatprep.subr.mxu1 %v10514_v1 }
0x1c03   : > { %9921 = vmatmul.mubr.msk.f32.vlgmr.msra.gmra.mxu1 %vm1453_vm2, %v4341_v21 }
0x1c04   : > { %9930 = vmatprep.mubr.msk.f32.mxu1 %vm10515_vm0, %v10514_v1  ;;  %9929 = vmatpush3.msra.mxu1 %v4080_v22 }
0x1c05   : > { %9938 = vmatprep.subr.mxu1 %v10514_v1 }
0x1cbf   : > { %v4247_v25 = vpop.f32.mrf.mxu1 }
0x1cc0   : > { %9931 = vmatmul.mubr.msk.f32.vlgmr.msra.gmra.mxu1 %vm1453_vm2, %v4247_v25 }
0x1cc1   : > { %v9912_v26 = vpop.f32.mrf.mxu1  ;;  %9940 = vmatprep.mubr.msk.f32.mxu1 %vm10515_vm0, %v10514_v1 }
0x1cc2   : > { %v9291_v26 = vld [vmem:[%s11784_s27 + $0x1] ss:$0 sm:$0xff]  ;;  %s11823_s27 = sld [smem:[#allocation32_spill]] }
0x1cc3   : > { %v4414_v27 = vpop.f32.mrf.mxu1 }
0x1cc4   : > { %9926 = vmatmul.mubr.msk.f32.vlgmr.msra.gmra.mxu0 %vm1453_vm2, %v4414_v27 }
0x1cc5   : > { %9934 = vmatpush3.xpose.msk.msra.mxu0 %vm1453_vm2, %v4567_v28  ;;  %v9922_v29 = vpop.f32.mrf.mxu1  ;;  %9935 = vmatprep.mubr.msk.f32.mxu0 %vm10515_vm0, %v10514_v1 }
0x1cc6   : > { %9943 = vmatprep.subr.mxu0 %v10514_v1 }
0x1cc8   : > { %9936 = vmatmul.mubr.msk.f32.vlgmr.msra.gmra.mxu0 %vm1453_vm2, %v4565_v30 }
0x1cc9   : > { %9945 = vmatprep.mubr.msk.f32.mxu0 %vm10515_vm0, %v10514_v1  ;;  %9944 = vmatpush3.msra.mxu0 %v4082_v55 }
0x1cca   : > { %9953 = vmatprep.subr.mxu0 %v10514_v1 }
0x1d80   : > { %v4560_v31 = vpop.f32.mrf.mxu1 }
0x1d82   : > { %v9932_v32 = vpop.f32.mrf.mxu1 }
0x1d84   : > { %v4487_v33 = vpop.f32.mrf.mxu0 }
0x1d85   : > { %v11157_v34 = vadd.f32 %v4560_v31, %v4487_v33 }
0x1d86   : > { %v9927_v35 = vpop.f32.mrf.mxu0 }
0x1d88   : > { %v4638_v37 = vpop.f32.mrf.mxu0 }
0x1d89   : > { %v4642_v38 = vmul.f32 0.35355338, %v4638_v37 }
0x1d8a   : > { %v9937_v40 = vpop.f32.mrf.mxu0 }
0x1d8b   : > { %v4643_v41 = vadd.f32 %v4642_v38, %v11118_v56 }
0x1d8d   : > { %v4644_v42 = vsel %vm1453_vm2, %v4643_v41, -inf }
0x1d8e   : > { %4645 = vmax.xlane.f32.xlu1 %v4644_v42 }
0x1d9f   : > { %4807 = vrot.lane.b32.xlu1 %v11089_v46, %s11713_s18  ;;  %s11805_s18 = smov 40  }
0x1da3   : > { %4805 = vrot.lane.b32.xlu1 %v11089_v46, %s11803_s11 }
0x1e17   : > { %v4646_v43 = vpop.xlane.xlu1 %4645 }
0x1e18   : > { %v4647_v44 = vsub.f32 %v4643_v41, %v4646_v43 }
0x1e1a   : > { %v4648_v45 = vmul.f32 1.442695, %v4647_v44 }
0x1e1b   : > { %v4808_v51 = vpop.permute.xlu1 %4807 }
0x1e1c   : > { %10383 = vpow2.f32 %v4648_v45 }
0x1e1f   : > { %v4806_v53 = vpop.permute.xlu1 %4805 }
0x1e29   : > { %v10384_v47 = vpop.eup %10383 }
0x1e2a   : > { %v4650_v5 = vsel %vm1453_vm2, %v10384_v47, 0.0 }
0x1e2b   : > { %4651 = vadd.xlane.f32.xlu0 %v4650_v5  ;;  %v5169_v5 = vld [vmem:[%s11807_s16 + $0x10] sm:$0xff] }
0x1e41   : > { %4655 = vrot.lane.b32.xlu0 %v11089_v46, %s11804_s10 }
0x1eb4   : > { %v4652_v48 = vpop.xlane.xlu0 %4651 }
0x1eb5   : > { %10385 = vrcp.f32 %v4652_v48  ;;  %v5168_v48 = vld [vmem:[%s11807_s16 + $0x8] sm:$0xff] }
0x1eb8   : > { %v4656_v49 = vpop.permute.xlu0 %4655 }
0x1eb9   : > { %9939 = vmatpush3.msra.mxu1 %v4656_v49  ;;  %v5167_v49 = vld [vmem:[%s11807_s16] sm:$0xff] }
0x1eba   : > { %9948 = vmatprep.subr.mxu1 %v10514_v1 }
0x1ec2   : > { %v10386_v50 = vpop.eup %10385 }
0x1ec3   : > { %v4654_v52 = vmul.f32 %v10386_v50, %v10384_v47  ;;  %v5170_v47 = vld [vmem:[%s11807_s16 + $0x18] sm:$0xff] }
0x1ec5   : > { %9941 = vmatmul.mubr.msk.f32.vlgmr.msra.gmra.mxu1 %vm1453_vm2, %v4654_v52 }
0x1ec6   : > { %9949 = vmatpush3.xpose.msk.msra.mxu1 %vm1453_vm2, %v4808_v51  ;;  %9950 = vmatprep.mubr.msk.f32.mxu1 %vm10515_vm0, %v10514_v1 }
0x1ec7   : > { %9958 = vmatprep.subr.mxu1 %v10514_v1 }
0x1ec9   : > { %9951 = vmatmul.mubr.msk.f32.vlgmr.msra.gmra.mxu1 %vm1453_vm2, %v4806_v53 }
0x1eca   : > { %9960 = vmatprep.mubr.msk.f32.mxu1 %vm10515_vm0, %v10514_v1  ;;  %9959 = vmatpush3.msra.mxu1 %v4083_v18 }
0x1ecb   : > { %9974 = vmatprep.subr.mxu1 %v10514_v1 }
0x1f85   : > { %v4727_v14 = vpop.f32.mrf.mxu1 }
0x1f86   : > { %9946 = vmatmul.mubr.msk.f32.vlgmr.msra.gmra.mxu0 %vm1453_vm2, %v4727_v14 }
0x1f87   : > { %v9942_v57 = vpop.f32.mrf.mxu1  ;;  %9955 = vmatprep.mubr.msk.f32.mxu0 %vm10515_vm0, %v10514_v1 }
0x1f89   : > { %v4879_v58 = vpop.f32.mrf.mxu1 }
0x1f8a   : > { %v4883_v59 = vmul.f32 0.35355338, %v4879_v58 }
0x1f8b   : > { %v9952_v39 = vpop.f32.mrf.mxu1 }
0x1f8c   : > { %v4884_v60 = vadd.f32 %v4883_v59, %v11118_v56  ;;  %v9292_v59 = vld [vmem:[%s11808_s2] ss:$0 sm:$0xff]  ;;  %s11814_s2 = sld [smem:[#allocation28_spill]] }
0x1f8e   : > { %v4885_v61 = vsel %vm1453_vm2, %v4884_v60, -inf }
0x1f8f   : > { %4886 = vmax.xlane.f32.xlu0 %v4885_v61 }
0x1fa5   : > { %4896 = vrot.lane.b32.xlu0 %v11089_v46, %s11805_s18 }
0x2018   : > { %v4887_v62 = vpop.xlane.xlu0 %4886 }
0x2019   : > { %v4888_v63 = vsub.f32 %v4884_v60, %v4887_v62  ;;  %v9293_v60 = vld [vmem:[%s11809_s28] ss:$0 sm:$0xff]  ;;  %s11813_s28 = sld [smem:[#allocation30_spill]] }
0x201b   : > { %v4889_v0 = vmul.f32 1.442695, %v4888_v63  ;;  %v5086_v63 = vld [vmem:[%s11810_s3 + $0x18] sm:$0xff] }
0x201c   : > { %v4897_v2 = vpop.permute.xlu0 %4896 }
0x201d   : > { %10387 = vpow2.f32 %v4889_v0  ;;  %9954 = vmatpush3.msra.mxu0 %v4897_v2  ;;  %v5085_v0 = vld [vmem:[%s11810_s3 + $0x10] sm:$0xff]  ;;  %v5084_v2 = vld [vmem:[%s11810_s3 + $0x8] sm:$0xff] }
0x201e   : > { %9963 = vmatprep.subr.mxu0 %v10514_v1 }
0x202a   : > { %v10388_v6 = vpop.eup %10387 }
0x202b   : > { %v4891_v56 = vsel %vm1453_vm2, %v10388_v6, 0.0 }
0x202c   : > { %4892 = vadd.xlane.f32.xlu1 %v4891_v56 }
0x2030   : > { %3938 = vadd.xlane.f32.xlu1 %v3937_v9  ;;  %v9313_v9 = vld [vmem:[%s11811_s5] ss:$0 sm:$0xff] }
0x2046   : > { %v4800_v46 = vpop.f32.mrf.mxu0 }
0x2047   : > { %v4804_v10 = vadd.f32 %v4800_v46, %v11157_v34  ;;  %v9312_v34 = vld [vmem:[%s11806_s15] ss:$0 sm:$0xff] }
0x2048   : > { %v9947_v11 = vpop.f32.mrf.mxu0 }
0x20b5   : > { %v4893_v12 = vpop.xlane.xlu1 %4892 }
0x20b6   : > { %10389 = vrcp.f32 %v4893_v12 }
0x20b9   : > { %v3939_v13 = vpop.xlane.xlu1 %3938 }
0x20ba   : > { %v3940_v15 = vmul.f32 0.03125, %v3939_v13  ;;  %v9317_v13 = vld [vmem:[%s11813_s28] ss:$0 sm:$0xff] }
0x20bc   : > { %v3941_v36 = vsub.f32 %v3932_v7, %v3940_v15 }
0x20be   : > { %v3942_v54 = vmul.f32 %v3941_v36, %v3941_v36 }
0x20c0   : > { %v3943_v16 = vsel %vm1371_vm1, %v3942_v54, 0.0 }
0x20c1   : > { %3944 = vadd.xlane.f32.xlu1 %v3943_v16  ;;  %v9315_v16 = vld [vmem:[%s11814_s2] ss:$0 sm:$0xff] }
0x20c3   : > { %v10390_v24 = vpop.eup %10389 }
0x20c4   : > { %v4895_v17 = vmul.f32 %v10390_v24, %v10388_v6 }
0x20c6   : > { %9956 = vmatmul.mubr.msk.f32.vlgmr.msra.gmra.mxu0 %vm1453_vm2, %v4895_v17 }
0x20c7   : > { %9971 = vmatprep.mubr.msk.f32.mxu0 %vm10515_vm0, %v10514_v1  ;;  %9964 = vmatpush3.msra.mxu0 %v5086_v63 }
0x20c8   : > { %9965 = vmatprep.subr.mxu0 %v10514_v1 }
0x20c9   : > { %9966 = vmatpush3.msra.mxu0 %v5085_v0 }
0x20ca   : > { %9967 = vmatprep.subr.mxu0 %v10514_v1 }
0x20cb   : > { %9968 = vmatpush3.msra.mxu0 %v5084_v2 }
0x20cc   : > { %9969 = vmatprep.subr.mxu0 %v10514_v1 }
0x20cd   : > { %9970 = vmatpush3.msra.mxu0 %v5083_v3 }
0x20ce   : > { %9985 = vmatprep.subr.mxu0 %v10514_v1 }
0x214a   : > { %v3945_v19 = vpop.xlane.xlu1 %3944 }
0x214b   : > { %v3946_v20 = vmul.f32 0.03125, %v3945_v19 }
0x214d   : > { %v3947_v21 = vadd.f32 1e-06, %v3946_v20 }
0x214f   : > { %10391 = vrsqrt.f32 %v3947_v21 }
0x215c   : > { %v10392_v22 = vpop.eup %10391 }
0x215d   : > { %v3949_v25 = vmul.f32 %v10392_v22, %v3941_v36  ;;  %v11269_v22 = vld [vmem:[%s11266_s13] sm:$0xff] }
0x215f   : > { %v3956_v27 = vmul.f32 %v9290_v23, %v3949_v25 }
0x2161   : > { %v3963_v28 = vadd.f32 %v9291_v26, %v3956_v27 }
0x2163   : > { %v3966_v29 = vsel %vm1371_vm1, %v3963_v28, 0.0 }
0x2164   : > { %3967 = vadd.xlane.f32.xlu1 %v3966_v29 }
0x2186   : > { %v4968_v30 = vpop.f32.mrf.mxu0 }
0x2187   : > { %9961 = vmatmul.mubr.msk.f32.vlgmr.msra.gmra.mxu1 %vm1453_vm2, %v4968_v30 }
0x2188   : > { %v9957_v31 = vpop.f32.mrf.mxu0  ;;  %9982 = vmatprep.mubr.msk.f32.mxu1 %vm10515_vm0, %v10514_v1  ;;  %9975 = vmatpush3.msra.mxu1 %v5170_v47 }
0x2189   : > { %9976 = vmatprep.subr.mxu1 %v10514_v1 }
0x218a   : > { %9977 = vmatpush3.msra.mxu1 %v5169_v5 }
0x218b   : > { %9978 = vmatprep.subr.mxu1 %v10514_v1 }
0x218c   : > { %9979 = vmatpush3.msra.mxu1 %v5168_v48 }
0x218d   : > { %9980 = vmatprep.subr.mxu1 %v10514_v1 }
0x218e   : > { %9981 = vmatpush3.msra.mxu1 %v5167_v49 }
0x218f   : > { %9990 = vmatprep.subr.mxu1 %v10514_v1 }
0x21ed   : > { %v3968_v32 = vpop.xlane.xlu1 %3967 }
0x21ee   : > { %v3969_v33 = vmul.f32 0.03125, %v3968_v32 }
0x21f0   : > { %v3970_v40 = vsub.f32 %v3963_v28, %v3969_v33 }
0x21f2   : > { %v3971_v44 = vmul.f32 %v3970_v40, %v3970_v40 }
0x21f4   : > { %v3972_v45 = vsel %vm1371_vm1, %v3971_v44, 0.0 }
0x2247   : > { %v5041_v35 = vpop.f32.mrf.mxu1 }
0x2248   : > { %v5045_v37 = vadd.f32 %v5041_v35, %v4804_v10  ;;  %v9314_v10 = vld [vmem:[%s11812_s6] ss:$0 sm:$0xff] }
0x2249   : > { %v9962_v38 = vpop.f32.mrf.mxu1 }
0x224a   : > { %v5052_v41 = vadd.f32 %v9312_v34, %v5045_v37 }
0x224c   : > { %v5053_v42 = vadd.f32 %v5052_v41, %v11063_v8 }
0x224e   : > { %v5056_v43 = vsel %vm1371_vm1, %v5053_v42, 0.0 }
0x224f   : > { %5057 = vadd.xlane.f32.xlu1 %v5056_v43 }
0x2253   : > { %3973 = vadd.xlane.f32.xlu1 %v3972_v45 }
0x22d8   : > { %v5058_v8 = vpop.xlane.xlu1 %5057 }
0x22d9   : > { %v5059_v50 = vmul.f32 0.03125, %v5058_v8 }
0x22db   : > { %v5060_v51 = vsub.f32 %v5053_v42, %v5059_v50 }
0x22dc   : > { %v3974_v52 = vpop.xlane.xlu1 %3973 }
0x22dd   : > { %v3975_v53 = vmul.f32 0.03125, %v3974_v52  ;;  %v5061_v55 = vmul.f32 %v5060_v51, %v5060_v51  ;;  %v5251_v52 = vld [vmem:[%s11820_s20] sm:$0xff] }
0x22df   : > { %v3976_v14 = vadd.f32 1e-06, %v3975_v53  ;;  %v5062_v57 = vsel %vm1371_vm1, %v5061_v55, 0.0  ;;  %v5252_v53 = vld [vmem:[%s11820_s20 + $0x8] sm:$0xff] }
0x22e0   : > { %5063 = vadd.xlane.f32.xlu0 %v5062_v57 }
0x22e1   : > { %10393 = vrsqrt.f32 %v3976_v14 }
0x22ee   : > { %v10394_v58 = vpop.eup %10393 }
0x22ef   : > { %v3978_v39 = vmul.f32 %v10394_v58, %v3970_v40 }
0x22f1   : > { %v3985_v61 = vmul.f32 %v9292_v59, %v3978_v39 }
0x22f3   : > { %v11220_v62 = vadd.f32 %v9293_v60, %v3985_v61 }
0x22f5   : > { %9983 = vmatmul.mubr.msk.f32.vlgmr.msra.gmra.mxu1 %vm1371_vm1, %v11220_v62 }
0x22f6   : > { %9992 = vmatprep.mubr.msk.f32.mxu1 %vm10515_vm0, %v10514_v1 }
0x2369   : > { %v5064_v4 = vpop.xlane.xlu0 %5063 }
0x236a   : > { %v5065_v6 = vmul.f32 0.03125, %v5064_v4 }
0x236c   : > { %v5066_v56 = vadd.f32 1e-06, %v5065_v6 }
0x236e   : > { %10395 = vrsqrt.f32 %v5066_v56 }
0x237b   : > { %v10396_v7 = vpop.eup %10395 }
0x237c   : > { %v5068_v46 = vmul.f32 %v10396_v7, %v5060_v51 }
0x237e   : > { %v5075_v11 = vmul.f32 %v9313_v9, %v5068_v46 }
0x2380   : > { %v11236_v12 = vadd.f32 %v9314_v10, %v5075_v11 }
0x2382   : > { %9972 = vmatmul.mubr.msk.f32.vlgmr.msra.gmra.mxu0 %vm1371_vm1, %v11236_v12 }
0x2383   : > { %9987 = vmatprep.mubr.msk.f32.mxu0 %vm10515_vm0, %v10514_v1 }
0x23b5   : > { %v5247_v15 = vpop.f32.mrf.mxu1 }
0x23b6   : > { %v11243_v36 = vadd.f32 %v9317_v13, %v5247_v15 }
0x23b7   : > { %v9984_v54 = vpop.f32.mrf.mxu1 }
0x23b8   : > { %5423 = vrot.lane.b32.xlu1 %v11243_v36, %s11815_s8  ;;  %9986 = vmatpush3.xpose.msk.msra.mxu0 %vm1453_vm2, %v11243_v36 }
0x23b9   : > { %9995 = vmatprep.subr.mxu0 %v10514_v1 }
0x242a   : > { %v5424_v19 = vpop.permute.xlu1 %5423 }
0x2442   : > { %v5163_v24 = vpop.f32.mrf.mxu0 }
0x2443   : > { %v11251_v17 = vadd.f32 %v9315_v16, %v5163_v24 }
0x2444   : > { %v9973_v18 = vpop.f32.mrf.mxu0 }
0x2445   : > { %5421 = vrot.lane.b32.xlu1 %v11251_v17, %s11815_s8  ;;  %9988 = vmatmul.mubr.msk.f32.vlgmr.msra.gmra.mxu0 %vm1453_vm2, %v11251_v17 }
0x2446   : > { %9996 = vmatpush3.xpose.msk.msra.mxu0 %vm1453_vm2, %v5424_v19  ;;  %9997 = vmatprep.mubr.msk.f32.mxu0 %vm10515_vm0, %v10514_v1  ;;  %v5253_v19 = vld [vmem:[%s11820_s20 + $0x10] sm:$0xff] }
0x2447   : > { %10005 = vmatprep.subr.mxu0 %v10514_v1 }
0x24b7   : > { %v5422_v20 = vpop.permute.xlu1 %5421 }
0x24b8   : > { %9998 = vmatmul.mubr.msk.f32.vlgmr.msra.gmra.mxu0 %vm1453_vm2, %v5422_v20 }
0x24b9   : > { %10007 = vmatprep.mubr.msk.f32.mxu0 %vm10515_vm0, %v10514_v1  ;;  %10006 = vmatpush3.msra.mxu0 %v5252_v53 }
0x24ba   : > { %10015 = vmatprep.subr.mxu0 %v10514_v1 }
0x2505   : > { %v5328_v21 = vpop.f32.mrf.mxu0 }
0x2506   : > { %v5332_v23 = vmul.f32 0.35355338, %v5328_v21 }
0x2507   : > { %v9989_v25 = vpop.f32.mrf.mxu0 }
0x2508   : > { %v5333_v26 = vadd.f32 %v5332_v23, %v11269_v22 }
0x250a   : > { %v5334_v27 = vsel %vm1453_vm2, %v5333_v26, -inf }
0x250b   : > { %5335 = vmax.xlane.f32.xlu1 %v5334_v27 }
0x251c   : > { %5512 = vrot.lane.b32.xlu1 %v11243_v36, %s11817_s14 }
0x2578   : > { %v5495_v28 = vpop.f32.mrf.mxu0 }
0x2579   : > { %v5499_v29 = vmul.f32 0.35355338, %v5495_v28 }
0x257a   : > { %v9999_v30 = vpop.f32.mrf.mxu0 }
0x257b   : > { %v5500_v31 = vadd.f32 %v5499_v29, %v11269_v22 }
0x257d   : > { %v5501_v32 = vsel %vm1453_vm2, %v5500_v31, -inf }
0x257e   : > { %5502 = vmax.xlane.f32.xlu0 %v5501_v32 }
0x2594   : > { %v5336_v33 = vpop.xlane.xlu1 %5335 }
0x2595   : > { %v5337_v34 = vsub.f32 %v5333_v26, %v5336_v33 }
0x2597   : > { %v5338_v35 = vmul.f32 1.442695, %v5337_v34 }
0x2598   : > { %v5513_v8 = vpop.permute.xlu1 %5512 }
0x2599   : > { %10397 = vpow2.f32 %v5338_v35 }
0x25a6   : > { %v10398_v37 = vpop.eup %10397 }
0x25a7   : > { %v5340_v38 = vsel %vm1453_vm2, %v10398_v37, 0.0 }
0x25a8   : > { %5341 = vadd.xlane.f32.xlu0 %v5340_v38 }
0x2607   : > { %v5503_v40 = vpop.xlane.xlu0 %5502 }
0x2608   : > { %v5504_v41 = vsub.f32 %v5500_v31, %v5503_v40 }
0x260a   : > { %v5505_v42 = vmul.f32 1.442695, %v5504_v41 }
0x260c   : > { %10399 = vpow2.f32 %v5505_v42 }
0x2619   : > { %v10400_v43 = vpop.eup %10399 }
0x261a   : > { %v5507_v44 = vsel %vm1453_vm2, %v10400_v43, 0.0 }
0x261b   : > { %5508 = vadd.xlane.f32.xlu0 %v5507_v44 }
0x2631   : > { %5345 = vrot.lane.b32.xlu0 %v11243_v36, %s11818_s12  ;;  %v5342_v45 = vpop.xlane.xlu0 %5341 }
0x2632   : > { %10401 = vrcp.f32 %v5342_v45  ;;  %v9335_v45 = vld [vmem:[%s11823_s27] ss:$0 sm:$0xff] }
0x2635   : > { %5736 = vrot.lane.b32.xlu0 %v11243_v36, %s11819_s19 }
0x2639   : > { %5734 = vrot.lane.b32.xlu0 %v11251_v17, %s11819_s19 }
0x263f   : > { %v10402_v5 = vpop.eup %10401 }
0x2640   : > { %v5344_v49 = vmul.f32 %v10402_v5, %v10398_v37  ;;  %v5254_v37 = vld [vmem:[%s11820_s20 + $0x18] sm:$0xff] }
0x26a4   : > { %v5509_v47 = vpop.xlane.xlu0 %5508 }
0x26a5   : > { %10403 = vrcp.f32 %v5509_v47 }
0x26a8   : > { %v5346_v48 = vpop.permute.xlu0 %5345 }
0x26a9   : > { %9991 = vmatpush3.msra.mxu1 %v5346_v48 }
0x26aa   : > { %9993 = vmatmul.mubr.msk.f32.vlgmr.msra.gmra.mxu1 %vm1453_vm2, %v5344_v49  ;;  %10000 = vmatprep.subr.mxu1 %v10514_v1 }
0x26ab   : > { %10001 = vmatpush3.msra.mxu1 %v5513_v8  ;;  %10002 = vmatprep.mubr.msk.f32.mxu1 %vm10515_vm0, %v10514_v1 }
0x26ac   : > { %10010 = vmatprep.subr.mxu1 %v10514_v1  ;;  %v5737_v57 = vpop.permute.xlu0 %5736 }
0x26b0   : > { %v5735_v39 = vpop.permute.xlu0 %5734 }
0x26b2   : > { %v10404_v50 = vpop.eup %10403 }
0x26b3   : > { %v5511_v51 = vmul.f32 %v10404_v50, %v10400_v43 }
0x26b5   : > { %10003 = vmatmul.mubr.msk.f32.vlgmr.msra.gmra.mxu1 %vm1453_vm2, %v5511_v51 }
0x26b6   : > { %10012 = vmatprep.mubr.msk.f32.mxu1 %vm10515_vm0, %v10514_v1  ;;  %10011 = vmatpush3.msra.mxu1 %v5251_v52 }
0x26b7   : > { %10020 = vmatprep.subr.mxu1 %v10514_v1 }
0x276a   : > { %v5417_v55 = vpop.f32.mrf.mxu1 }
0x276b   : > { %10013 = vmatmul.mubr.msk.f32.vlgmr.msra.gmra.mxu1 %vm1453_vm2, %v5417_v55 }
0x276c   : > { %v9994_v14 = vpop.f32.mrf.mxu1  ;;  %10022 = vmatprep.mubr.msk.f32.mxu1 %vm10515_vm0, %v10514_v1 }
0x2775   : > { %v5584_v58 = vpop.f32.mrf.mxu1 }
0x2776   : > { %10008 = vmatmul.mubr.msk.f32.vlgmr.msra.gmra.mxu0 %vm1453_vm2, %v5584_v58  ;;  %v6255_v58 = vld [vmem:[%s11824_s29 + $0x10] sm:$0xff] }
0x2777   : > { %10016 = vmatpush3.xpose.msk.msra.mxu0 %vm1453_vm2, %v5737_v57  ;;  %v10004_v59 = vpop.f32.mrf.mxu1  ;;  %10017 = vmatprep.mubr.msk.f32.mxu0 %vm10515_vm0, %v10514_v1  ;;  %v6256_v57 = vld [vmem:[%s11824_s29 + $0x18] sm:$0xff] }
0x2778   : > { %10025 = vmatprep.subr.mxu0 %v10514_v1  ;;  %v6254_v59 = vld [vmem:[%s11824_s29 + $0x8] sm:$0xff] }
0x277a   : > { %10018 = vmatmul.mubr.msk.f32.vlgmr.msra.gmra.mxu0 %vm1453_vm2, %v5735_v39 }
0x277b   : > { %10027 = vmatprep.mubr.msk.f32.mxu0 %vm10515_vm0, %v10514_v1  ;;  %10026 = vmatpush3.msra.mxu0 %v5253_v19 }
0x277c   : > { %10035 = vmatprep.subr.mxu0 %v10514_v1 }
0x282b   : > { %v5730_v60 = vpop.f32.mrf.mxu1 }
0x282d   : > { %v10014_v61 = vpop.f32.mrf.mxu1 }
0x2836   : > { %v5657_v63 = vpop.f32.mrf.mxu0 }
0x2837   : > { %v5731_v0 = vadd.f32 %v5730_v60, %v5657_v63 }
0x2838   : > { %v10009_v2 = vpop.f32.mrf.mxu0 }
0x283a   : > { %v5808_v3 = vpop.f32.mrf.mxu0 }
0x283b   : > { %v5812_v4 = vmul.f32 0.35355338, %v5808_v3  ;;  %v9337_v3 = vld [vmem:[%s11826_s22] ss:$0 sm:$0xff]  ;;  %s11829_s22 = sld [smem:[#allocation36_spill]] }
0x283c   : > { %v10019_v6 = vpop.f32.mrf.mxu0 }
0x283d   : > { %v5813_v56 = vadd.f32 %v5812_v4, %v11269_v22 }
0x283f   : > { %v5814_v7 = vsel %vm1453_vm2, %v5813_v56, -inf }
0x2840   : > { %5815 = vmax.xlane.f32.xlu0 %v5814_v7  ;;  %v6264_v7 = vld [vmem:[%s11828_s0 + $0x30] sm:$0xff] }
0x2841   : > { %s11830_s21 = smov %s11829_s22 }
0x2856   : > { %5825 = vrot.lane.b32.xlu0 %v11243_v36, %s11821_s24 }
0x285a   : > { %5975 = vrot.lane.b32.xlu0 %v11251_v17, %s11803_s11 }
0x28c9   : > { %v5816_v9 = vpop.xlane.xlu0 %5815 }
0x28ca   : > { %v5817_v46 = vsub.f32 %v5813_v56, %v5816_v9  ;;  %v6265_v56 = vld [vmem:[%s11828_s0 + $0x38] sm:$0xff]  ;;  %v6263_v9 = vld [vmem:[%s11828_s0 + $0x28] sm:$0xff] }
0x28cc   : > { %v5818_v10 = vmul.f32 1.442695, %v5817_v46  ;;  %v6262_v46 = vld [vmem:[%s11828_s0 + $0x20] sm:$0xff] }
0x28cd   : > { %v5826_v11 = vpop.permute.xlu0 %5825 }
0x28ce   : > { %10405 = vpow2.f32 %v5818_v10  ;;  %10021 = vmatpush3.msra.mxu1 %v5826_v11  ;;  %v6261_v10 = vld [vmem:[%s11828_s0 + $0x18] sm:$0xff]  ;;  %v6260_v11 = vld [vmem:[%s11828_s0 + $0x10] sm:$0xff] }
0x28cf   : > { %10030 = vmatprep.subr.mxu1 %v10514_v1 }
0x28d1   : > { %v5976_v18 = vpop.permute.xlu0 %5975 }
0x28db   : > { %v10406_v13 = vpop.eup %10405 }
0x28dc   : > { %v5820_v15 = vsel %vm1453_vm2, %v10406_v13, 0.0 }
0x28dd   : > { %5821 = vadd.xlane.f32.xlu1 %v5820_v15  ;;  %v6258_v15 = vld [vmem:[%s11828_s0] sm:$0xff] }
0x28ee   : > { %5977 = vrot.lane.b32.xlu1 %v11243_v36, %s11803_s11 }
0x2966   : > { %v5822_v54 = vpop.xlane.xlu1 %5821 }
0x2967   : > { %10407 = vrcp.f32 %v5822_v54  ;;  %v9338_v54 = vld [vmem:[%s11829_s22] ss:$0 sm:$0xff]  ;;  %s11832_s22 = sld [smem:[#allocation39_spill]] }
0x296a   : > { %v5978_v17 = vpop.permute.xlu1 %5977 }
0x296d   : > { %s11833_s4 = smov %s11832_s22 }
0x2974   : > { %v10408_v16 = vpop.eup %10407 }
0x2975   : > { %v5824_v24 = vmul.f32 %v10408_v16, %v10406_v13  ;;  %v6259_v13 = vld [vmem:[%s11828_s0 + $0x8] sm:$0xff] }
0x2977   : > { %10023 = vmatmul.mubr.msk.f32.vlgmr.msra.gmra.mxu1 %vm1453_vm2, %v5824_v24 }
0x2978   : > { %10031 = vmatpush3.xpose.msk.msra.mxu1 %vm1453_vm2, %v5978_v17  ;;  %10032 = vmatprep.mubr.msk.f32.mxu1 %vm10515_vm0, %v10514_v1 }
0x2979   : > { %10040 = vmatprep.subr.mxu1 %v10514_v1 }
0x297b   : > { %10033 = vmatmul.mubr.msk.f32.vlgmr.msra.gmra.mxu1 %vm1453_vm2, %v5976_v18 }
0x297c   : > { %10042 = vmatprep.mubr.msk.f32.mxu1 %vm10515_vm0, %v10514_v1  ;;  %10041 = vmatpush3.msra.mxu1 %v5254_v37  ;;  %v9347_v37 = vld [vmem:[%s11798_s7 + $0x38] sm:$0xff] }
0x297d   : > { %10056 = vmatprep.subr.mxu1 %v10514_v1 }
0x2a37   : > { %v5897_v20 = vpop.f32.mrf.mxu1 }
0x2a38   : > { %10028 = vmatmul.mubr.msk.f32.vlgmr.msra.gmra.mxu0 %vm1453_vm2, %v5897_v20 }
0x2a39   : > { %v10024_v21 = vpop.f32.mrf.mxu1  ;;  %10037 = vmatprep.mubr.msk.f32.mxu0 %vm10515_vm0, %v10514_v1 }
0x2a3b   : > { %v6049_v23 = vpop.f32.mrf.mxu1 }
0x2a3c   : > { %v6053_v25 = vmul.f32 0.35355338, %v6049_v23 }
0x2a3d   : > { %v10034_v26 = vpop.f32.mrf.mxu1 }
0x2a3e   : > { %v6054_v27 = vadd.f32 %v6053_v25, %v11269_v22  ;;  %v9340_v25 = vld [vmem:[%s11831_s9] ss:$0 sm:$0xff]  ;;  %s11834_s9 = sld [smem:[#allocation40_spill]] }
0x2a40   : > { %v6055_v28 = vsel %vm1453_vm2, %v6054_v27, -inf }
0x2a41   : > { %6056 = vmax.xlane.f32.xlu0 %v6055_v28 }
0x2a57   : > { %6066 = vrot.lane.b32.xlu0 %v11243_v36, %s11822_s25 }
0x2aca   : > { %v6057_v29 = vpop.xlane.xlu0 %6056 }
0x2acb   : > { %v6058_v30 = vsub.f32 %v6054_v27, %v6057_v29 }
0x2acd   : > { %v6059_v31 = vmul.f32 1.442695, %v6058_v30 }
0x2ace   : > { %v6067_v32 = vpop.permute.xlu0 %6066 }
0x2acf   : > { %10409 = vpow2.f32 %v6059_v31  ;;  %10036 = vmatpush3.msra.mxu0 %v6067_v32 }
0x2ad0   : > { %10045 = vmatprep.subr.mxu0 %v10514_v1 }
0x2adc   : > { %v10410_v33 = vpop.eup %10409 }
0x2add   : > { %v6061_v34 = vsel %vm1453_vm2, %v10410_v33, 0.0 }
0x2ade   : > { %6062 = vadd.xlane.f32.xlu1 %v6061_v34 }
0x2af8   : > { %v5970_v35 = vpop.f32.mrf.mxu0 }
0x2af9   : > { %v5974_v38 = vadd.f32 %v5970_v35, %v5731_v0  ;;  %v9336_v0 = vld [vmem:[%s11825_s30] ss:$0 sm:$0xff] }
0x2afa   : > { %v10029_v40 = vpop.f32.mrf.mxu0 }
0x2afb   : > { %v9345_v40 = vld [vmem:[%s11798_s7 + $0x28] sm:$0xff] }
0x2b67   : > { %v6063_v36 = vpop.xlane.xlu1 %6062 }
0x2b68   : > { %10411 = vrcp.f32 %v6063_v36  ;;  %v9344_v36 = vld [vmem:[%s11798_s7 + $0x20] sm:$0xff] }
0x2b75   : > { %v10412_v41 = vpop.eup %10411 }
0x2b76   : > { %v6065_v42 = vmul.f32 %v10412_v41, %v10410_v33 }
0x2b78   : > { %10038 = vmatmul.mubr.msk.f32.vlgmr.msra.gmra.mxu0 %vm1453_vm2, %v6065_v42 }
0x2b79   : > { %10053 = vmatprep.mubr.msk.f32.mxu0 %vm10515_vm0, %v10514_v1  ;;  %10046 = vmatpush3.msra.mxu0 %v6256_v57 }
0x2b7a   : > { %10047 = vmatprep.subr.mxu0 %v10514_v1 }
0x2b7b   : > { %10048 = vmatpush3.msra.mxu0 %v6255_v58 }
0x2b7c   : > { %10049 = vmatprep.subr.mxu0 %v10514_v1 }
0x2b7d   : > { %10050 = vmatpush3.msra.mxu0 %v6254_v59 }
0x2b7e   : > { %10051 = vmatprep.subr.mxu0 %v10514_v1 }
0x2c38   : > { %v6138_v43 = vpop.f32.mrf.mxu0 }
0x2c39   : > { %10043 = vmatmul.mubr.msk.f32.vlgmr.msra.gmra.mxu1 %vm1453_vm2, %v6138_v43 }
0x2c3a   : > { %v10039_v44 = vpop.f32.mrf.mxu0  ;;  %10072 = vmatprep.mubr.msk.f32.mxu1 %vm10515_vm0, %v10514_v1  ;;  %10057 = vmatpush3.msra.mxu1 %v6265_v56 }
0x2c3b   : > { %10058 = vmatprep.subr.mxu1 %v10514_v1 }
0x2c3c   : > { %10059 = vmatpush3.msra.mxu1 %v6264_v7 }
0x2c3d   : > { %10060 = vmatprep.subr.mxu1 %v10514_v1 }
0x2c3e   : > { %10061 = vmatpush3.msra.mxu1 %v6263_v9 }
0x2c3f   : > { %10062 = vmatprep.subr.mxu1 %v10514_v1 }
0x2c40   : > { %10063 = vmatpush3.msra.mxu1 %v6262_v46 }
0x2c41   : > { %10064 = vmatprep.subr.mxu1 %v10514_v1 }
0x2c42   : > { %10065 = vmatpush3.msra.mxu1 %v6261_v10 }
0x2c43   : > { %10066 = vmatprep.subr.mxu1 %v10514_v1 }
0x2c44   : > { %10067 = vmatpush3.msra.mxu1 %v6260_v11 }
0x2c45   : > { %10068 = vmatprep.subr.mxu1 %v10514_v1 }
0x2c46   : > { %10069 = vmatpush3.msra.mxu1 %v6259_v13 }
0x2c47   : > { %10070 = vmatprep.subr.mxu1 %v10514_v1 }
0x2c48   : > { %10071 = vmatpush3.msra.mxu1 %v6258_v15 }
0x2c49   : > { %10091 = vmatprep.subr.mxu1 %v10514_v1 }
0x2cf9   : > { %v6211_v47 = vpop.f32.mrf.mxu1 }
0x2cfa   : > { %v6215_v5 = vadd.f32 %v6211_v47, %v5974_v38  ;;  %v9346_v38 = vld [vmem:[%s11798_s7 + $0x30] sm:$0xff] }
0x2cfb   : > { %v10044_v48 = vpop.f32.mrf.mxu1 }
0x2cfc   : > { %v6222_v49 = vadd.f32 %v9335_v45, %v6215_v5  ;;  %v9342_v45 = vld [vmem:[%s11832_s22] ss:$0 sm:$0xff]  ;;  %s11835_s22 = smov 56  }
0x2cfd   : > { %v9343_v5 = vld [vmem:[%s11834_s9] ss:$0 sm:$0xff] }
0x2cfe   : > { %v6223_v8 = vadd.f32 %v6222_v49, %v11236_v12  ;;  %v6253_v12 = vld [vmem:[%s11824_s29] sm:$0xff] }
0x2cff   : > { %10052 = vmatpush3.msra.mxu0 %v6253_v12  ;;  %v11422_v12 = vld [vmem:[%s11115_s1] sm:$0xff]  ;;  %s11836_s1 = smov 64  }
0x2d00   : > { %v6226_v50 = vsel %vm1371_vm1, %v6223_v8, 0.0  ;;  %10075 = vmatprep.subr.mxu0 %v10514_v1 }
0x2d01   : > { %6227 = vadd.xlane.f32.xlu1 %v6226_v50 }
0x2d8a   : > { %v6228_v51 = vpop.xlane.xlu1 %6227 }
0x2d8b   : > { %v6229_v52 = vmul.f32 0.03125, %v6228_v51 }
0x2d8d   : > { %v6230_v53 = vsub.f32 %v6223_v8, %v6229_v52  ;;  %v9349_v8 = vld [vmem:[%s11800_s23 + $0x1] ss:$0 sm:$0xff] }
0x2d8f   : > { %v6231_v55 = vmul.f32 %v6230_v53, %v6230_v53 }
0x2d91   : > { %v6232_v14 = vsel %vm1371_vm1, %v6231_v55, 0.0 }
0x2d92   : > { %6233 = vadd.xlane.f32.xlu1 %v6232_v14 }
0x2e1b   : > { %v6234_v39 = vpop.xlane.xlu1 %6233 }
0x2e1c   : > { %v6235_v60 = vmul.f32 0.03125, %v6234_v39 }
0x2e1e   : > { %v6236_v61 = vadd.f32 1e-06, %v6235_v60 }
0x2e20   : > { %10413 = vrsqrt.f32 %v6236_v61 }
0x2e2d   : > { %v10414_v63 = vpop.eup %10413 }
0x2e2e   : > { %v6238_v2 = vmul.f32 %v10414_v63, %v6230_v53 }
0x2e30   : > { %v6245_v4 = vmul.f32 %v9336_v0, %v6238_v2 }
0x2e32   : > { %v6252_v6 = vadd.f32 %v9337_v3, %v6245_v4 }
0x2e34   : > { %10054 = vmatmul.mubr.msk.f32.vlgmr.msra.gmra.mxu0 %vm1371_vm1, %v6252_v6 }
0x2e35   : > { %10083 = vmatprep.mubr.msk.f32.mxu0 %vm10515_vm0, %v10514_v1  ;;  %10076 = vmatpush3.msra.mxu0 %v9347_v37 }
0x2e36   : > { %10077 = vmatprep.subr.mxu0 %v10514_v1 }
0x2e37   : > { %10078 = vmatpush3.msra.mxu0 %v9346_v38 }
0x2e38   : > { %10079 = vmatprep.subr.mxu0 %v10514_v1 }
0x2e39   : > { %10080 = vmatpush3.msra.mxu0 %v9345_v40 }
0x2e3a   : > { %10081 = vmatprep.subr.mxu0 %v10514_v1 }
0x2e3b   : > { %10082 = vmatpush3.msra.mxu0 %v9344_v36 }
0x2e3c   : > { %10086 = vmatprep.subr.mxu0 %v10514_v1 }
0x2ef4   : > { %v6342_v16 = vpop.f32.mrf.mxu0 }
0x2ef5   : > { %v6343_v24 = vadd.f32 %v9338_v54, %v6342_v16 }
0x2ef6   : > { %v10055_v17 = vpop.f32.mrf.mxu0 }
0x2ef7   : > { %v6347_v18 = vmul.f32 0.70710677, %v6343_v24  ;;  %v6346_v20 = vmul.f32 0.5, %v6343_v24 }
0x2ef9   : > { %10415 = verf.f32 %v6347_v18 }
0x2f06   : > { %v10416_v19 = vpop.eup %10415 }
0x2f07   : > { %v6349_v21 = vadd.f32 1.0, %v10416_v19 }
0x2f09   : > { %v6350_v23 = vmul.f32 %v6349_v21, %v6346_v20 }
0x2f0b   : > { %10073 = vmatmul.mubr.msk.f32.vlgmr.msra.gmra.mxu1 %vm2554_vm3, %v6350_v23  ;;  %v9351_v23 = vld [vmem:[%s11802_s26 + $0x20] sm:$0xff] }
0x2f0c   : > { %10093 = vmatprep.mubr.msk.f32.mxu1 %vm10515_vm0, %v10514_v1 }
0x2fcb   : > { %v6426_v26 = vpop.f32.mrf.mxu1 }
0x2fcc   : > { %v6427_v27 = vadd.f32 %v9340_v25, %v6426_v26  ;;  %v9352_v25 = vld [vmem:[%s11802_s26 + $0x28] sm:$0xff] }
0x2fcd   : > { %v10074_v28 = vpop.f32.mrf.mxu1 }
0x2fce   : > { %v6430_v29 = vadd.f32 %v6427_v27, %v6252_v6 }
0x2fd0   : > { %v6433_v30 = vsel %vm1371_vm1, %v6430_v29, 0.0 }
0x2fd1   : > { %6434 = vadd.xlane.f32.xlu1 %v6433_v30 }
0x305a   : > { %v6435_v31 = vpop.xlane.xlu1 %6434 }
0x305b   : > { %v6436_v32 = vmul.f32 0.03125, %v6435_v31 }
0x305d   : > { %v6437_v33 = vsub.f32 %v6430_v29, %v6436_v32 }
0x305f   : > { %v6438_v34 = vmul.f32 %v6437_v33, %v6437_v33 }
0x3061   : > { %v6439_v35 = vsel %vm1371_vm1, %v6438_v34, 0.0 }
0x3062   : > { %6440 = vadd.xlane.f32.xlu1 %v6439_v35 }
0x30eb   : > { %v6441_v41 = vpop.xlane.xlu1 %6440 }
0x30ec   : > { %v6442_v42 = vmul.f32 0.03125, %v6441_v41 }
0x30ee   : > { %v6443_v43 = vadd.f32 1e-06, %v6442_v42 }
0x30f0   : > { %10417 = vrsqrt.f32 %v6443_v43 }
0x30fd   : > { %v10418_v44 = vpop.eup %10417 }
0x30fe   : > { %v6445_v47 = vmul.f32 %v10418_v44, %v6437_v33 }
0x3100   : > { %v6452_v48 = vmul.f32 %v9342_v45, %v6445_v47 }
0x3102   : > { %v11395_v49 = vadd.f32 %v9343_v5, %v6452_v48 }
0x3104   : > { %10084 = vmatmul.mubr.msk.f32.vlgmr.msra.gmra.mxu0 %vm1371_vm1, %v11395_v49 }
0x3105   : > { %10088 = vmatprep.mubr.msk.f32.mxu0 %vm10515_vm0, %v10514_v1 }
0x31c4   : > { %v6542_v50 = vpop.f32.mrf.mxu0 }
0x31c5   : > { %v11402_v51 = vadd.f32 %v9349_v8, %v6542_v50 }
0x31c6   : > { %v10085_v52 = vpop.f32.mrf.mxu0 }
0x31c7   : > { %6721 = vrot.lane.b32.xlu0 %v11402_v51, %s11817_s14  ;;  %6554 = vrot.lane.b32.xlu1 %v11402_v51, %s11818_s12 }
0x31cb   : > { %6719 = vrot.lane.b32.xlu0 %v11402_v51, %s11815_s8 }
0x3239   : > { %v6555_v53 = vpop.permute.xlu1 %6554  ;;  %v6722_v55 = vpop.permute.xlu0 %6721 }
0x323a   : > { %10087 = vmatpush3.xpose.msk.msra.mxu0 %vm1453_vm2, %v6555_v53 }
0x323b   : > { %10096 = vmatprep.subr.mxu0 %v10514_v1 }
0x323d   : > { %10089 = vmatmul.mubr.msk.f32.vlgmr.msra.gmra.mxu0 %vm1453_vm2, %v11402_v51  ;;  %v6720_v14 = vpop.permute.xlu0 %6719 }
0x323e   : > { %10097 = vmatpush3.xpose.msk.msra.mxu0 %vm1453_vm2, %v6722_v55  ;;  %10098 = vmatprep.mubr.msk.f32.mxu0 %vm10515_vm0, %v10514_v1 }
0x323f   : > { %10106 = vmatprep.subr.mxu0 %v10514_v1 }
0x3241   : > { %10099 = vmatmul.mubr.msk.f32.vlgmr.msra.gmra.mxu0 %vm1453_vm2, %v6720_v14  ;;  %v9353_v14 = vld [vmem:[%s11802_s26 + $0x30] sm:$0xff] }
0x3242   : > { %10108 = vmatprep.mubr.msk.f32.mxu0 %vm10515_vm0, %v10514_v1  ;;  %10107 = vmatpush3.msra.mxu0 %v9352_v25 }
0x3243   : > { %10116 = vmatprep.subr.mxu0 %v10514_v1 }
0x32fd   : > { %v6626_v57 = vpop.f32.mrf.mxu0 }
0x32fe   : > { %v6630_v58 = vmul.f32 0.35355338, %v6626_v57 }
0x32ff   : > { %v10090_v59 = vpop.f32.mrf.mxu0 }
0x3300   : > { %v6631_v39 = vadd.f32 %v11422_v12, %v6630_v58 }
0x3301   : > { %v6793_v60 = vpop.f32.mrf.mxu0 }
0x3302   : > { %v6797_v61 = vmul.f32 0.35355338, %v6793_v60  ;;  %v6632_v63 = vsel %vm1453_vm2, %v6631_v39, -inf }
0x3303   : > { %6633 = vmax.xlane.f32.xlu0 %v6632_v63  ;;  %v10100_v0 = vpop.f32.mrf.mxu0 }
0x3304   : > { %v6798_v2 = vadd.f32 %v11422_v12, %v6797_v61 }
0x3306   : > { %v6799_v3 = vsel %vm1453_vm2, %v6798_v2, -inf }
0x3307   : > { %6800 = vmax.xlane.f32.xlu1 %v6799_v3 }
0x3318   : > { %6810 = vrot.lane.b32.xlu1 %v11402_v51, %s11835_s22 }
0x331c   : > { %7032 = vrot.lane.b32.xlu1 %v11402_v51, %s11819_s19 }
0x338c   : > { %v6634_v4 = vpop.xlane.xlu0 %6633 }
0x338d   : > { %v6635_v6 = vsub.f32 %v6631_v39, %v6634_v4 }
0x338f   : > { %v6636_v56 = vmul.f32 1.442695, %v6635_v6 }
0x3390   : > { %v6801_v7 = vpop.xlane.xlu1 %6800 }
0x3391   : > { %10419 = vpow2.f32 %v6636_v56  ;;  %v6802_v9 = vsub.f32 %v6798_v2, %v6801_v7  ;;  %v9354_v7 = vld [vmem:[%s11802_s26 + $0x38] sm:$0xff] }
0x3393   : > { %v6803_v46 = vmul.f32 1.442695, %v6802_v9 }
0x3394   : > { %v6811_v19 = vpop.permute.xlu1 %6810 }
0x3395   : > { %10421 = vpow2.f32 %v6803_v46 }
0x3398   : > { %v7033_v31 = vpop.permute.xlu1 %7032 }
0x339e   : > { %v10420_v10 = vpop.eup %10419 }
0x339f   : > { %v6638_v11 = vsel %vm1453_vm2, %v10420_v10, 0.0 }
0x33a0   : > { %6639 = vadd.xlane.f32.xlu0 %v6638_v11 }
0x33a2   : > { %v10422_v13 = vpop.eup %10421 }
0x33a3   : > { %v6805_v15 = vsel %vm1453_vm2, %v10422_v13, 0.0 }
0x33a4   : > { %6806 = vadd.xlane.f32.xlu0 %v6805_v15 }
0x33ba   : > { %6643 = vrot.lane.b32.xlu0 %v11402_v51, %s11836_s1 }
0x33be   : > { %7034 = vrot.lane.b32.xlu0 %v11402_v51, %s11821_s24 }
0x3429   : > { %v6640_v54 = vpop.xlane.xlu0 %6639 }
0x342a   : > { %10423 = vrcp.f32 %v6640_v54  ;;  %v9386_v54 = vld [vmem:[%s11807_s16 + $0x30] sm:$0xff] }
0x342d   : > { %v6807_v16 = vpop.xlane.xlu0 %6806 }
0x342e   : > { %10425 = vrcp.f32 %v6807_v16 }
0x3431   : > { %v6644_v24 = vpop.permute.xlu0 %6643 }
0x3432   : > { %10092 = vmatpush3.msra.mxu1 %v6644_v24  ;;  %v9385_v24 = vld [vmem:[%s11807_s16 + $0x28] sm:$0xff] }
0x3433   : > { %10101 = vmatprep.subr.mxu1 %v10514_v1 }
0x3435   : > { %v7035_v29 = vpop.permute.xlu0 %7034 }
0x3437   : > { %v10424_v17 = vpop.eup %10423 }
0x3438   : > { %v6642_v18 = vmul.f32 %v10424_v17, %v10420_v10  ;;  %v9384_v17 = vld [vmem:[%s11807_s16 + $0x20] sm:$0xff] }
0x343a   : > { %10094 = vmatmul.mubr.msk.f32.vlgmr.msra.gmra.mxu1 %vm1453_vm2, %v6642_v18  ;;  %v9372_v18 = vld [vmem:[%s11806_s15 + $0x1] ss:$0 sm:$0xff] }
0x343b   : > { %v10426_v20 = vpop.eup %10425  ;;  %10102 = vmatpush3.msra.mxu1 %v6811_v19  ;;  %10103 = vmatprep.mubr.msk.f32.mxu1 %vm10515_vm0, %v10514_v1 }
0x343c   : > { %v6809_v21 = vmul.f32 %v10426_v20, %v10422_v13  ;;  %10111 = vmatprep.subr.mxu1 %v10514_v1 }
0x343e   : > { %10104 = vmatmul.mubr.msk.f32.vlgmr.msra.gmra.mxu1 %vm1453_vm2, %v6809_v21 }
0x343f   : > { %10113 = vmatprep.mubr.msk.f32.mxu1 %vm10515_vm0, %v10514_v1  ;;  %10112 = vmatpush3.msra.mxu1 %v9351_v23 }
0x3440   : > { %10121 = vmatprep.subr.mxu1 %v10514_v1 }
0x34fa   : > { %v6715_v26 = vpop.f32.mrf.mxu1 }
0x34fb   : > { %10114 = vmatmul.mubr.msk.f32.vlgmr.msra.gmra.mxu1 %vm1453_vm2, %v6715_v26 }
0x34fc   : > { %v10095_v27 = vpop.f32.mrf.mxu1  ;;  %10123 = vmatprep.mubr.msk.f32.mxu1 %vm10515_vm0, %v10514_v1 }
0x34fe   : > { %v6882_v28 = vpop.f32.mrf.mxu1 }
0x34ff   : > { %10109 = vmatmul.mubr.msk.f32.vlgmr.msra.gmra.mxu0 %vm1453_vm2, %v6882_v28 }
0x3500   : > { %10117 = vmatpush3.xpose.msk.msra.mxu0 %vm1453_vm2, %v7035_v29  ;;  %v10105_v30 = vpop.f32.mrf.mxu1  ;;  %10118 = vmatprep.mubr.msk.f32.mxu0 %vm10515_vm0, %v10514_v1 }
0x3501   : > { %10126 = vmatprep.subr.mxu0 %v10514_v1 }
0x3503   : > { %10119 = vmatmul.mubr.msk.f32.vlgmr.msra.gmra.mxu0 %vm1453_vm2, %v7033_v31 }
0x3504   : > { %10128 = vmatprep.mubr.msk.f32.mxu0 %vm10515_vm0, %v10514_v1  ;;  %10127 = vmatpush3.msra.mxu0 %v9353_v14 }
0x3505   : > { %10136 = vmatprep.subr.mxu0 %v10514_v1 }
0x35bb   : > { %v7028_v32 = vpop.f32.mrf.mxu1 }
0x35bd   : > { %v10115_v33 = vpop.f32.mrf.mxu1 }
0x35be   : > { %v9389_v33 = vld [vmem:[%s11813_s28 + $0x1] ss:$0 sm:$0xff] }
0x35bf   : > { %v6955_v34 = vpop.f32.mrf.mxu0 }
0x35c0   : > { %v7029_v35 = vadd.f32 %v7028_v32, %v6955_v34 }
0x35c1   : > { %v10110_v37 = vpop.f32.mrf.mxu0 }
0x35c2   : > { %v9378_v37 = vld [vmem:[%s11810_s3 + $0x28] sm:$0xff] }
0x35c3   : > { %v7106_v38 = vpop.f32.mrf.mxu0 }
0x35c4   : > { %v7110_v40 = vmul.f32 0.35355338, %v7106_v38  ;;  %v9377_v38 = vld [vmem:[%s11810_s3 + $0x20] sm:$0xff] }
0x35c5   : > { %v10120_v36 = vpop.f32.mrf.mxu0 }
0x35c6   : > { %v7111_v41 = vadd.f32 %v11422_v12, %v7110_v40 }
0x35c8   : > { %v7112_v42 = vsel %vm1453_vm2, %v7111_v41, -inf }
0x35c9   : > { %7113 = vmax.xlane.f32.xlu0 %v7112_v42 }
0x35df   : > { %7123 = vrot.lane.b32.xlu0 %v11402_v51, %s11804_s10  ;;  %s11843_s10 = sld [smem:[#allocation45_spill]] }
0x35e3   : > { %7273 = vrot.lane.b32.xlu0 %v11402_v51, %s11803_s11 }
0x3652   : > { %v7114_v43 = vpop.xlane.xlu0 %7113 }
0x3653   : > { %v7115_v44 = vsub.f32 %v7111_v41, %v7114_v43  ;;  %v9375_v43 = vld [vmem:[%s11811_s5 + $0x1] ss:$0 sm:$0xff] }
0x3655   : > { %v7116_v45 = vmul.f32 1.442695, %v7115_v44 }
0x3656   : > { %v7124_v47 = vpop.permute.xlu0 %7123 }
0x3657   : > { %10427 = vpow2.f32 %v7116_v45  ;;  %10122 = vmatpush3.msra.mxu1 %v7124_v47  ;;  %v9376_v45 = vld [vmem:[%s11812_s6 + $0x1] ss:$0 sm:$0xff] }
0x3658   : > { %10131 = vmatprep.subr.mxu1 %v10514_v1 }
0x365a   : > { %v7274_v55 = vpop.permute.xlu0 %7273 }
0x3664   : > { %v10428_v5 = vpop.eup %10427 }
0x3665   : > { %v7118_v48 = vsel %vm1453_vm2, %v10428_v5, 0.0 }
0x3666   : > { %7119 = vadd.xlane.f32.xlu1 %v7118_v48  ;;  %v9382_v48 = vld [vmem:[%s11814_s2 + $0x1] ss:$0 sm:$0xff] }
0x3677   : > { %7275 = vrot.lane.b32.xlu1 %v11402_v51, %s11822_s25 }
0x36ef   : > { %v7120_v8 = vpop.xlane.xlu1 %7119 }
0x36f0   : > { %10429 = vrcp.f32 %v7120_v8 }
0x36f3   : > { %v7276_v53 = vpop.permute.xlu1 %7275 }
0x36fd   : > { %v10430_v50 = vpop.eup %10429 }
0x36fe   : > { %v7122_v52 = vmul.f32 %v10430_v50, %v10428_v5 }
0x3700   : > { %10124 = vmatmul.mubr.msk.f32.vlgmr.msra.gmra.mxu1 %vm1453_vm2, %v7122_v52 }
0x3701   : > { %10132 = vmatpush3.xpose.msk.msra.mxu1 %vm1453_vm2, %v7276_v53  ;;  %10133 = vmatprep.mubr.msk.f32.mxu1 %vm10515_vm0, %v10514_v1 }
0x3702   : > { %10141 = vmatprep.subr.mxu1 %v10514_v1 }
0x3704   : > { %10134 = vmatmul.mubr.msk.f32.vlgmr.msra.gmra.mxu1 %vm1453_vm2, %v7274_v55 }
0x3705   : > { %10143 = vmatprep.mubr.msk.f32.mxu1 %vm10515_vm0, %v10514_v1  ;;  %10142 = vmatpush3.msra.mxu1 %v9354_v7 }
0x3706   : > { %10157 = vmatprep.subr.mxu1 %v10514_v1 }
0x37c0   : > { %v7195_v57 = vpop.f32.mrf.mxu1 }
0x37c1   : > { %10129 = vmatmul.mubr.msk.f32.vlgmr.msra.gmra.mxu0 %vm1453_vm2, %v7195_v57 }
0x37c2   : > { %v10125_v58 = vpop.f32.mrf.mxu1  ;;  %10138 = vmatprep.mubr.msk.f32.mxu0 %vm10515_vm0, %v10514_v1 }
0x37c4   : > { %v7347_v59 = vpop.f32.mrf.mxu1 }
0x37c5   : > { %v7351_v39 = vmul.f32 0.35355338, %v7347_v59 }
0x37c6   : > { %v10135_v60 = vpop.f32.mrf.mxu1 }
0x37c7   : > { %v7352_v61 = vadd.f32 %v11422_v12, %v7351_v39 }
0x37c9   : > { %v7353_v63 = vsel %vm1453_vm2, %v7352_v61, -inf }
0x37ca   : > { %7354 = vmax.xlane.f32.xlu1 %v7353_v63 }
0x3853   : > { %v7355_v0 = vpop.xlane.xlu1 %7354 }
0x3854   : > { %v7356_v2 = vsub.f32 %v7352_v61, %v7355_v0 }
0x3856   : > { %v7357_v3 = vmul.f32 1.442695, %v7356_v2 }
0x3858   : > { %10431 = vpow2.f32 %v7357_v3 }
0x3865   : > { %v10432_v4 = vpop.eup %10431 }
0x3866   : > { %v7359_v6 = vsel %vm1453_vm2, %v10432_v4, 0.0 }
0x3867   : > { %7360 = vadd.xlane.f32.xlu0 %v7359_v6 }
0x387d   : > { %7364 = vrot.lane.b32.xlu0 %v11402_v51, %s11805_s18  ;;  %v9387_v51 = vld [vmem:[%s11807_s16 + $0x38] sm:$0xff] }
0x3881   : > { %v7268_v56 = vpop.f32.mrf.mxu0 }
0x3882   : > { %v7272_v9 = vadd.f32 %v7268_v56, %v7029_v35  ;;  %v9379_v35 = vld [vmem:[%s11810_s3 + $0x30] sm:$0xff] }
0x3883   : > { %v10130_v12 = vpop.f32.mrf.mxu0 }
0x38f0   : > { %v7361_v46 = vpop.xlane.xlu0 %7360 }
0x38f1   : > { %10433 = vrcp.f32 %v7361_v46 }
0x38f4   : > { %v7365_v10 = vpop.permute.xlu0 %7364 }
0x38f5   : > { %10137 = vmatpush3.msra.mxu0 %v7365_v10 }
0x38f6   : > { %10146 = vmatprep.subr.mxu0 %v10514_v1 }
0x38fe   : > { %v10434_v11 = vpop.eup %10433 }
0x38ff   : > { %v7363_v13 = vmul.f32 %v10434_v11, %v10432_v4 }
0x3901   : > { %10139 = vmatmul.mubr.msk.f32.vlgmr.msra.gmra.mxu0 %vm1453_vm2, %v7363_v13 }
0x3902   : > { %10154 = vmatprep.mubr.msk.f32.mxu0 %vm10515_vm0, %v10514_v1 }
0x39c1   : > { %v7436_v15 = vpop.f32.mrf.mxu0 }
0x39c2   : > { %10144 = vmatmul.mubr.msk.f32.vlgmr.msra.gmra.mxu1 %vm1453_vm2, %v7436_v15 }
0x39c3   : > { %10158 = vmatpush3.msra.mxu1 %v9387_v51  ;;  %v10140_v16 = vpop.f32.mrf.mxu0  ;;  %10165 = vmatprep.mubr.msk.f32.mxu1 %vm10515_vm0, %v10514_v1 }
0x39c4   : > { %10159 = vmatprep.subr.mxu1 %v10514_v1 }
0x39c5   : > { %10160 = vmatpush3.msra.mxu1 %v9386_v54  ;;  %v9392_v54 = vld [vmem:[%s11820_s20 + $0x28] sm:$0xff] }
0x39c6   : > { %10161 = vmatprep.subr.mxu1 %v10514_v1 }
0x39c7   : > { %10162 = vmatpush3.msra.mxu1 %v9385_v24 }
0x39c8   : > { %10163 = vmatprep.subr.mxu1 %v10514_v1 }
0x39c9   : > { %10164 = vmatpush3.msra.mxu1 %v9384_v17 }
0x39ca   : > { %10166 = vmatmul.mubr.msk.f32.vlgmr.msra.gmra.mxu1 %vm1371_vm1, %v11220_v62  ;;  %10173 = vmatprep.subr.mxu1 %v10514_v1 }
0x39cb   : > { %10175 = vmatprep.mubr.msk.f32.mxu1 %vm10515_vm0, %v10514_v1 }
0x3a82   : > { %v7509_v19 = vpop.f32.mrf.mxu1 }
0x3a83   : > { %v7513_v20 = vadd.f32 %v7509_v19, %v7272_v9  ;;  %v9391_v19 = vld [vmem:[%s11820_s20 + $0x20] sm:$0xff] }
0x3a84   : > { %v10145_v21 = vpop.f32.mrf.mxu1 }
0x3a85   : > { %v7520_v23 = vadd.f32 %v9372_v18, %v7513_v20 }
0x3a87   : > { %v7521_v25 = vadd.f32 %v7520_v23, %v11395_v49  ;;  %v9380_v49 = vld [vmem:[%s11810_s3 + $0x38] sm:$0xff] }
0x3a88   : > { %10147 = vmatpush3.msra.mxu0 %v9380_v49  ;;  %v10462_v49 = vld [vmem:[%s11266_s13] sm:$0xff]  ;;  %s11837_s13 = sld [smem:[#allocation38_spill]] }
0x3a89   : > { %v7526_v26 = vsel %vm1371_vm1, %v7521_v25, 0.0  ;;  %10148 = vmatprep.subr.mxu0 %v10514_v1 }
0x3a8a   : > { %v7718_v27 = vpop.f32.mrf.mxu1  ;;  %7527 = vadd.xlane.f32.xlu1 %v7526_v26  ;;  %10149 = vmatpush3.msra.mxu0 %v9379_v35 }
0x3a8b   : > { %v11515_v34 = vadd.f32 %v9389_v33, %v7718_v27  ;;  %10150 = vmatprep.subr.mxu0 %v10514_v1 }
0x3a8c   : > { %v10167_v62 = vpop.f32.mrf.mxu1  ;;  %10151 = vmatpush3.msra.mxu0 %v9378_v37 }
0x3a8d   : > { %10152 = vmatprep.subr.mxu0 %v10514_v1 }
0x3a8e   : > { %10153 = vmatpush3.msra.mxu0 %v9377_v38 }
0x3a8f   : > { %10168 = vmatprep.subr.mxu0 %v10514_v1 }
0x3b13   : > { %v7528_v28 = vpop.xlane.xlu1 %7527 }
0x3b14   : > { %v7529_v29 = vmul.f32 0.03125, %v7528_v28 }
0x3b16   : > { %v7530_v30 = vsub.f32 %v7521_v25, %v7529_v29 }
0x3b18   : > { %v7531_v31 = vmul.f32 %v7530_v30, %v7530_v30 }
0x3b1a   : > { %v7532_v32 = vsel %vm1371_vm1, %v7531_v31, 0.0 }
0x3b1b   : > { %7533 = vadd.xlane.f32.xlu1 %v7532_v32 }
0x3b2c   : > { %7896 = vrot.lane.b32.xlu1 %v11515_v34, %s11815_s8 }
0x3ba4   : > { %v7534_v40 = vpop.xlane.xlu1 %7533 }
0x3ba5   : > { %v7535_v36 = vmul.f32 0.03125, %v7534_v40 }
0x3ba7   : > { %v7536_v41 = vadd.f32 1e-06, %v7535_v36 }
0x3ba8   : > { %v7897_v53 = vpop.permute.xlu1 %7896 }
0x3ba9   : > { %10435 = vrsqrt.f32 %v7536_v41 }
0x3bb6   : > { %v10436_v42 = vpop.eup %10435 }
0x3bb7   : > { %v7538_v44 = vmul.f32 %v10436_v42, %v7530_v30 }
0x3bb9   : > { %v7545_v47 = vmul.f32 %v9375_v43, %v7538_v44 }
0x3bbb   : > { %v11529_v5 = vadd.f32 %v9376_v45, %v7545_v47 }
0x3bbd   : > { %10155 = vmatmul.mubr.msk.f32.vlgmr.msra.gmra.mxu0 %vm1371_vm1, %v11529_v5 }
0x3bbe   : > { %10169 = vmatpush3.xpose.msk.msra.mxu0 %vm1453_vm2, %v11515_v34  ;;  %10170 = vmatprep.mubr.msk.f32.mxu0 %vm10515_vm0, %v10514_v1 }
0x3bbf   : > { %10178 = vmatprep.subr.mxu0 %v10514_v1 }
0x3c7d   : > { %v7635_v8 = vpop.f32.mrf.mxu0 }
0x3c7e   : > { %v11539_v50 = vadd.f32 %v9382_v48, %v7635_v8 }
0x3c7f   : > { %v10156_v52 = vpop.f32.mrf.mxu0 }
0x3c80   : > { %7894 = vrot.lane.b32.xlu0 %v11539_v50, %s11815_s8  ;;  %10171 = vmatmul.mubr.msk.f32.vlgmr.msra.gmra.mxu0 %vm1453_vm2, %v11539_v50  ;;  %s11839_s8 = sld [smem:[#allocation41_spill]] }
0x3c81   : > { %10179 = vmatpush3.xpose.msk.msra.mxu0 %vm1453_vm2, %v7897_v53  ;;  %10180 = vmatprep.mubr.msk.f32.mxu0 %vm10515_vm0, %v10514_v1 }
0x3c82   : > { %10188 = vmatprep.subr.mxu0 %v10514_v1 }
0x3cf2   : > { %v7895_v55 = vpop.permute.xlu0 %7894 }
0x3cf3   : > { %10181 = vmatmul.mubr.msk.f32.vlgmr.msra.gmra.mxu0 %vm1453_vm2, %v7895_v55 }
0x3cf4   : > { %10190 = vmatprep.mubr.msk.f32.mxu0 %vm10515_vm0, %v10514_v1  ;;  %10189 = vmatpush3.msra.mxu0 %v9392_v54 }
0x3cf5   : > { %10198 = vmatprep.subr.mxu0 %v10514_v1 }
0x3d40   : > { %v7801_v14 = vpop.f32.mrf.mxu0 }
0x3d41   : > { %v7805_v57 = vmul.f32 0.35355338, %v7801_v14 }
0x3d42   : > { %v10172_v58 = vpop.f32.mrf.mxu0 }
0x3d43   : > { %v7806_v59 = vadd.f32 %v7805_v57, %v11269_v22 }
0x3d45   : > { %v7807_v39 = vsel %vm1453_vm2, %v7806_v59, -inf }
0x3d46   : > { %7808 = vmax.xlane.f32.xlu0 %v7807_v39 }
0x3db3   : > { %v7968_v60 = vpop.f32.mrf.mxu0 }
0x3db4   : > { %v7972_v61 = vmul.f32 0.35355338, %v7968_v60 }
0x3db5   : > { %v10182_v63 = vpop.f32.mrf.mxu0 }
0x3db6   : > { %v7973_v0 = vadd.f32 %v7972_v61, %v11269_v22 }
0x3db8   : > { %v7974_v2 = vsel %vm1453_vm2, %v7973_v0, -inf }
0x3db9   : > { %7975 = vmax.xlane.f32.xlu1 %v7974_v2 }
0x3dca   : > { %7818 = vrot.lane.b32.xlu1 %v11515_v34, %s11818_s12 }
0x3dce   : > { %8209 = vrot.lane.b32.xlu1 %v11515_v34, %s11819_s19 }
0x3dcf   : > { %v7809_v3 = vpop.xlane.xlu0 %7808 }
0x3dd0   : > { %v7810_v4 = vsub.f32 %v7806_v59, %v7809_v3 }
0x3dd2   : > { %v7811_v6 = vmul.f32 1.442695, %v7810_v4  ;;  %8207 = vrot.lane.b32.xlu1 %v11539_v50, %s11819_s19  ;;  %v9394_v4 = vld [vmem:[%s11820_s20 + $0x38] sm:$0xff]  ;;  %s11841_s19 = sld [smem:[#allocation44_spill]] }
0x3dd4   : > { %10437 = vpow2.f32 %v7811_v6 }
0x3de1   : > { %v10438_v56 = vpop.eup %10437 }
0x3de2   : > { %v7813_v7 = vsel %vm1453_vm2, %v10438_v56, 0.0 }
0x3de3   : > { %7814 = vadd.xlane.f32.xlu0 %v7813_v7 }
0x3e42   : > { %v7976_v22 = vpop.xlane.xlu1 %7975 }
0x3e43   : > { %v7977_v9 = vsub.f32 %v7973_v0, %v7976_v22 }
0x3e45   : > { %v7978_v12 = vmul.f32 1.442695, %v7977_v9 }
0x3e46   : > { %v7819_v46 = vpop.permute.xlu1 %7818 }
0x3e47   : > { %10439 = vpow2.f32 %v7978_v12  ;;  %10174 = vmatpush3.msra.mxu1 %v7819_v46 }
0x3e48   : > { %10183 = vmatprep.subr.mxu1 %v10514_v1 }
0x3e4a   : > { %v8210_v23 = vpop.permute.xlu1 %8209 }
0x3e4e   : > { %v8208_v27 = vpop.permute.xlu1 %8207 }
0x3e54   : > { %v10440_v10 = vpop.eup %10439 }
0x3e55   : > { %v7980_v11 = vsel %vm1453_vm2, %v10440_v10, 0.0 }
0x3e56   : > { %7981 = vadd.xlane.f32.xlu0 %v7980_v11 }
0x3e6c   : > { %v7815_v13 = vpop.xlane.xlu0 %7814  ;;  %7985 = vrot.lane.b32.xlu0 %v11515_v34, %s11817_s14  ;;  %s11840_s14 = sld [smem:[#allocation42_spill]] }
0x3e6d   : > { %10441 = vrcp.f32 %v7815_v13 }
0x3e7a   : > { %v10442_v51 = vpop.eup %10441 }
0x3e7b   : > { %v7817_v15 = vmul.f32 %v10442_v51, %v10438_v56 }
0x3e7d   : > { %10176 = vmatmul.mubr.msk.f32.vlgmr.msra.gmra.mxu1 %vm1453_vm2, %v7817_v15 }
0x3e7e   : > { %10185 = vmatprep.mubr.msk.f32.mxu1 %vm10515_vm0, %v10514_v1 }
0x3edf   : > { %v7982_v16 = vpop.xlane.xlu0 %7981 }
0x3ee0   : > { %10443 = vrcp.f32 %v7982_v16 }
0x3ee3   : > { %v7986_v24 = vpop.permute.xlu0 %7985 }
0x3ee4   : > { %10184 = vmatpush3.msra.mxu1 %v7986_v24 }
0x3ee5   : > { %10193 = vmatprep.subr.mxu1 %v10514_v1 }
0x3eed   : > { %v10444_v17 = vpop.eup %10443 }
0x3eee   : > { %v7984_v18 = vmul.f32 %v10444_v17, %v10440_v10  ;;  %v9412_v10 = vld [vmem:[%s11823_s27 + $0x1] ss:$0 sm:$0xff] }
0x3ef0   : > { %10186 = vmatmul.mubr.msk.f32.vlgmr.msra.gmra.mxu1 %vm1453_vm2, %v7984_v18 }
0x3ef1   : > { %10194 = vmatpush3.msra.mxu1 %v9391_v19  ;;  %10195 = vmatprep.mubr.msk.f32.mxu1 %vm10515_vm0, %v10514_v1 }
0x3ef2   : > { %10203 = vmatprep.subr.mxu1 %v10514_v1 }
0x3f3d   : > { %v7890_v20 = vpop.f32.mrf.mxu1 }
0x3f3e   : > { %10196 = vmatmul.mubr.msk.f32.vlgmr.msra.gmra.mxu1 %vm1453_vm2, %v7890_v20 }
0x3f3f   : > { %v10177_v21 = vpop.f32.mrf.mxu1  ;;  %10205 = vmatprep.mubr.msk.f32.mxu1 %vm10515_vm0, %v10514_v1 }
0x3f40   : > { %v9420_v21 = vld [vmem:[%s11824_s29 + $0x38] sm:$0xff] }
0x3fb0   : > { %v8057_v25 = vpop.f32.mrf.mxu1 }
0x3fb1   : > { %10191 = vmatmul.mubr.msk.f32.vlgmr.msra.gmra.mxu0 %vm1453_vm2, %v8057_v25  ;;  %v9418_v25 = vld [vmem:[%s11824_s29 + $0x28] sm:$0xff] }
0x3fb2   : > { %10199 = vmatpush3.xpose.msk.msra.mxu0 %vm1453_vm2, %v8210_v23  ;;  %v10187_v26 = vpop.f32.mrf.mxu1  ;;  %10200 = vmatprep.mubr.msk.f32.mxu0 %vm10515_vm0, %v10514_v1  ;;  %v9419_v23 = vld [vmem:[%s11824_s29 + $0x30] sm:$0xff] }
0x3fb3   : > { %10208 = vmatprep.subr.mxu0 %v10514_v1 }
0x3fb5   : > { %10201 = vmatmul.mubr.msk.f32.vlgmr.msra.gmra.mxu0 %vm1453_vm2, %v8208_v27 }
0x3fb6   : > { %10210 = vmatprep.mubr.msk.f32.mxu0 %vm10515_vm0, %v10514_v1 }
0x3ffe   : > { %v8203_v62 = vpop.f32.mrf.mxu1 }
0x4000   : > { %v10197_v28 = vpop.f32.mrf.mxu1 }
0x4071   : > { %v8130_v29 = vpop.f32.mrf.mxu0 }
0x4072   : > { %v8204_v2 = vadd.f32 %v8203_v62, %v8130_v29  ;;  %v9415_v29 = vld [vmem:[%s11825_s30 + $0x1] ss:$0 sm:$0xff] }
0x4073   : > { %v10192_v30 = vpop.f32.mrf.mxu0 }
0x4075   : > { %v8281_v31 = vpop.f32.mrf.mxu0 }
0x4076   : > { %v8285_v32 = vmul.f32 0.35355338, %v8281_v31  ;;  %v9416_v31 = vld [vmem:[%s11827_s17 + $0x1] ss:$0 sm:$0xff] }
0x4077   : > { %v10202_v33 = vpop.f32.mrf.mxu0 }
0x4078   : > { %v8286_v35 = vadd.f32 %v10462_v49, %v8285_v32 }
0x407a   : > { %v8287_v37 = vsel %vm1453_vm2, %v8286_v35, -inf }
0x407b   : > { %8288 = vmax.xlane.f32.xlu0 %v8287_v37  ;;  %v9427_v37 = vld [vmem:[%s11828_s0 + $0x68] sm:$0xff] }
0x4091   : > { %8298 = vrot.lane.b32.xlu0 %v11515_v34, %s11821_s24  ;;  %s11842_s24 = sld [smem:[#allocation47_spill]] }
0x4095   : > { %8448 = vrot.lane.b32.xlu0 %v11539_v50, %s11803_s11  ;;  %v9393_v50 = vld [vmem:[%s11820_s20 + $0x30] sm:$0xff] }
0x4096   : > { %10209 = vmatpush3.msra.mxu0 %v9393_v50 }
0x4097   : > { %10218 = vmatprep.subr.mxu0 %v10514_v1 }
0x4104   : > { %v8289_v38 = vpop.xlane.xlu0 %8288 }
0x4105   : > { %v8290_v40 = vsub.f32 %v8286_v35, %v8289_v38  ;;  %v9428_v35 = vld [vmem:[%s11828_s0 + $0x70] sm:$0xff]  ;;  %v9426_v38 = vld [vmem:[%s11828_s0 + $0x60] sm:$0xff] }
0x4107   : > { %v8291_v36 = vmul.f32 1.442695, %v8290_v40  ;;  %v9425_v40 = vld [vmem:[%s11828_s0 + $0x58] sm:$0xff] }
0x4108   : > { %v8299_v41 = vpop.permute.xlu0 %8298 }
0x4109   : > { %10445 = vpow2.f32 %v8291_v36  ;;  %10204 = vmatpush3.msra.mxu1 %v8299_v41  ;;  %v9424_v36 = vld [vmem:[%s11828_s0 + $0x50] sm:$0xff]  ;;  %v9423_v41 = vld [vmem:[%s11828_s0 + $0x48] sm:$0xff] }
0x410a   : > { %10213 = vmatprep.subr.mxu1 %v10514_v1 }
0x410c   : > { %v8449_v8 = vpop.permute.xlu0 %8448 }
0x4116   : > { %v10446_v42 = vpop.eup %10445 }
0x4117   : > { %v8293_v43 = vsel %vm1453_vm2, %v10446_v42, 0.0 }
0x4118   : > { %8294 = vadd.xlane.f32.xlu1 %v8293_v43  ;;  %v9431_v43 = vld [vmem:[%s11830_s21 + $0x1] ss:$0 sm:$0xff] }
0x4129   : > { %8450 = vrot.lane.b32.xlu1 %v11515_v34, %s11803_s11  ;;  %s1357_s11 = scalar_lea.vmem %s11843_s10, %s11842_s24 }
0x41a1   : > { %v8295_v44 = vpop.xlane.xlu1 %8294 }
0x41a2   : > { %10447 = vrcp.f32 %v8295_v44 }
0x41a5   : > { %v8451_v48 = vpop.permute.xlu1 %8450 }
0x41af   : > { %v10448_v45 = vpop.eup %10447 }
0x41b0   : > { %v8297_v47 = vmul.f32 %v10448_v45, %v10446_v42  ;;  %v9422_v42 = vld [vmem:[%s11828_s0 + $0x40] sm:$0xff] }
0x41b2   : > { %10206 = vmatmul.mubr.msk.f32.vlgmr.msra.gmra.mxu1 %vm1453_vm2, %v8297_v47 }
0x41b3   : > { %10214 = vmatpush3.xpose.msk.msra.mxu1 %vm1453_vm2, %v8451_v48  ;;  %10215 = vmatprep.mubr.msk.f32.mxu1 %vm10515_vm0, %v10514_v1 }
0x41b4   : > { %10223 = vmatprep.subr.mxu1 %v10514_v1 }
0x41b6   : > { %10216 = vmatmul.mubr.msk.f32.vlgmr.msra.gmra.mxu1 %vm1453_vm2, %v8449_v8 }
0x41b7   : > { %10225 = vmatprep.mubr.msk.f32.mxu1 %vm10515_vm0, %v10514_v1  ;;  %10224 = vmatpush3.msra.mxu1 %v9394_v4 }
0x41b8   : > { %10239 = vmatprep.subr.mxu1 %v10514_v1 }
0x4272   : > { %v8370_v52 = vpop.f32.mrf.mxu1 }
0x4273   : > { %10211 = vmatmul.mubr.msk.f32.vlgmr.msra.gmra.mxu0 %vm1453_vm2, %v8370_v52 }
0x4274   : > { %v10207_v53 = vpop.f32.mrf.mxu1  ;;  %10220 = vmatprep.mubr.msk.f32.mxu0 %vm10515_vm0, %v10514_v1 }
0x4276   : > { %v8522_v55 = vpop.f32.mrf.mxu1 }
0x4277   : > { %v8526_v14 = vmul.f32 0.35355338, %v8522_v55  ;;  %v9433_v55 = vld [vmem:[%s11837_s13 + $0x1] ss:$0 sm:$0xff] }
0x4278   : > { %v10217_v57 = vpop.f32.mrf.mxu1 }
0x4279   : > { %v8527_v58 = vadd.f32 %v10462_v49, %v8526_v14  ;;  %v9429_v49 = vld [vmem:[%s11828_s0 + $0x78] sm:$0xff] }
0x427b   : > { %v8528_v59 = vsel %vm1453_vm2, %v8527_v58, -inf }
0x427c   : > { %8529 = vmax.xlane.f32.xlu1 %v8528_v59 }
0x4305   : > { %v8530_v39 = vpop.xlane.xlu1 %8529 }
0x4306   : > { %v8531_v60 = vsub.f32 %v8527_v58, %v8530_v39 }
0x4308   : > { %v8532_v61 = vmul.f32 1.442695, %v8531_v60 }
0x430a   : > { %10449 = vpow2.f32 %v8532_v61 }
0x4317   : > { %v10450_v63 = vpop.eup %10449 }
0x4318   : > { %v8534_v0 = vsel %vm1453_vm2, %v10450_v63, 0.0 }
0x4319   : > { %8535 = vadd.xlane.f32.xlu0 %v8534_v0 }
0x432f   : > { %8539 = vrot.lane.b32.xlu0 %v11515_v34, %s11822_s25  ;;  %s11838_s25 = sld [smem:[#allocation43_spill]] }
0x4333   : > { %v8443_v3 = vpop.f32.mrf.mxu0 }
0x4334   : > { %v8447_v6 = vadd.f32 %v8443_v3, %v8204_v2 }
0x4335   : > { %v10212_v56 = vpop.f32.mrf.mxu0 }
0x43a2   : > { %v8536_v7 = vpop.xlane.xlu0 %8535 }
0x43a3   : > { %10451 = vrcp.f32 %v8536_v7  ;;  %v9437_v7 = vld [vmem:[%s11833_s4 + $0x1] ss:$0 sm:$0xff] }
0x43a6   : > { %v8540_v22 = vpop.permute.xlu0 %8539 }
0x43a7   : > { %10219 = vmatpush3.msra.mxu0 %v8540_v22 }
0x43a8   : > { %10228 = vmatprep.subr.mxu0 %v10514_v1 }
0x43b0   : > { %v10452_v9 = vpop.eup %10451 }
0x43b1   : > { %v8538_v12 = vmul.f32 %v10452_v9, %v10450_v63  ;;  %v9438_v9 = vld [vmem:[%s11834_s9 + $0x1] ss:$0 sm:$0xff] }
0x43b3   : > { %10221 = vmatmul.mubr.msk.f32.vlgmr.msra.gmra.mxu0 %vm1453_vm2, %v8538_v12 }
0x43b4   : > { %10236 = vmatprep.mubr.msk.f32.mxu0 %vm10515_vm0, %v10514_v1  ;;  %10229 = vmatpush3.msra.mxu0 %v9420_v21 }
0x43b5   : > { %10230 = vmatprep.subr.mxu0 %v10514_v1 }
0x43b6   : > { %10231 = vmatpush3.msra.mxu0 %v9419_v23  ;;  %v9439_v23 = vld [vmem:[%s11839_s8] ss:$0 sm:$0xff] }
0x43b7   : > { %10232 = vmatprep.subr.mxu0 %v10514_v1 }
0x43b8   : > { %10233 = vmatpush3.msra.mxu0 %v9418_v25 }
0x43b9   : > { %10234 = vmatprep.subr.mxu0 %v10514_v1 }
0x4473   : > { %v8611_v34 = vpop.f32.mrf.mxu0 }
0x4474   : > { %10226 = vmatmul.mubr.msk.f32.vlgmr.msra.gmra.mxu1 %vm1453_vm2, %v8611_v34 }
0x4475   : > { %v10222_v46 = vpop.f32.mrf.mxu0  ;;  %10255 = vmatprep.mubr.msk.f32.mxu1 %vm10515_vm0, %v10514_v1  ;;  %10240 = vmatpush3.msra.mxu1 %v9429_v49 }
0x4476   : > { %10241 = vmatprep.subr.mxu1 %v10514_v1 }
0x4477   : > { %10242 = vmatpush3.msra.mxu1 %v9428_v35 }
0x4478   : > { %10243 = vmatprep.subr.mxu1 %v10514_v1 }
0x4479   : > { %10244 = vmatpush3.msra.mxu1 %v9427_v37 }
0x447a   : > { %10245 = vmatprep.subr.mxu1 %v10514_v1 }
0x447b   : > { %10246 = vmatpush3.msra.mxu1 %v9426_v38 }
0x447c   : > { %10247 = vmatprep.subr.mxu1 %v10514_v1 }
0x447d   : > { %10248 = vmatpush3.msra.mxu1 %v9425_v40 }
0x447e   : > { %10249 = vmatprep.subr.mxu1 %v10514_v1 }
0x447f   : > { %10250 = vmatpush3.msra.mxu1 %v9424_v36 }
0x4480   : > { %10251 = vmatprep.subr.mxu1 %v10514_v1 }
0x4481   : > { %10252 = vmatpush3.msra.mxu1 %v9423_v41 }
0x4482   : > { %10253 = vmatprep.subr.mxu1 %v10514_v1 }
0x4483   : > { %10254 = vmatpush3.msra.mxu1 %v9422_v42 }
0x4534   : > { %v8684_v11 = vpop.f32.mrf.mxu1 }
0x4535   : > { %v8688_v13 = vadd.f32 %v8684_v11, %v8447_v6 }
0x4536   : > { %v10227_v51 = vpop.f32.mrf.mxu1 }
0x4537   : > { %v8695_v15 = vadd.f32 %v9412_v10, %v8688_v13 }
0x4539   : > { %v8696_v54 = vadd.f32 %v8695_v15, %v11529_v5  ;;  %v9417_v5 = vld [vmem:[%s11824_s29 + $0x20] sm:$0xff] }
0x453a   : > { %10235 = vmatpush3.msra.mxu0 %v9417_v5  ;;  %v9440_v5 = vld [vmem:[%s11840_s14] ss:$0 sm:$0xff] }
0x453b   : > { %v8701_v16 = vsel %vm1371_vm1, %v8696_v54, 0.0  ;;  %10258 = vmatprep.subr.mxu0 %v10514_v1 }
0x453c   : > { %8702 = vadd.xlane.f32.xlu1 %v8701_v16  ;;  %v8972_v16 = vld [vmem:[%s11838_s25 + $0x10] sm:$0xff] }
0x45c5   : > { %v8703_v24 = vpop.xlane.xlu1 %8702 }
0x45c6   : > { %v8704_v17 = vmul.f32 0.03125, %v8703_v24  ;;  %v8971_v24 = vld [vmem:[%s11838_s25 + $0x8] sm:$0xff] }
0x45c8   : > { %v8705_v18 = vsub.f32 %v8696_v54, %v8704_v17  ;;  %v8973_v54 = vld [vmem:[%s11838_s25 + $0x18] sm:$0xff]  ;;  %v8970_v17 = vld [vmem:[%s11838_s25] sm:$0xff] }
0x45ca   : > { %v8706_v19 = vmul.f32 %v8705_v18, %v8705_v18 }
0x45cc   : > { %v8707_v20 = vsel %vm1371_vm1, %v8706_v19, 0.0 }
0x45cd   : > { %8708 = vadd.xlane.f32.xlu1 %v8707_v20 }
0x4656   : > { %v8709_v26 = vpop.xlane.xlu1 %8708 }
0x4657   : > { %v8710_v27 = vmul.f32 0.03125, %v8709_v26 }
0x4659   : > { %v8711_v62 = vadd.f32 1e-06, %v8710_v27 }
0x465b   : > { %10453 = vrsqrt.f32 %v8711_v62  ;;  %v9441_v62 = vld [vmem:[%s11841_s19] ss:$0 sm:$0xff] }
0x4668   : > { %v10454_v28 = vpop.eup %10453 }
0x4669   : > { %v8713_v30 = vmul.f32 %v10454_v28, %v8705_v18 }
0x466b   : > { %v8720_v32 = vmul.f32 %v9415_v29, %v8713_v30 }
0x466d   : > { %v8727_v33 = vadd.f32 %v9416_v31, %v8720_v32 }
0x466f   : > { %10237 = vmatmul.mubr.msk.f32.vlgmr.msra.gmra.mxu0 %vm1371_vm1, %v8727_v33 }
0x4670   : > { %10266 = vmatprep.mubr.msk.f32.mxu0 %vm10515_vm0, %v10514_v1  ;;  %10259 = vmatpush3.msra.mxu0 %v8973_v54 }
0x4671   : > { %10260 = vmatprep.subr.mxu0 %v10514_v1 }
0x4672   : > { %10261 = vmatpush3.msra.mxu0 %v8972_v16 }
0x4673   : > { %10262 = vmatprep.subr.mxu0 %v10514_v1 }
0x4674   : > { %10263 = vmatpush3.msra.mxu0 %v8971_v24 }
0x4675   : > { %10264 = vmatprep.subr.mxu0 %v10514_v1 }
0x4676   : > { %10265 = vmatpush3.msra.mxu0 %v8970_v17 }
0x472f   : > { %v8821_v44 = vpop.f32.mrf.mxu0 }
0x4730   : > { %v8822_v45 = vadd.f32 %v9431_v43, %v8821_v44 }
0x4731   : > { %v10238_v47 = vpop.f32.mrf.mxu0 }
0x4732   : > { %v8826_v48 = vmul.f32 0.70710677, %v8822_v45  ;;  %v8825_v50 = vmul.f32 0.5, %v8822_v45 }
0x4734   : > { %10455 = verf.f32 %v8826_v48 }
0x4741   : > { %v10456_v8 = vpop.eup %10455 }
0x4742   : > { %v8828_v52 = vadd.f32 1.0, %v10456_v8 }
0x4744   : > { %v8829_v53 = vmul.f32 %v8828_v52, %v8825_v50 }
0x4746   : > { %10256 = vmatmul.mubr.msk.f32.vlgmr.msra.gmra.mxu1 %vm2554_vm3, %v8829_v53 }
0x4806   : > { %v8905_v14 = vpop.f32.mrf.mxu1 }
0x4807   : > { %v8906_v57 = vadd.f32 %v9433_v55, %v8905_v14 }
0x4808   : > { %v10257_v58 = vpop.f32.mrf.mxu1 }
0x4809   : > { %v8909_v59 = vadd.f32 %v8906_v57, %v8727_v33 }
0x480b   : > { %v8914_v39 = vsel %vm1371_vm1, %v8909_v59, 0.0 }
0x480c   : > { %8915 = vadd.xlane.f32.xlu1 %v8914_v39 }
0x4895   : > { %v8916_v60 = vpop.xlane.xlu1 %8915 }
0x4896   : > { %v8917_v61 = vmul.f32 0.03125, %v8916_v60 }
0x4898   : > { %v8918_v63 = vsub.f32 %v8909_v59, %v8917_v61 }
0x489a   : > { %v8919_v0 = vmul.f32 %v8918_v63, %v8918_v63 }
0x489c   : > { %v8920_v2 = vsel %vm1371_vm1, %v8919_v0, 0.0 }
0x489d   : > { %8921 = vadd.xlane.f32.xlu1 %v8920_v2 }
0x4926   : > { %v8922_v3 = vpop.xlane.xlu1 %8921 }
0x4927   : > { %v8923_v4 = vmul.f32 0.03125, %v8922_v3 }
0x4929   : > { %v8924_v6 = vadd.f32 1e-06, %v8923_v4 }
0x492b   : > { %10457 = vrsqrt.f32 %v8924_v6 }
0x4938   : > { %v10458_v56 = vpop.eup %10457 }
0x4939   : > { %v8926_v22 = vmul.f32 %v10458_v56, %v8918_v63 }
0x493b   : > { %v8933_v12 = vmul.f32 %v9437_v7, %v8926_v22 }
0x493d   : > { %v8940_v34 = vadd.f32 %v9438_v9, %v8933_v12 }
0x493f   : > { %v8943_v46 = vsel %vm1371_vm1, %v8940_v34, 0.0 }
0x4940   : > { %8944 = vadd.xlane.f32.xlu1 %v8943_v46 }
0x49c9   : > { %v8945_v10 = vpop.xlane.xlu1 %8944 }
0x49ca   : > { %v8946_v11 = vmul.f32 0.03125, %v8945_v10 }
0x49cc   : > { %v8947_v13 = vsub.f32 %v8940_v34, %v8946_v11 }
0x49ce   : > { %v8948_v51 = vmul.f32 %v8947_v13, %v8947_v13 }
0x49d0   : > { %v8949_v15 = vsel %vm1371_vm1, %v8948_v51, 0.0 }
0x49d1   : > { %8950 = vadd.xlane.f32.xlu1 %v8949_v15 }
0x4a5a   : > { %v8951_v18 = vpop.xlane.xlu1 %8950 }
0x4a5b   : > { %v8952_v19 = vmul.f32 0.03125, %v8951_v18 }
0x4a5d   : > { %v8953_v20 = vadd.f32 1e-06, %v8952_v19 }
0x4a5f   : > { %10459 = vrsqrt.f32 %v8953_v20 }
0x4a6c   : > { %v10460_v21 = vpop.eup %10459 }
0x4a6d   : > { %v8955_v25 = vmul.f32 %v10460_v21, %v8947_v13 }
0x4a6f   : > { %v8962_v26 = vmul.f32 %v9439_v23, %v8955_v25 }
0x4a71   : > { %v8969_v27 = vadd.f32 %v9440_v5, %v8962_v26 }
0x4a73   : > { %10267 = vmatmul.mubr.msk.f32.vlgmr.msra.gmra.mxu0 %vm1371_vm1, %v8969_v27 }
0x4b33   : > { %v9050_v28 = vpop.f32.mrf.mxu0 }
0x4b34   : > { %v9051_v29 = vadd.f32 %v9441_v62, %v9050_v28 }
0x4b35   : > { %v10268_v30 = vpop.f32.mrf.mxu0 }
0x4b36   : > { %9054 = vst [vmem:[%s1357_s11] sm:$0xff] %v9051_v29 }
0x4b37 PF: > { %s11844_s18 = sld [smem:[#allocation46_spill]] }
0x4b3d   : > { %s97_s22 = sadd.s32 1, %s11844_s18  }
0x4b3e   : > { %p94_p4 = scmp.ge.s32.totalorder %s97_s22, 4  }
0x4b40   :  { %96 = sbr.rel (!%p94_p4) target bundleno = 105 (0x69), region = 309 }

</bundles_post_ra>
